<compile_context>
chip_gen: v7x
topology: tpu7x:2x2x1
jax: 0.10.0
libtpu: 0.0.40
codegen_flags: <defaults>
</compile_context>

<pallas_src>
import functools
import math

import jax
import jax.numpy as jnp
from jax import lax
from jax.experimental import pallas as pl
from jax.experimental.pallas import tpu as pltpu

_LN_EPS = 1e-5
_NEG_INF = -1e30


def _layernorm(x, gamma, beta):
    mu = jnp.mean(x, axis=-1, keepdims=True)
    var = jnp.mean(jnp.square(x - mu), axis=-1, keepdims=True)
    return (x - mu) * lax.rsqrt(var + _LN_EPS) * gamma + beta


def _clip_layer_kernel(x_ref, mask_ref, g1_ref, be1_ref, win_ref, bin_ref,
                       wout_ref, bout_ref, g2_ref, be2_ref, w1_ref, b1_ref,
                       w2_ref, b2_ref, o_ref, ctx_ref, *, n_head):
    bt, seq, d = x_ref.shape
    rows = bt * seq
    dh = d // n_head
    scale = 1.0 / math.sqrt(dh)
    bf16 = jnp.bfloat16

    x = x_ref[...].astype(jnp.float32).reshape(rows, d)    # (rows, D)
    mask = mask_ref[...]                                    # (T, T) additive f32

    # ---- LayerNorm 1 + fused QKV projection (bf16 x bf16 -> f32 acc) -----
    h = _layernorm(x, g1_ref[...], be1_ref[...])
    qkv = jnp.dot(h.astype(bf16), win_ref[...],
                  preferred_element_type=jnp.float32) + bin_ref[...]  # (rows, 3D)

    # ---- causal attention: per sequence / per head; each head writes its
    # output into a lane slice of a VMEM scratch context buffer so a single
    # well-shaped (rows, D) @ (D, D) out-projection can follow (K = D, not dh).
    # Note: for dh < 128 (e.g. CLIP-L dh=64), permute W_in's columns offline so
    # these lane slices stay 128-aligned; at dh=128 they already are.
    for b in range(bt):
        r0 = b * seq
        for hh in range(n_head):
            lo = hh * dh
            qh = qkv[r0:r0 + seq, lo:lo + dh].astype(bf16)
            kh = qkv[r0:r0 + seq, d + lo:d + lo + dh].astype(bf16)
            vh = qkv[r0:r0 + seq, 2 * d + lo:2 * d + lo + dh].astype(bf16)
            s = lax.dot_general(qh, kh, (((1,), (1,)), ((), ())),
                                preferred_element_type=jnp.float32)
            s = s * scale + mask                            # masked logits (f32)
            s = s - jnp.max(s, axis=-1, keepdims=True)
            p = jnp.exp(s)
            p = p * pl.reciprocal(jnp.sum(p, axis=-1, keepdims=True),
                                  approx=True)              # EUP divide
            ctx_ref[r0:r0 + seq, lo:lo + dh] = jnp.dot(
                p.astype(bf16), vh, preferred_element_type=jnp.float32)

    attn = jnp.dot(ctx_ref[...].astype(bf16), wout_ref[...],
                   preferred_element_type=jnp.float32)
    x = x + attn + bout_ref[...]                            # residual + out bias

    # ---- LayerNorm 2 + QuickGELU MLP + residual ---------------------------
    h = _layernorm(x, g2_ref[...], be2_ref[...])
    m = jnp.dot(h.astype(bf16), w1_ref[...],
                preferred_element_type=jnp.float32) + b1_ref[...]
    m = m * jax.nn.sigmoid(1.702 * m)                       # QuickGELU (f32)
    m = jnp.dot(m.astype(bf16), w2_ref[...],
                preferred_element_type=jnp.float32) + b2_ref[...]

    o_ref[...] = (x + m).reshape(bt, seq, d).astype(o_ref.dtype)


def _pick_block_batch(batch, seq, target_rows=256):
    """Largest divisor of `batch` that keeps >= 2 grid steps (v7x megacore)
    while keeping the per-step row count (matmul M) within a sane budget."""
    best = 1
    for cand in range(1, batch + 1):
        if batch % cand:
            continue
        if batch >= 2 and batch // cand < 2:
            continue                         # keep both v7x TensorCores busy
        if cand * seq <= max(2 * target_rows, seq):
            best = cand
    return best


def clip_layer(x, params, *, n_head, block_batch=None):
    """x: (B, T, D) f32.  Weight matrices stored (in_features, out_features)."""
    (ln1_g, ln1_b, w_in, b_in, w_out, b_out,
     ln2_g, ln2_b, w1, b1, w2, b2) = params
    batch, seq, d = x.shape
    assert d % n_head == 0
    assert w_in.shape == (d, 3 * d) and w_out.shape == (d, d)
    assert w1.shape == (d, 4 * d) and w2.shape == (4 * d, d)

    bt = block_batch or _pick_block_batch(batch, seq)
    assert batch % bt == 0
    rows = bt * seq

    # bf16 weights: ~3x MXU throughput and half the resident-weight VMEM.
    bf = lambda a: a.astype(jnp.bfloat16)
    w_in, w_out, w1, w2 = bf(w_in), bf(w_out), bf(w1), bf(w2)

    # Per-channel params stay f32, lane-dense (1, N) rows.
    rv = lambda a: a.reshape(1, -1).astype(jnp.float32)
    ln1_g, ln1_b, b_in, b_out, ln2_g, ln2_b, b1, b2 = map(
        rv, (ln1_g, ln1_b, b_in, b_out, ln2_g, ln2_b, b1, b2))

    # Additive causal mask, built once and kept resident in VMEM.
    keep = jnp.tril(jnp.ones((seq, seq), dtype=bool))
    mask = jnp.where(keep, 0.0, _NEG_INF).astype(jnp.float32)

    const_args = (mask, ln1_g, ln1_b, w_in, b_in, w_out, b_out,
                  ln2_g, ln2_b, w1, b1, w2, b2)

    # Explicit VMEM budget: single-buffered weights + double-buffered
    # activation blocks + f32 temporaries/scratch (+50% headroom, 32 MiB floor,
    # capped below v7x's 64 MiB per-TC physical VMEM).
    nbytes = lambda a: a.size * a.dtype.itemsize
    weight_bytes = sum(nbytes(a) for a in const_args)
    act_bytes = 2 * 2 * rows * d * x.dtype.itemsize          # in + out blocks
    live_bytes = rows * (d + 3 * d + 4 * d) * 4 + rows * d * 4  # temps + ctx
    vmem_limit = int(1.5 * (weight_bytes + act_bytes + live_bytes)) + (2 << 20)
    vmem_limit = min(max(vmem_limit, 32 << 20), 56 << 20)

    flops = 24 * batch * seq * d * d + 4 * batch * seq * seq * d
    cost = pl.CostEstimate(
        flops=flops,
        transcendentals=batch * seq * (4 * d + n_head * seq),
        bytes_accessed=2 * batch * seq * d * x.dtype.itemsize + weight_bytes)

    kernel = functools.partial(_clip_layer_kernel, n_head=n_head)
    io_spec = pl.BlockSpec((bt, seq, d), lambda b: (b, 0, 0))

    def call(single_buffer_weights):
        def const_spec(a):
            idx = lambda b, _nd=a.ndim: (0,) * _nd    # fetched once, resident
            if single_buffer_weights:
                return pl.BlockSpec(a.shape, idx, pipeline_mode=pl.Buffered(1))
            return pl.BlockSpec(a.shape, idx)

        return pl.pallas_call(
            kernel,
            out_shape=jax.ShapeDtypeStruct((batch, seq, d), x.dtype),
            grid_spec=pltpu.PrefetchScalarGridSpec(
                num_scalar_prefetch=0,
                grid=(batch // bt,),
                in_specs=[io_spec] + [const_spec(a) for a in const_args],
                out_specs=io_spec,
                scratch_shapes=[pltpu.VMEM((rows, d), jnp.float32)]),
            compiler_params=pltpu.CompilerParams(
                dimension_semantics=("parallel",),
                vmem_limit_bytes=vmem_limit),
            cost_estimate=cost,
        )(x, *const_args)

    try:
        # Preferred: weights single-buffered (no dead duplicate buffer).
        return call(True)
    except Exception:
        # JAX build without Buffered(1) support: default 2-deep buffering.
        return call(False)


def clip_layer_ref(x, params, n_head):
    """Pure-JAX f32 (HIGHEST precision) reference of CLIPLayer.forward."""
    (ln1_g, ln1_b, w_in, b_in, w_out, b_out,
     ln2_g, ln2_b, w1, b1, w2, b2) = params
    B, T, D = x.shape
    dh = D // n_head
    hp = lax.Precision.HIGHEST

    def ln(v, g, b):
        mu = jnp.mean(v, axis=-1, keepdims=True)
        var = jnp.mean((v - mu) ** 2, axis=-1, keepdims=True)
        return (v - mu) / jnp.sqrt(var + _LN_EPS) * g + b

    res = x
    h = ln(x, ln1_g, ln1_b)
    qkv = jnp.dot(h, w_in, precision=hp) + b_in
    q, k, v = jnp.split(qkv, 3, axis=-1)
    q = q.reshape(B, T, n_head, dh).transpose(0, 2, 1, 3)
    k = k.reshape(B, T, n_head, dh).transpose(0, 2, 1, 3)
    v = v.reshape(B, T, n_head, dh).transpose(0, 2, 1, 3)
    s = jnp.einsum("bhqd,bhkd->bhqk", q, k, precision=hp) / math.sqrt(dh)
    keep = jnp.tril(jnp.ones((T, T), dtype=bool))
    s = jnp.where(keep, s, _NEG_INF)
    p = jax.nn.softmax(s, axis=-1)
    o = jnp.einsum("bhqk,bhkd->bhqd", p, v, precision=hp)
    o = o.transpose(0, 2, 1, 3).reshape(B, T, D)
    o = jnp.dot(o, w_out, precision=hp) + b_out
    x1 = res + o

    res = x1
    h = ln(x1, ln2_g, ln2_b)
    m = jnp.dot(h, w1, precision=hp) + b1
    m = m * jax.nn.sigmoid(1.702 * m)
    m = jnp.dot(m, w2, precision=hp) + b2
    return res + m


if __name__ == "__main__":
    batch, seq, n_embd, n_head = 2, 8, 256, 2   # d_head = 128 (lane-aligned)

    key = jax.random.PRNGKey(0)
    ks = jax.random.split(key, 14)
    w = 0.05

    x = jax.random.normal(ks[0], (batch, seq, n_embd), jnp.float32)

    ln1_g = 1.0 + 0.1 * jax.random.normal(ks[1], (n_embd,), jnp.float32)
    ln1_b = 0.1 * jax.random.normal(ks[2], (n_embd,), jnp.float32)
    w_in  = w * jax.random.normal(ks[3], (n_embd, 3 * n_embd), jnp.float32)
    b_in  = w * jax.random.normal(ks[4], (3 * n_embd,), jnp.float32)
    w_out = w * jax.random.normal(ks[5], (n_embd, n_embd), jnp.float32)
    b_out = w * jax.random.normal(ks[6], (n_embd,), jnp.float32)
    ln2_g = 1.0 + 0.1 * jax.random.normal(ks[7], (n_embd,), jnp.float32)
    ln2_b = 0.1 * jax.random.normal(ks[8], (n_embd,), jnp.float32)
    w1    = w * jax.random.normal(ks[9], (n_embd, 4 * n_embd), jnp.float32)
    b1    = w * jax.random.normal(ks[10], (4 * n_embd,), jnp.float32)
    w2    = w * jax.random.normal(ks[11], (4 * n_embd, n_embd), jnp.float32)
    b2    = w * jax.random.normal(ks[12], (n_embd,), jnp.float32)

    params = (ln1_g, ln1_b, w_in, b_in, w_out, b_out,
              ln2_g, ln2_b, w1, b1, w2, b2)

    out = clip_layer(x, params, n_head=n_head)
    out = jax.block_until_ready(out)

    ref = clip_layer_ref(x, params, n_head)

    assert out.shape == (batch, seq, n_embd)
    # Tolerance reflects bf16 MXU operands with f32 accumulation (per-matmul
    # relative error ~2^-8, chained through QKV/attention/out-proj/MLP with
    # contraction depths up to 4*D) vs. the f32 HIGHEST-precision reference.
    max_err = float(jnp.max(jnp.abs(out - ref)))
    assert max_err < 5e-2, f"mismatch vs reference: max_err={max_err}"
    print("KERNEL_OK")
</pallas_src>

<mosaic_0001>
module attributes {stable_mosaic.version = 11 : i64} {
  func.func @_clip_layer_kernel(%arg0: i32, %arg1: memref<1x8x256xf32, #tpu.memory_space<vmem>>, %arg2: memref<8x8xf32, #tpu.memory_space<vmem>>, %arg3: memref<1x256xf32, #tpu.memory_space<vmem>>, %arg4: memref<1x256xf32, #tpu.memory_space<vmem>>, %arg5: memref<256x768xbf16, #tpu.memory_space<vmem>>, %arg6: memref<1x768xf32, #tpu.memory_space<vmem>>, %arg7: memref<256x256xbf16, #tpu.memory_space<vmem>>, %arg8: memref<1x256xf32, #tpu.memory_space<vmem>>, %arg9: memref<1x256xf32, #tpu.memory_space<vmem>>, %arg10: memref<1x256xf32, #tpu.memory_space<vmem>>, %arg11: memref<256x1024xbf16, #tpu.memory_space<vmem>>, %arg12: memref<1x1024xf32, #tpu.memory_space<vmem>>, %arg13: memref<1024x256xbf16, #tpu.memory_space<vmem>>, %arg14: memref<1x256xf32, #tpu.memory_space<vmem>>, %arg15: memref<1x8x256xf32, #tpu.memory_space<vmem>>, %arg16: memref<8x256xf32, #tpu.memory_space<vmem>>) attributes {dimension_semantics = [#tpu.dimension_semantics<parallel>], iteration_bounds = array<i64: 2>, scalar_prefetch = 0 : i64, scratch_operands = 1 : i64, tpu.core_type = #tpu.core_type<tc>, window_params = [{transform_indices = @transform_0, window_bounds = array<i64: 1, 8, 256>}, {pipeline_mode = #tpu.pipeline_mode<synchronous>, transform_indices = @transform_1, window_bounds = array<i64: 8, 8>}, {pipeline_mode = #tpu.pipeline_mode<synchronous>, transform_indices = @transform_2, window_bounds = array<i64: 1, 256>}, {pipeline_mode = #tpu.pipeline_mode<synchronous>, transform_indices = @transform_3, window_bounds = array<i64: 1, 256>}, {pipeline_mode = #tpu.pipeline_mode<synchronous>, transform_indices = @transform_4, window_bounds = array<i64: 256, 768>}, {pipeline_mode = #tpu.pipeline_mode<synchronous>, transform_indices = @transform_5, window_bounds = array<i64: 1, 768>}, {pipeline_mode = #tpu.pipeline_mode<synchronous>, transform_indices = @transform_6, window_bounds = array<i64: 256, 256>}, {pipeline_mode = #tpu.pipeline_mode<synchronous>, transform_indices = @transform_7, window_bounds = array<i64: 1, 256>}, {pipeline_mode = #tpu.pipeline_mode<synchronous>, transform_indices = @transform_8, window_bounds = array<i64: 1, 256>}, {pipeline_mode = #tpu.pipeline_mode<synchronous>, transform_indices = @transform_9, window_bounds = array<i64: 1, 256>}, {pipeline_mode = #tpu.pipeline_mode<synchronous>, transform_indices = @transform_10, window_bounds = array<i64: 256, 1024>}, {pipeline_mode = #tpu.pipeline_mode<synchronous>, transform_indices = @transform_11, window_bounds = array<i64: 1, 1024>}, {pipeline_mode = #tpu.pipeline_mode<synchronous>, transform_indices = @transform_12, window_bounds = array<i64: 1024, 256>}, {pipeline_mode = #tpu.pipeline_mode<synchronous>, transform_indices = @transform_13, window_bounds = array<i64: 1, 256>}, {transform_indices = @transform_14, window_bounds = array<i64: 1, 8, 256>}]} {
    %c0 = arith.constant 0 : index
    %c0_0 = arith.constant 0 : index
    %c0_1 = arith.constant 0 : index
    %0 = vector.load %arg1[%c0, %c0_0, %c0_1] : memref<1x8x256xf32, #tpu.memory_space<vmem>>, vector<1x8x256xf32>
    %1 = vector.shape_cast %0 : vector<1x8x256xf32> to vector<8x256xf32>
    %c0_2 = arith.constant 0 : index
    %c0_3 = arith.constant 0 : index
    %2 = vector.load %arg2[%c0_2, %c0_3] : memref<8x8xf32, #tpu.memory_space<vmem>>, vector<8x8xf32>
    %c0_4 = arith.constant 0 : index
    %c0_5 = arith.constant 0 : index
    %3 = vector.load %arg3[%c0_4, %c0_5] : memref<1x256xf32, #tpu.memory_space<vmem>>, vector<1x256xf32>
    %c0_6 = arith.constant 0 : index
    %c0_7 = arith.constant 0 : index
    %4 = vector.load %arg4[%c0_6, %c0_7] : memref<1x256xf32, #tpu.memory_space<vmem>>, vector<1x256xf32>
    %cst = arith.constant dense<0.000000e+00> : vector<8xf32>
    %5 = vector.multi_reduction <add>, %1, %cst [1] : vector<8x256xf32> to vector<8xf32>
    %6 = vector.shape_cast %5 : vector<8xf32> to vector<8x1xf32>
    %cst_8 = arith.constant 2.560000e+02 : f32
    %7 = vector.broadcast %cst_8 : f32 to vector<8x1xf32>
    %8 = arith.divf %6, %7 : vector<8x1xf32>
    %9 = vector.broadcast %8 : vector<8x1xf32> to vector<8x256xf32>
    %10 = arith.subf %1, %9 : vector<8x256xf32>
    %11 = arith.mulf %10, %10 : vector<8x256xf32>
    %cst_9 = arith.constant dense<0.000000e+00> : vector<8xf32>
    %12 = vector.multi_reduction <add>, %11, %cst_9 [1] : vector<8x256xf32> to vector<8xf32>
    %13 = vector.shape_cast %12 : vector<8xf32> to vector<8x1xf32>
    %cst_10 = arith.constant 2.560000e+02 : f32
    %14 = vector.broadcast %cst_10 : f32 to vector<8x1xf32>
    %15 = arith.divf %13, %14 : vector<8x1xf32>
    %16 = vector.broadcast %8 : vector<8x1xf32> to vector<8x256xf32>
    %17 = arith.subf %1, %16 : vector<8x256xf32>
    %cst_11 = arith.constant 9.99999974E-6 : f32
    %18 = vector.broadcast %cst_11 : f32 to vector<8x1xf32>
    %19 = arith.addf %15, %18 : vector<8x1xf32>
    %20 = math.rsqrt %19 : vector<8x1xf32>
    %21 = vector.broadcast %20 : vector<8x1xf32> to vector<8x256xf32>
    %22 = arith.mulf %17, %21 : vector<8x256xf32>
    %23 = vector.broadcast %3 : vector<1x256xf32> to vector<8x256xf32>
    %24 = arith.mulf %22, %23 : vector<8x256xf32>
    %25 = vector.broadcast %4 : vector<1x256xf32> to vector<8x256xf32>
    %26 = arith.addf %24, %25 : vector<8x256xf32>
    %27 = arith.truncf %26 : vector<8x256xf32> to vector<8x256xbf16>
    %c0_12 = arith.constant 0 : index
    %c0_13 = arith.constant 0 : index
    %28 = vector.load %arg5[%c0_12, %c0_13] : memref<256x768xbf16, #tpu.memory_space<vmem>>, vector<256x768xbf16>
    %cst_14 = arith.constant dense<0.000000e+00> : vector<8x768xf32>
    %29 = tpu.matmul %27, %28, %cst_14 {dimension_numbers = #tpu.dot_dimension_numbers<[1], [0], [0], [1], [0, 0, 1, 1], [], []>} : vector<8x256xbf16>, vector<256x768xbf16>, vector<8x768xf32> -> vector<8x768xf32>
    %c0_15 = arith.constant 0 : index
    %c0_16 = arith.constant 0 : index
    %30 = vector.load %arg6[%c0_15, %c0_16] : memref<1x768xf32, #tpu.memory_space<vmem>>, vector<1x768xf32>
    %31 = vector.broadcast %30 : vector<1x768xf32> to vector<8x768xf32>
    %32 = arith.addf %29, %31 : vector<8x768xf32>
    %33 = vector.extract_strided_slice %32 {offsets = [0, 0], sizes = [8, 128], strides = [1, 1]} : vector<8x768xf32> to vector<8x128xf32>
    %34 = arith.truncf %33 : vector<8x128xf32> to vector<8x128xbf16>
    %35 = vector.extract_strided_slice %32 {offsets = [0, 256], sizes = [8, 128], strides = [1, 1]} : vector<8x768xf32> to vector<8x128xf32>
    %36 = arith.truncf %35 : vector<8x128xf32> to vector<8x128xbf16>
    %37 = vector.extract_strided_slice %32 {offsets = [0, 512], sizes = [8, 128], strides = [1, 1]} : vector<8x768xf32> to vector<8x128xf32>
    %38 = arith.truncf %37 : vector<8x128xf32> to vector<8x128xbf16>
    %cst_17 = arith.constant dense<0.000000e+00> : vector<8x8xf32>
    %39 = tpu.matmul %34, %36, %cst_17 {dimension_numbers = #tpu.dot_dimension_numbers<[1], [1], [0], [0], [0, 0, 1, 0], [], []>} : vector<8x128xbf16>, vector<8x128xbf16>, vector<8x8xf32> -> vector<8x8xf32>
    %cst_18 = arith.constant 0.0883883461 : f32
    %40 = vector.broadcast %cst_18 : f32 to vector<8x8xf32>
    %41 = arith.mulf %39, %40 : vector<8x8xf32>
    %42 = arith.addf %41, %2 : vector<8x8xf32>
    %cst_19 = arith.constant dense<0xFF800000> : vector<8xf32>
    %43 = vector.multi_reduction <maximumf>, %42, %cst_19 [1] : vector<8x8xf32> to vector<8xf32>
    %44 = vector.shape_cast %43 : vector<8xf32> to vector<8x1xf32>
    %45 = vector.broadcast %44 : vector<8x1xf32> to vector<8x8xf32>
    %46 = arith.subf %42, %45 : vector<8x8xf32>
    %47 = math.exp %46 : vector<8x8xf32>
    %cst_20 = arith.constant dense<0.000000e+00> : vector<8xf32>
    %48 = vector.multi_reduction <add>, %47, %cst_20 [1] : vector<8x8xf32> to vector<8xf32>
    %49 = vector.shape_cast %48 : vector<8xf32> to vector<8x1xf32>
    %50 = tpu.reciprocal %49 {approx = true} : vector<8x1xf32> -> vector<8x1xf32>
    %51 = vector.broadcast %50 : vector<8x1xf32> to vector<8x8xf32>
    %52 = arith.mulf %47, %51 : vector<8x8xf32>
    %53 = arith.truncf %52 : vector<8x8xf32> to vector<8x8xbf16>
    %cst_21 = arith.constant dense<0.000000e+00> : vector<8x128xf32>
    %54 = tpu.matmul %53, %38, %cst_21 {dimension_numbers = #tpu.dot_dimension_numbers<[1], [0], [0], [1], [0, 0, 1, 1], [], []>} : vector<8x8xbf16>, vector<8x128xbf16>, vector<8x128xf32> -> vector<8x128xf32>
    %c0_22 = arith.constant 0 : index
    %c0_23 = arith.constant 0 : index
    %55 = vector.load %arg16[%c0_22, %c0_23] : memref<8x256xf32, #tpu.memory_space<vmem>>, vector<8x128xf32>
    tpu.vector_store %arg16[%c0_22, %c0_23], %54 {strides = array<i32>} : memref<8x256xf32, #tpu.memory_space<vmem>>, vector<8x128xf32>,
    %56 = vector.extract_strided_slice %32 {offsets = [0, 128], sizes = [8, 128], strides = [1, 1]} : vector<8x768xf32> to vector<8x128xf32>
    %57 = arith.truncf %56 : vector<8x128xf32> to vector<8x128xbf16>
    %58 = vector.extract_strided_slice %32 {offsets = [0, 384], sizes = [8, 128], strides = [1, 1]} : vector<8x768xf32> to vector<8x128xf32>
    %59 = arith.truncf %58 : vector<8x128xf32> to vector<8x128xbf16>
    %60 = vector.extract_strided_slice %32 {offsets = [0, 640], sizes = [8, 128], strides = [1, 1]} : vector<8x768xf32> to vector<8x128xf32>
    %61 = arith.truncf %60 : vector<8x128xf32> to vector<8x128xbf16>
    %cst_24 = arith.constant dense<0.000000e+00> : vector<8x8xf32>
    %62 = tpu.matmul %57, %59, %cst_24 {dimension_numbers = #tpu.dot_dimension_numbers<[1], [1], [0], [0], [0, 0, 1, 0], [], []>} : vector<8x128xbf16>, vector<8x128xbf16>, vector<8x8xf32> -> vector<8x8xf32>
    %cst_25 = arith.constant 0.0883883461 : f32
    %63 = vector.broadcast %cst_25 : f32 to vector<8x8xf32>
    %64 = arith.mulf %62, %63 : vector<8x8xf32>
    %65 = arith.addf %64, %2 : vector<8x8xf32>
    %cst_26 = arith.constant dense<0xFF800000> : vector<8xf32>
    %66 = vector.multi_reduction <maximumf>, %65, %cst_26 [1] : vector<8x8xf32> to vector<8xf32>
    %67 = vector.shape_cast %66 : vector<8xf32> to vector<8x1xf32>
    %68 = vector.broadcast %67 : vector<8x1xf32> to vector<8x8xf32>
    %69 = arith.subf %65, %68 : vector<8x8xf32>
    %70 = math.exp %69 : vector<8x8xf32>
    %cst_27 = arith.constant dense<0.000000e+00> : vector<8xf32>
    %71 = vector.multi_reduction <add>, %70, %cst_27 [1] : vector<8x8xf32> to vector<8xf32>
    %72 = vector.shape_cast %71 : vector<8xf32> to vector<8x1xf32>
    %73 = tpu.reciprocal %72 {approx = true} : vector<8x1xf32> -> vector<8x1xf32>
    %74 = vector.broadcast %73 : vector<8x1xf32> to vector<8x8xf32>
    %75 = arith.mulf %70, %74 : vector<8x8xf32>
    %76 = arith.truncf %75 : vector<8x8xf32> to vector<8x8xbf16>
    %cst_28 = arith.constant dense<0.000000e+00> : vector<8x128xf32>
    %77 = tpu.matmul %76, %61, %cst_28 {dimension_numbers = #tpu.dot_dimension_numbers<[1], [0], [0], [1], [0, 0, 1, 1], [], []>} : vector<8x8xbf16>, vector<8x128xbf16>, vector<8x128xf32> -> vector<8x128xf32>
    %c0_29 = arith.constant 0 : index
    %c128 = arith.constant 128 : index
    %78 = vector.load %arg16[%c0_29, %c128] : memref<8x256xf32, #tpu.memory_space<vmem>>, vector<8x128xf32>
    tpu.vector_store %arg16[%c0_29, %c128], %77 {strides = array<i32>} : memref<8x256xf32, #tpu.memory_space<vmem>>, vector<8x128xf32>,
    %c0_30 = arith.constant 0 : index
    %c0_31 = arith.constant 0 : index
    %79 = vector.load %arg16[%c0_30, %c0_31] : memref<8x256xf32, #tpu.memory_space<vmem>>, vector<8x256xf32>
    %80 = arith.truncf %79 : vector<8x256xf32> to vector<8x256xbf16>
    %c0_32 = arith.constant 0 : index
    %c0_33 = arith.constant 0 : index
    %81 = vector.load %arg7[%c0_32, %c0_33] : memref<256x256xbf16, #tpu.memory_space<vmem>>, vector<256x256xbf16>
    %cst_34 = arith.constant dense<0.000000e+00> : vector<8x256xf32>
    %82 = tpu.matmul %80, %81, %cst_34 {dimension_numbers = #tpu.dot_dimension_numbers<[1], [0], [0], [1], [0, 0, 1, 1], [], []>} : vector<8x256xbf16>, vector<256x256xbf16>, vector<8x256xf32> -> vector<8x256xf32>
    %83 = arith.addf %1, %82 : vector<8x256xf32>
    %c0_35 = arith.constant 0 : index
    %c0_36 = arith.constant 0 : index
    %84 = vector.load %arg8[%c0_35, %c0_36] : memref<1x256xf32, #tpu.memory_space<vmem>>, vector<1x256xf32>
    %85 = vector.broadcast %84 : vector<1x256xf32> to vector<8x256xf32>
    %86 = arith.addf %83, %85 : vector<8x256xf32>
    %c0_37 = arith.constant 0 : index
    %c0_38 = arith.constant 0 : index
    %87 = vector.load %arg9[%c0_37, %c0_38] : memref<1x256xf32, #tpu.memory_space<vmem>>, vector<1x256xf32>
    %c0_39 = arith.constant 0 : index
    %c0_40 = arith.constant 0 : index
    %88 = vector.load %arg10[%c0_39, %c0_40] : memref<1x256xf32, #tpu.memory_space<vmem>>, vector<1x256xf32>
    %cst_41 = arith.constant dense<0.000000e+00> : vector<8xf32>
    %89 = vector.multi_reduction <add>, %86, %cst_41 [1] : vector<8x256xf32> to vector<8xf32>
    %90 = vector.shape_cast %89 : vector<8xf32> to vector<8x1xf32>
    %cst_42 = arith.constant 2.560000e+02 : f32
    %91 = vector.broadcast %cst_42 : f32 to vector<8x1xf32>
    %92 = arith.divf %90, %91 : vector<8x1xf32>
    %93 = vector.broadcast %92 : vector<8x1xf32> to vector<8x256xf32>
    %94 = arith.subf %86, %93 : vector<8x256xf32>
    %95 = arith.mulf %94, %94 : vector<8x256xf32>
    %cst_43 = arith.constant dense<0.000000e+00> : vector<8xf32>
    %96 = vector.multi_reduction <add>, %95, %cst_43 [1] : vector<8x256xf32> to vector<8xf32>
    %97 = vector.shape_cast %96 : vector<8xf32> to vector<8x1xf32>
    %cst_44 = arith.constant 2.560000e+02 : f32
    %98 = vector.broadcast %cst_44 : f32 to vector<8x1xf32>
    %99 = arith.divf %97, %98 : vector<8x1xf32>
    %100 = vector.broadcast %92 : vector<8x1xf32> to vector<8x256xf32>
    %101 = arith.subf %86, %100 : vector<8x256xf32>
    %cst_45 = arith.constant 9.99999974E-6 : f32
    %102 = vector.broadcast %cst_45 : f32 to vector<8x1xf32>
    %103 = arith.addf %99, %102 : vector<8x1xf32>
    %104 = math.rsqrt %103 : vector<8x1xf32>
    %105 = vector.broadcast %104 : vector<8x1xf32> to vector<8x256xf32>
    %106 = arith.mulf %101, %105 : vector<8x256xf32>
    %107 = vector.broadcast %87 : vector<1x256xf32> to vector<8x256xf32>
    %108 = arith.mulf %106, %107 : vector<8x256xf32>
    %109 = vector.broadcast %88 : vector<1x256xf32> to vector<8x256xf32>
    %110 = arith.addf %108, %109 : vector<8x256xf32>
    %111 = arith.truncf %110 : vector<8x256xf32> to vector<8x256xbf16>
    %c0_46 = arith.constant 0 : index
    %c0_47 = arith.constant 0 : index
    %112 = vector.load %arg11[%c0_46, %c0_47] : memref<256x1024xbf16, #tpu.memory_space<vmem>>, vector<256x1024xbf16>
    %cst_48 = arith.constant dense<0.000000e+00> : vector<8x1024xf32>
    %113 = tpu.matmul %111, %112, %cst_48 {dimension_numbers = #tpu.dot_dimension_numbers<[1], [0], [0], [1], [0, 0, 1, 1], [], []>} : vector<8x256xbf16>, vector<256x1024xbf16>, vector<8x1024xf32> -> vector<8x1024xf32>
    %c0_49 = arith.constant 0 : index
    %c0_50 = arith.constant 0 : index
    %114 = vector.load %arg12[%c0_49, %c0_50] : memref<1x1024xf32, #tpu.memory_space<vmem>>, vector<1x1024xf32>
    %115 = vector.broadcast %114 : vector<1x1024xf32> to vector<8x1024xf32>
    %116 = arith.addf %113, %115 : vector<8x1024xf32>
    %cst_51 = arith.constant 1.702000e+00 : f32
    %117 = vector.broadcast %cst_51 : f32 to vector<8x1024xf32>
    %118 = arith.mulf %117, %116 : vector<8x1024xf32>
    %119 = arith.negf %118 : vector<8x1024xf32>
    %120 = math.exp %119 : vector<8x1024xf32>
    %cst_52 = arith.constant 1.000000e+00 : f32
    %121 = vector.broadcast %cst_52 : f32 to vector<8x1024xf32>
    %122 = arith.addf %121, %120 : vector<8x1024xf32>
    %123 = arith.divf %121, %122 : vector<8x1024xf32>
    %124 = arith.mulf %116, %123 : vector<8x1024xf32>
    %125 = arith.truncf %124 : vector<8x1024xf32> to vector<8x1024xbf16>
    %c0_53 = arith.constant 0 : index
    %c0_54 = arith.constant 0 : index
    %126 = vector.load %arg13[%c0_53, %c0_54] : memref<1024x256xbf16, #tpu.memory_space<vmem>>, vector<1024x256xbf16>
    %cst_55 = arith.constant dense<0.000000e+00> : vector<8x256xf32>
    %127 = tpu.matmul %125, %126, %cst_55 {dimension_numbers = #tpu.dot_dimension_numbers<[1], [0], [0], [1], [0, 0, 1, 1], [], []>} : vector<8x1024xbf16>, vector<1024x256xbf16>, vector<8x256xf32> -> vector<8x256xf32>
    %c0_56 = arith.constant 0 : index
    %c0_57 = arith.constant 0 : index
    %128 = vector.load %arg14[%c0_56, %c0_57] : memref<1x256xf32, #tpu.memory_space<vmem>>, vector<1x256xf32>
    %129 = vector.broadcast %128 : vector<1x256xf32> to vector<8x256xf32>
    %130 = arith.addf %127, %129 : vector<8x256xf32>
    %131 = arith.addf %86, %130 : vector<8x256xf32>
    %132 = vector.shape_cast %131 : vector<8x256xf32> to vector<1x8x256xf32>
    %c0_58 = arith.constant 0 : index
    %c0_59 = arith.constant 0 : index
    %c0_60 = arith.constant 0 : index
    %133 = vector.load %arg15[%c0_58, %c0_59, %c0_60] : memref<1x8x256xf32, #tpu.memory_space<vmem>>, vector<1x8x256xf32>
    tpu.vector_store %arg15[%c0_58, %c0_59, %c0_60], %132 {strides = array<i32>} : memref<1x8x256xf32, #tpu.memory_space<vmem>>, vector<1x8x256xf32>,
    return
  }
  func.func @transform_0(%arg0: i32) -> (i32, i32, i32) {
    %c0_i32 = arith.constant 0 : i32
    %c0_i32_0 = arith.constant 0 : i32
    %c0_i32_1 = arith.constant 0 : i32
    return %arg0, %c0_i32, %c0_i32_0 : i32, i32, i32
  }
  func.func @transform_1(%arg0: i32) -> (i32, i32) {
    %c0_i32 = arith.constant 0 : i32
    %c0_i32_0 = arith.constant 0 : i32
    %c0_i32_1 = arith.constant 0 : i32
    return %c0_i32, %c0_i32_0 : i32, i32
  }
  func.func @transform_2(%arg0: i32) -> (i32, i32) {
    %c0_i32 = arith.constant 0 : i32
    %c0_i32_0 = arith.constant 0 : i32
    %c0_i32_1 = arith.constant 0 : i32
    return %c0_i32, %c0_i32_0 : i32, i32
  }
  func.func @transform_3(%arg0: i32) -> (i32, i32) {
    %c0_i32 = arith.constant 0 : i32
    %c0_i32_0 = arith.constant 0 : i32
    %c0_i32_1 = arith.constant 0 : i32
    return %c0_i32, %c0_i32_0 : i32, i32
  }
  func.func @transform_4(%arg0: i32) -> (i32, i32) {
    %c0_i32 = arith.constant 0 : i32
    %c0_i32_0 = arith.constant 0 : i32
    %c0_i32_1 = arith.constant 0 : i32
    return %c0_i32, %c0_i32_0 : i32, i32
  }
  func.func @transform_5(%arg0: i32) -> (i32, i32) {
    %c0_i32 = arith.constant 0 : i32
    %c0_i32_0 = arith.constant 0 : i32
    %c0_i32_1 = arith.constant 0 : i32
    return %c0_i32, %c0_i32_0 : i32, i32
  }
  func.func @transform_6(%arg0: i32) -> (i32, i32) {
    %c0_i32 = arith.constant 0 : i32
    %c0_i32_0 = arith.constant 0 : i32
    %c0_i32_1 = arith.constant 0 : i32
    return %c0_i32, %c0_i32_0 : i32, i32
  }
  func.func @transform_7(%arg0: i32) -> (i32, i32) {
    %c0_i32 = arith.constant 0 : i32
    %c0_i32_0 = arith.constant 0 : i32
    %c0_i32_1 = arith.constant 0 : i32
    return %c0_i32, %c0_i32_0 : i32, i32
  }
  func.func @transform_8(%arg0: i32) -> (i32, i32) {
    %c0_i32 = arith.constant 0 : i32
    %c0_i32_0 = arith.constant 0 : i32
    %c0_i32_1 = arith.constant 0 : i32
    return %c0_i32, %c0_i32_0 : i32, i32
  }
  func.func @transform_9(%arg0: i32) -> (i32, i32) {
    %c0_i32 = arith.constant 0 : i32
    %c0_i32_0 = arith.constant 0 : i32
    %c0_i32_1 = arith.constant 0 : i32
    return %c0_i32, %c0_i32_0 : i32, i32
  }
  func.func @transform_10(%arg0: i32) -> (i32, i32) {
    %c0_i32 = arith.constant 0 : i32
    %c0_i32_0 = arith.constant 0 : i32
    %c0_i32_1 = arith.constant 0 : i32
    return %c0_i32, %c0_i32_0 : i32, i32
  }
  func.func @transform_11(%arg0: i32) -> (i32, i32) {
    %c0_i32 = arith.constant 0 : i32
    %c0_i32_0 = arith.constant 0 : i32
    %c0_i32_1 = arith.constant 0 : i32
    return %c0_i32, %c0_i32_0 : i32, i32
  }
  func.func @transform_12(%arg0: i32) -> (i32, i32) {
    %c0_i32 = arith.constant 0 : i32
    %c0_i32_0 = arith.constant 0 : i32
    %c0_i32_1 = arith.constant 0 : i32
    return %c0_i32, %c0_i32_0 : i32, i32
  }
  func.func @transform_13(%arg0: i32) -> (i32, i32) {
    %c0_i32 = arith.constant 0 : i32
    %c0_i32_0 = arith.constant 0 : i32
    %c0_i32_1 = arith.constant 0 : i32
    return %c0_i32, %c0_i32_0 : i32, i32
  }
  func.func @transform_14(%arg0: i32) -> (i32, i32, i32) {
    %c0_i32 = arith.constant 0 : i32
    %c0_i32_0 = arith.constant 0 : i32
    %c0_i32_1 = arith.constant 0 : i32
    return %arg0, %c0_i32, %c0_i32_0 : i32, i32, i32
  }
}

module attributes {stable_mosaic.version = 11 : i64} {
  func.func @_clip_layer_kernel(%arg0: i32, %arg1: memref<1x8x256xf32, #tpu.memory_space<vmem>>, %arg2: memref<8x8xf32, #tpu.memory_space<vmem>>, %arg3: memref<1x256xf32, #tpu.memory_space<vmem>>, %arg4: memref<1x256xf32, #tpu.memory_space<vmem>>, %arg5: memref<256x768xbf16, #tpu.memory_space<vmem>>, %arg6: memref<1x768xf32, #tpu.memory_space<vmem>>, %arg7: memref<256x256xbf16, #tpu.memory_space<vmem>>, %arg8: memref<1x256xf32, #tpu.memory_space<vmem>>, %arg9: memref<1x256xf32, #tpu.memory_space<vmem>>, %arg10: memref<1x256xf32, #tpu.memory_space<vmem>>, %arg11: memref<256x1024xbf16, #tpu.memory_space<vmem>>, %arg12: memref<1x1024xf32, #tpu.memory_space<vmem>>, %arg13: memref<1024x256xbf16, #tpu.memory_space<vmem>>, %arg14: memref<1x256xf32, #tpu.memory_space<vmem>>, %arg15: memref<1x8x256xf32, #tpu.memory_space<vmem>>, %arg16: memref<8x256xf32, #tpu.memory_space<vmem>>) attributes {dimension_semantics = [#tpu.dimension_semantics<parallel>], iteration_bounds = array<i64: 2>, scalar_prefetch = 0 : i64, scratch_operands = 1 : i64, tpu.core_type = #tpu.core_type<tc>, window_params = [{transform_indices = @transform_0, window_bounds = array<i64: 1, 8, 256>}, {pipeline_mode = #tpu.pipeline_mode<synchronous>, transform_indices = @transform_1, window_bounds = array<i64: 8, 8>}, {pipeline_mode = #tpu.pipeline_mode<synchronous>, transform_indices = @transform_2, window_bounds = array<i64: 1, 256>}, {pipeline_mode = #tpu.pipeline_mode<synchronous>, transform_indices = @transform_3, window_bounds = array<i64: 1, 256>}, {pipeline_mode = #tpu.pipeline_mode<synchronous>, transform_indices = @transform_4, window_bounds = array<i64: 256, 768>}, {pipeline_mode = #tpu.pipeline_mode<synchronous>, transform_indices = @transform_5, window_bounds = array<i64: 1, 768>}, {pipeline_mode = #tpu.pipeline_mode<synchronous>, transform_indices = @transform_6, window_bounds = array<i64: 256, 256>}, {pipeline_mode = #tpu.pipeline_mode<synchronous>, transform_indices = @transform_7, window_bounds = array<i64: 1, 256>}, {pipeline_mode = #tpu.pipeline_mode<synchronous>, transform_indices = @transform_8, window_bounds = array<i64: 1, 256>}, {pipeline_mode = #tpu.pipeline_mode<synchronous>, transform_indices = @transform_9, window_bounds = array<i64: 1, 256>}, {pipeline_mode = #tpu.pipeline_mode<synchronous>, transform_indices = @transform_10, window_bounds = array<i64: 256, 1024>}, {pipeline_mode = #tpu.pipeline_mode<synchronous>, transform_indices = @transform_11, window_bounds = array<i64: 1, 1024>}, {pipeline_mode = #tpu.pipeline_mode<synchronous>, transform_indices = @transform_12, window_bounds = array<i64: 1024, 256>}, {pipeline_mode = #tpu.pipeline_mode<synchronous>, transform_indices = @transform_13, window_bounds = array<i64: 1, 256>}, {transform_indices = @transform_14, window_bounds = array<i64: 1, 8, 256>}]} {
    %c0 = arith.constant 0 : index
    %c0_0 = arith.constant 0 : index
    %c0_1 = arith.constant 0 : index
    %0 = vector.load %arg1[%c0, %c0_0, %c0_1] : memref<1x8x256xf32, #tpu.memory_space<vmem>>, vector<1x8x256xf32>
    %1 = vector.shape_cast %0 : vector<1x8x256xf32> to vector<8x256xf32>
    %c0_2 = arith.constant 0 : index
    %c0_3 = arith.constant 0 : index
    %2 = vector.load %arg2[%c0_2, %c0_3] : memref<8x8xf32, #tpu.memory_space<vmem>>, vector<8x8xf32>
    %c0_4 = arith.constant 0 : index
    %c0_5 = arith.constant 0 : index
    %3 = vector.load %arg3[%c0_4, %c0_5] : memref<1x256xf32, #tpu.memory_space<vmem>>, vector<1x256xf32>
    %c0_6 = arith.constant 0 : index
    %c0_7 = arith.constant 0 : index
    %4 = vector.load %arg4[%c0_6, %c0_7] : memref<1x256xf32, #tpu.memory_space<vmem>>, vector<1x256xf32>
    %cst = arith.constant dense<0.000000e+00> : vector<8xf32>
    %5 = vector.multi_reduction <add>, %1, %cst [1] : vector<8x256xf32> to vector<8xf32>
    %6 = vector.shape_cast %5 : vector<8xf32> to vector<8x1xf32>
    %cst_8 = arith.constant 2.560000e+02 : f32
    %7 = vector.broadcast %cst_8 : f32 to vector<8x1xf32>
    %8 = arith.divf %6, %7 : vector<8x1xf32>
    %9 = vector.broadcast %8 : vector<8x1xf32> to vector<8x256xf32>
    %10 = arith.subf %1, %9 : vector<8x256xf32>
    %11 = arith.mulf %10, %10 : vector<8x256xf32>
    %cst_9 = arith.constant dense<0.000000e+00> : vector<8xf32>
    %12 = vector.multi_reduction <add>, %11, %cst_9 [1] : vector<8x256xf32> to vector<8xf32>
    %13 = vector.shape_cast %12 : vector<8xf32> to vector<8x1xf32>
    %cst_10 = arith.constant 2.560000e+02 : f32
    %14 = vector.broadcast %cst_10 : f32 to vector<8x1xf32>
    %15 = arith.divf %13, %14 : vector<8x1xf32>
    %16 = vector.broadcast %8 : vector<8x1xf32> to vector<8x256xf32>
    %17 = arith.subf %1, %16 : vector<8x256xf32>
    %cst_11 = arith.constant 9.99999974E-6 : f32
    %18 = vector.broadcast %cst_11 : f32 to vector<8x1xf32>
    %19 = arith.addf %15, %18 : vector<8x1xf32>
    %20 = math.rsqrt %19 : vector<8x1xf32>
    %21 = vector.broadcast %20 : vector<8x1xf32> to vector<8x256xf32>
    %22 = arith.mulf %17, %21 : vector<8x256xf32>
    %23 = vector.broadcast %3 : vector<1x256xf32> to vector<8x256xf32>
    %24 = arith.mulf %22, %23 : vector<8x256xf32>
    %25 = vector.broadcast %4 : vector<1x256xf32> to vector<8x256xf32>
    %26 = arith.addf %24, %25 : vector<8x256xf32>
    %27 = arith.truncf %26 : vector<8x256xf32> to vector<8x256xbf16>
    %c0_12 = arith.constant 0 : index
    %c0_13 = arith.constant 0 : index
    %28 = vector.load %arg5[%c0_12, %c0_13] : memref<256x768xbf16, #tpu.memory_space<vmem>>, vector<256x768xbf16>
    %cst_14 = arith.constant dense<0.000000e+00> : vector<8x768xf32>
    %29 = tpu.matmul %27, %28, %cst_14 {dimension_numbers = #tpu.dot_dimension_numbers<[1], [0], [0], [1], [0, 0, 1, 1], [], []>} : vector<8x256xbf16>, vector<256x768xbf16>, vector<8x768xf32> -> vector<8x768xf32>
    %c0_15 = arith.constant 0 : index
    %c0_16 = arith.constant 0 : index
    %30 = vector.load %arg6[%c0_15, %c0_16] : memref<1x768xf32, #tpu.memory_space<vmem>>, vector<1x768xf32>
    %31 = vector.broadcast %30 : vector<1x768xf32> to vector<8x768xf32>
    %32 = arith.addf %29, %31 : vector<8x768xf32>
    %33 = vector.extract_strided_slice %32 {offsets = [0, 0], sizes = [8, 128], strides = [1, 1]} : vector<8x768xf32> to vector<8x128xf32>
    %34 = arith.truncf %33 : vector<8x128xf32> to vector<8x128xbf16>
    %35 = vector.extract_strided_slice %32 {offsets = [0, 256], sizes = [8, 128], strides = [1, 1]} : vector<8x768xf32> to vector<8x128xf32>
    %36 = arith.truncf %35 : vector<8x128xf32> to vector<8x128xbf16>
    %37 = vector.extract_strided_slice %32 {offsets = [0, 512], sizes = [8, 128], strides = [1, 1]} : vector<8x768xf32> to vector<8x128xf32>
    %38 = arith.truncf %37 : vector<8x128xf32> to vector<8x128xbf16>
    %cst_17 = arith.constant dense<0.000000e+00> : vector<8x8xf32>
    %39 = tpu.matmul %34, %36, %cst_17 {dimension_numbers = #tpu.dot_dimension_numbers<[1], [1], [0], [0], [0, 0, 1, 0], [], []>} : vector<8x128xbf16>, vector<8x128xbf16>, vector<8x8xf32> -> vector<8x8xf32>
    %cst_18 = arith.constant 0.0883883461 : f32
    %40 = vector.broadcast %cst_18 : f32 to vector<8x8xf32>
    %41 = arith.mulf %39, %40 : vector<8x8xf32>
    %42 = arith.addf %41, %2 : vector<8x8xf32>
    %cst_19 = arith.constant dense<0xFF800000> : vector<8xf32>
    %43 = vector.multi_reduction <maximumf>, %42, %cst_19 [1] : vector<8x8xf32> to vector<8xf32>
    %44 = vector.shape_cast %43 : vector<8xf32> to vector<8x1xf32>
    %45 = vector.broadcast %44 : vector<8x1xf32> to vector<8x8xf32>
    %46 = arith.subf %42, %45 : vector<8x8xf32>
    %47 = math.exp %46 : vector<8x8xf32>
    %cst_20 = arith.constant dense<0.000000e+00> : vector<8xf32>
    %48 = vector.multi_reduction <add>, %47, %cst_20 [1] : vector<8x8xf32> to vector<8xf32>
    %49 = vector.shape_cast %48 : vector<8xf32> to vector<8x1xf32>
    %50 = tpu.reciprocal %49 {approx = true} : vector<8x1xf32> -> vector<8x1xf32>
    %51 = vector.broadcast %50 : vector<8x1xf32> to vector<8x8xf32>
    %52 = arith.mulf %47, %51 : vector<8x8xf32>
    %53 = arith.truncf %52 : vector<8x8xf32> to vector<8x8xbf16>
    %cst_21 = arith.constant dense<0.000000e+00> : vector<8x128xf32>
    %54 = tpu.matmul %53, %38, %cst_21 {dimension_numbers = #tpu.dot_dimension_numbers<[1], [0], [0], [1], [0, 0, 1, 1], [], []>} : vector<8x8xbf16>, vector<8x128xbf16>, vector<8x128xf32> -> vector<8x128xf32>
    %c0_22 = arith.constant 0 : index
    %c0_23 = arith.constant 0 : index
    %55 = vector.load %arg16[%c0_22, %c0_23] : memref<8x256xf32, #tpu.memory_space<vmem>>, vector<8x128xf32>
    tpu.vector_store %arg16[%c0_22, %c0_23], %54 {strides = array<i32>} : memref<8x256xf32, #tpu.memory_space<vmem>>, vector<8x128xf32>,
    %56 = vector.extract_strided_slice %32 {offsets = [0, 128], sizes = [8, 128], strides = [1, 1]} : vector<8x768xf32> to vector<8x128xf32>
    %57 = arith.truncf %56 : vector<8x128xf32> to vector<8x128xbf16>
    %58 = vector.extract_strided_slice %32 {offsets = [0, 384], sizes = [8, 128], strides = [1, 1]} : vector<8x768xf32> to vector<8x128xf32>
    %59 = arith.truncf %58 : vector<8x128xf32> to vector<8x128xbf16>
    %60 = vector.extract_strided_slice %32 {offsets = [0, 640], sizes = [8, 128], strides = [1, 1]} : vector<8x768xf32> to vector<8x128xf32>
    %61 = arith.truncf %60 : vector<8x128xf32> to vector<8x128xbf16>
    %cst_24 = arith.constant dense<0.000000e+00> : vector<8x8xf32>
    %62 = tpu.matmul %57, %59, %cst_24 {dimension_numbers = #tpu.dot_dimension_numbers<[1], [1], [0], [0], [0, 0, 1, 0], [], []>} : vector<8x128xbf16>, vector<8x128xbf16>, vector<8x8xf32> -> vector<8x8xf32>
    %cst_25 = arith.constant 0.0883883461 : f32
    %63 = vector.broadcast %cst_25 : f32 to vector<8x8xf32>
    %64 = arith.mulf %62, %63 : vector<8x8xf32>
    %65 = arith.addf %64, %2 : vector<8x8xf32>
    %cst_26 = arith.constant dense<0xFF800000> : vector<8xf32>
    %66 = vector.multi_reduction <maximumf>, %65, %cst_26 [1] : vector<8x8xf32> to vector<8xf32>
    %67 = vector.shape_cast %66 : vector<8xf32> to vector<8x1xf32>
    %68 = vector.broadcast %67 : vector<8x1xf32> to vector<8x8xf32>
    %69 = arith.subf %65, %68 : vector<8x8xf32>
    %70 = math.exp %69 : vector<8x8xf32>
    %cst_27 = arith.constant dense<0.000000e+00> : vector<8xf32>
    %71 = vector.multi_reduction <add>, %70, %cst_27 [1] : vector<8x8xf32> to vector<8xf32>
    %72 = vector.shape_cast %71 : vector<8xf32> to vector<8x1xf32>
    %73 = tpu.reciprocal %72 {approx = true} : vector<8x1xf32> -> vector<8x1xf32>
    %74 = vector.broadcast %73 : vector<8x1xf32> to vector<8x8xf32>
    %75 = arith.mulf %70, %74 : vector<8x8xf32>
    %76 = arith.truncf %75 : vector<8x8xf32> to vector<8x8xbf16>
    %cst_28 = arith.constant dense<0.000000e+00> : vector<8x128xf32>
    %77 = tpu.matmul %76, %61, %cst_28 {dimension_numbers = #tpu.dot_dimension_numbers<[1], [0], [0], [1], [0, 0, 1, 1], [], []>} : vector<8x8xbf16>, vector<8x128xbf16>, vector<8x128xf32> -> vector<8x128xf32>
    %c0_29 = arith.constant 0 : index
    %c128 = arith.constant 128 : index
    %78 = vector.load %arg16[%c0_29, %c128] : memref<8x256xf32, #tpu.memory_space<vmem>>, vector<8x128xf32>
    tpu.vector_store %arg16[%c0_29, %c128], %77 {strides = array<i32>} : memref<8x256xf32, #tpu.memory_space<vmem>>, vector<8x128xf32>,
    %c0_30 = arith.constant 0 : index
    %c0_31 = arith.constant 0 : index
    %79 = vector.load %arg16[%c0_30, %c0_31] : memref<8x256xf32, #tpu.memory_space<vmem>>, vector<8x256xf32>
    %80 = arith.truncf %79 : vector<8x256xf32> to vector<8x256xbf16>
    %c0_32 = arith.constant 0 : index
    %c0_33 = arith.constant 0 : index
    %81 = vector.load %arg7[%c0_32, %c0_33] : memref<256x256xbf16, #tpu.memory_space<vmem>>, vector<256x256xbf16>
    %cst_34 = arith.constant dense<0.000000e+00> : vector<8x256xf32>
    %82 = tpu.matmul %80, %81, %cst_34 {dimension_numbers = #tpu.dot_dimension_numbers<[1], [0], [0], [1], [0, 0, 1, 1], [], []>} : vector<8x256xbf16>, vector<256x256xbf16>, vector<8x256xf32> -> vector<8x256xf32>
    %83 = arith.addf %1, %82 : vector<8x256xf32>
    %c0_35 = arith.constant 0 : index
    %c0_36 = arith.constant 0 : index
    %84 = vector.load %arg8[%c0_35, %c0_36] : memref<1x256xf32, #tpu.memory_space<vmem>>, vector<1x256xf32>
    %85 = vector.broadcast %84 : vector<1x256xf32> to vector<8x256xf32>
    %86 = arith.addf %83, %85 : vector<8x256xf32>
    %c0_37 = arith.constant 0 : index
    %c0_38 = arith.constant 0 : index
    %87 = vector.load %arg9[%c0_37, %c0_38] : memref<1x256xf32, #tpu.memory_space<vmem>>, vector<1x256xf32>
    %c0_39 = arith.constant 0 : index
    %c0_40 = arith.constant 0 : index
    %88 = vector.load %arg10[%c0_39, %c0_40] : memref<1x256xf32, #tpu.memory_space<vmem>>, vector<1x256xf32>
    %cst_41 = arith.constant dense<0.000000e+00> : vector<8xf32>
    %89 = vector.multi_reduction <add>, %86, %cst_41 [1] : vector<8x256xf32> to vector<8xf32>
    %90 = vector.shape_cast %89 : vector<8xf32> to vector<8x1xf32>
    %cst_42 = arith.constant 2.560000e+02 : f32
    %91 = vector.broadcast %cst_42 : f32 to vector<8x1xf32>
    %92 = arith.divf %90, %91 : vector<8x1xf32>
    %93 = vector.broadcast %92 : vector<8x1xf32> to vector<8x256xf32>
    %94 = arith.subf %86, %93 : vector<8x256xf32>
    %95 = arith.mulf %94, %94 : vector<8x256xf32>
    %cst_43 = arith.constant dense<0.000000e+00> : vector<8xf32>
    %96 = vector.multi_reduction <add>, %95, %cst_43 [1] : vector<8x256xf32> to vector<8xf32>
    %97 = vector.shape_cast %96 : vector<8xf32> to vector<8x1xf32>
    %cst_44 = arith.constant 2.560000e+02 : f32
    %98 = vector.broadcast %cst_44 : f32 to vector<8x1xf32>
    %99 = arith.divf %97, %98 : vector<8x1xf32>
    %100 = vector.broadcast %92 : vector<8x1xf32> to vector<8x256xf32>
    %101 = arith.subf %86, %100 : vector<8x256xf32>
    %cst_45 = arith.constant 9.99999974E-6 : f32
    %102 = vector.broadcast %cst_45 : f32 to vector<8x1xf32>
    %103 = arith.addf %99, %102 : vector<8x1xf32>
    %104 = math.rsqrt %103 : vector<8x1xf32>
    %105 = vector.broadcast %104 : vector<8x1xf32> to vector<8x256xf32>
    %106 = arith.mulf %101, %105 : vector<8x256xf32>
    %107 = vector.broadcast %87 : vector<1x256xf32> to vector<8x256xf32>
    %108 = arith.mulf %106, %107 : vector<8x256xf32>
    %109 = vector.broadcast %88 : vector<1x256xf32> to vector<8x256xf32>
    %110 = arith.addf %108, %109 : vector<8x256xf32>
    %111 = arith.truncf %110 : vector<8x256xf32> to vector<8x256xbf16>
    %c0_46 = arith.constant 0 : index
    %c0_47 = arith.constant 0 : index
    %112 = vector.load %arg11[%c0_46, %c0_47] : memref<256x1024xbf16, #tpu.memory_space<vmem>>, vector<256x1024xbf16>
    %cst_48 = arith.constant dense<0.000000e+00> : vector<8x1024xf32>
    %113 = tpu.matmul %111, %112, %cst_48 {dimension_numbers = #tpu.dot_dimension_numbers<[1], [0], [0], [1], [0, 0, 1, 1], [], []>} : vector<8x256xbf16>, vector<256x1024xbf16>, vector<8x1024xf32> -> vector<8x1024xf32>
    %c0_49 = arith.constant 0 : index
    %c0_50 = arith.constant 0 : index
    %114 = vector.load %arg12[%c0_49, %c0_50] : memref<1x1024xf32, #tpu.memory_space<vmem>>, vector<1x1024xf32>
    %115 = vector.broadcast %114 : vector<1x1024xf32> to vector<8x1024xf32>
    %116 = arith.addf %113, %115 : vector<8x1024xf32>
    %cst_51 = arith.constant 1.702000e+00 : f32
    %117 = vector.broadcast %cst_51 : f32 to vector<8x1024xf32>
    %118 = arith.mulf %117, %116 : vector<8x1024xf32>
    %119 = arith.negf %118 : vector<8x1024xf32>
    %120 = math.exp %119 : vector<8x1024xf32>
    %cst_52 = arith.constant 1.000000e+00 : f32
    %121 = vector.broadcast %cst_52 : f32 to vector<8x1024xf32>
    %122 = arith.addf %121, %120 : vector<8x1024xf32>
    %123 = arith.divf %121, %122 : vector<8x1024xf32>
    %124 = arith.mulf %116, %123 : vector<8x1024xf32>
    %125 = arith.truncf %124 : vector<8x1024xf32> to vector<8x1024xbf16>
    %c0_53 = arith.constant 0 : index
    %c0_54 = arith.constant 0 : index
    %126 = vector.load %arg13[%c0_53, %c0_54] : memref<1024x256xbf16, #tpu.memory_space<vmem>>, vector<1024x256xbf16>
    %cst_55 = arith.constant dense<0.000000e+00> : vector<8x256xf32>
    %127 = tpu.matmul %125, %126, %cst_55 {dimension_numbers = #tpu.dot_dimension_numbers<[1], [0], [0], [1], [0, 0, 1, 1], [], []>} : vector<8x1024xbf16>, vector<1024x256xbf16>, vector<8x256xf32> -> vector<8x256xf32>
    %c0_56 = arith.constant 0 : index
    %c0_57 = arith.constant 0 : index
    %128 = vector.load %arg14[%c0_56, %c0_57] : memref<1x256xf32, #tpu.memory_space<vmem>>, vector<1x256xf32>
    %129 = vector.broadcast %128 : vector<1x256xf32> to vector<8x256xf32>
    %130 = arith.addf %127, %129 : vector<8x256xf32>
    %131 = arith.addf %86, %130 : vector<8x256xf32>
    %132 = vector.shape_cast %131 : vector<8x256xf32> to vector<1x8x256xf32>
    %c0_58 = arith.constant 0 : index
    %c0_59 = arith.constant 0 : index
    %c0_60 = arith.constant 0 : index
    %133 = vector.load %arg15[%c0_58, %c0_59, %c0_60] : memref<1x8x256xf32, #tpu.memory_space<vmem>>, vector<1x8x256xf32>
    tpu.vector_store %arg15[%c0_58, %c0_59, %c0_60], %132 {strides = array<i32>} : memref<1x8x256xf32, #tpu.memory_space<vmem>>, vector<1x8x256xf32>,
    return
  }
  func.func @transform_0(%arg0: i32) -> (i32, i32, i32) {
    %c0_i32 = arith.constant 0 : i32
    %c0_i32_0 = arith.constant 0 : i32
    %c0_i32_1 = arith.constant 0 : i32
    return %arg0, %c0_i32, %c0_i32_0 : i32, i32, i32
  }
  func.func @transform_1(%arg0: i32) -> (i32, i32) {
    %c0_i32 = arith.constant 0 : i32
    %c0_i32_0 = arith.constant 0 : i32
    %c0_i32_1 = arith.constant 0 : i32
    return %c0_i32, %c0_i32_0 : i32, i32
  }
  func.func @transform_2(%arg0: i32) -> (i32, i32) {
    %c0_i32 = arith.constant 0 : i32
    %c0_i32_0 = arith.constant 0 : i32
    %c0_i32_1 = arith.constant 0 : i32
    return %c0_i32, %c0_i32_0 : i32, i32
  }
  func.func @transform_3(%arg0: i32) -> (i32, i32) {
    %c0_i32 = arith.constant 0 : i32
    %c0_i32_0 = arith.constant 0 : i32
    %c0_i32_1 = arith.constant 0 : i32
    return %c0_i32, %c0_i32_0 : i32, i32
  }
  func.func @transform_4(%arg0: i32) -> (i32, i32) {
    %c0_i32 = arith.constant 0 : i32
    %c0_i32_0 = arith.constant 0 : i32
    %c0_i32_1 = arith.constant 0 : i32
    return %c0_i32, %c0_i32_0 : i32, i32
  }
  func.func @transform_5(%arg0: i32) -> (i32, i32) {
    %c0_i32 = arith.constant 0 : i32
    %c0_i32_0 = arith.constant 0 : i32
    %c0_i32_1 = arith.constant 0 : i32
    return %c0_i32, %c0_i32_0 : i32, i32
  }
  func.func @transform_6(%arg0: i32) -> (i32, i32) {
    %c0_i32 = arith.constant 0 : i32
    %c0_i32_0 = arith.constant 0 : i32
    %c0_i32_1 = arith.constant 0 : i32
    return %c0_i32, %c0_i32_0 : i32, i32
  }
  func.func @transform_7(%arg0: i32) -> (i32, i32) {
    %c0_i32 = arith.constant 0 : i32
    %c0_i32_0 = arith.constant 0 : i32
    %c0_i32_1 = arith.constant 0 : i32
    return %c0_i32, %c0_i32_0 : i32, i32
  }
  func.func @transform_8(%arg0: i32) -> (i32, i32) {
    %c0_i32 = arith.constant 0 : i32
    %c0_i32_0 = arith.constant 0 : i32
    %c0_i32_1 = arith.constant 0 : i32
    return %c0_i32, %c0_i32_0 : i32, i32
  }
  func.func @transform_9(%arg0: i32) -> (i32, i32) {
    %c0_i32 = arith.constant 0 : i32
    %c0_i32_0 = arith.constant 0 : i32
    %c0_i32_1 = arith.constant 0 : i32
    return %c0_i32, %c0_i32_0 : i32, i32
  }
  func.func @transform_10(%arg0: i32) -> (i32, i32) {
    %c0_i32 = arith.constant 0 : i32
    %c0_i32_0 = arith.constant 0 : i32
    %c0_i32_1 = arith.constant 0 : i32
    return %c0_i32, %c0_i32_0 : i32, i32
  }
  func.func @transform_11(%arg0: i32) -> (i32, i32) {
    %c0_i32 = arith.constant 0 : i32
    %c0_i32_0 = arith.constant 0 : i32
    %c0_i32_1 = arith.constant 0 : i32
    return %c0_i32, %c0_i32_0 : i32, i32
  }
  func.func @transform_12(%arg0: i32) -> (i32, i32) {
    %c0_i32 = arith.constant 0 : i32
    %c0_i32_0 = arith.constant 0 : i32
    %c0_i32_1 = arith.constant 0 : i32
    return %c0_i32, %c0_i32_0 : i32, i32
  }
  func.func @transform_13(%arg0: i32) -> (i32, i32) {
    %c0_i32 = arith.constant 0 : i32
    %c0_i32_0 = arith.constant 0 : i32
    %c0_i32_1 = arith.constant 0 : i32
    return %c0_i32, %c0_i32_0 : i32, i32
  }
  func.func @transform_14(%arg0: i32) -> (i32, i32, i32) {
    %c0_i32 = arith.constant 0 : i32
    %c0_i32_0 = arith.constant 0 : i32
    %c0_i32_1 = arith.constant 0 : i32
    return %arg0, %c0_i32, %c0_i32_0 : i32, i32, i32
  }
}

</mosaic_0001>

<bundles_post_ra>
// kernel: tpu_custom_call.1
= control target key start
LH: loop header
LB: loop body
LE: loop exit
PB: predicated region body
PF: predicated region fallthrough
CT: control target
= control target key end

     0   :  { %s5924_s0 = inlined_call_operand.hbm [shape: f32[2,8,256], index: 0, kind: input, shape index: {}]   ;;  %s5925_s1 = inlined_call_operand.hbm [shape: f32[8,8], index: 1, kind: input, shape index: {}]   ;;  %s5926_s2 = inlined_call_operand.hbm [shape: f32[1,256], index: 2, kind: input, shape index: {}]   ;;  %s5927_s3 = inlined_call_operand.hbm [shape: f32[1,256], index: 3, kind: input, shape index: {}]   ;;  %s5928_s4 = inlined_call_operand.hbm [shape: bf16[256,768], index: 4, kind: input, shape index: {}]   ;;  %s5929_s5 = inlined_call_operand.vmem [shape: f32[1,768], index: 5, kind: input, shape index: {}]   ;;  %s5930_s6 = inlined_call_operand.hbm [shape: bf16[256,256], index: 6, kind: input, shape index: {}]   ;;  %s5931_s7 = inlined_call_operand.vmem [shape: f32[1,256], index: 7, kind: input, shape index: {}]   ;;  %s5932_s8 = inlined_call_operand.vmem [shape: f32[1,256], index: 8, kind: input, shape index: {}]   ;;  %s5933_s9 = inlined_call_operand.vmem [shape: f32[1,256], index: 9, kind: input, shape index: {}]   ;;  %s5934_s10 = inlined_call_operand.hbm [shape: bf16[256,1024], index: 10, kind: input, shape index: {}]   ;;  %s5935_s11 = inlined_call_operand.vmem [shape: f32[1,1024], index: 11, kind: input, shape index: {}]   ;;  %s5936_s12 = inlined_call_operand.hbm [shape: bf16[1024,256], index: 12, kind: input, shape index: {}]   ;;  %s5937_s13 = inlined_call_operand.vmem [shape: f32[1,256], index: 13, kind: input, shape index: {}]   ;;  %s5938_s14 = inlined_call_operand.hbm [shape: f32[2,8,256], index: 14, kind: output, shape index: {}]  }
   0x1   :  { %5943 = sst [smem:[#allocation24_spill]] %s5925_s1 }
   0x2   :  { %5944 = sst [smem:[#allocation25_spill]] %s5927_s3 }
   0x3   :  { %5945 = sst [smem:[#allocation26_spill]] %s5931_s7 }
   0x4   :  { %5946 = sst [smem:[#allocation27_spill]] %s5932_s8 }
   0x5   :  { %5947 = sst [smem:[#allocation28_spill]] %s5933_s9 }
   0x6   :  { %5948 = sst [smem:[#allocation29_spill]] %s5935_s11 }
   0x7   :  { %5949 = sst [smem:[#allocation30_spill]] %s5937_s13 }
   0x8   :  { %5950 = sst [smem:[#allocation31_spill]] %s5938_s14 }
   0x9   :  { %19 = vsyncpa [#allocation4], 0 }
   0xa   :  { %21 = vsyncpa [#allocation4 + $0x1], 0 }
   0xb   :  { %22 = vsyncpa [#allocation7], 0 }
   0xc   :  { %23 = vsyncpa [#allocation10], 0 }
   0xd   :  { %24 = vsyncpa [#allocation13], 0 }
   0xe   :  { %25 = vsyncpa [#allocation16], 0 }
   0xf   :  { %26 = vsyncpa [#allocation5], 0 }
  0x10   :  { %28 = vsyncpa [#allocation5 + $0x1], 0  ;;  %s5430_s29 = smov 0   ;;  %s5432_s30 = smov 0  }
  0x11   :  { %s5434_s15 = smov 0   ;;  %s5436_s16 = smov 0  }
  0x12 LB: > { %s5338_s17 = smov [#allocation6]   ;;  %s5451_s19 = sadd.s32 4294967295, %s5336_s16   ;;  %s5336_s16 = sphi %s5436_s16, %s5982_s16   ;;  %s5332_s15 = sphi %s5434_s15, %s5981_s15   ;;  %s5328_s30 = sphi %s5432_s30, %s5980_s30   ;;  %s5324_s29 = sphi %s5430_s29, %s5979_s29  }
  0x13   : > { %s377_s18 = sshll.u32 %s5338_s17, 4  ;;  %p4018_p0 = scmp.ge.s32.totalorder %s5336_s16, 1  ;;  %s378_s18 = int_to_ptr.vmem [resolvable:$true] %s377_s18 }
  0x14   : > { %p5940_p1 = scmp.eq.s32.totalorder %s5451_s19, 0  ;;  %p364_p2 = scmp.lt.s32.totalorder %s5336_s16, 3 }
  0x15   : > { %s5339_s21 = smov [#allocation9]   ;;  %s5340_s23 = smov [#allocation12]  }
  0x16   : > { %p5456_p3 = pnand %p4018_p0, %p364_p2  ;;  %s399_s22 = sshll.u32 %s5339_s21, 4  ;;  %s5463_s22 = int_to_ptr.vmem [resolvable:$true] %s399_s22 }
  0x17   : > { %s425_s24 = sshll.u32 %s5340_s23, 4  ;;  %s5953_s1 = sld [smem:[#allocation24_spill]]  ;;  %s5471_s24 = int_to_ptr.vmem [resolvable:$true] %s425_s24 }
  0x18   : > { %s5951_s20 = scalar_select %p5456_p3, 1, 0 }
  0x19   : > { %p4505_p5 = pneg %p5456_p3 }
  0x1b   : > { %p5467_p6 = pnand %p4505_p5, %p5940_p1 }
  0x1d   : > { %s5028_s28 = scalar_lea.hbm %s5953_s1, 128  ;;  %p5481_p8 = pneg %p5467_p6 }
  0x1e   : > { %p5029_p7 = scmp.ne.s32.totalorder %s5953_s1, %s5028_s28  ;;  %p5035_p11 = scmp.lt.u32.totalorder %s5028_s28, %s5953_s1 }
  0x20   : > { %p5031_p9 = pnand %p5481_p8, %p5029_p7 }
  0x22   : > { %p5032_p10 = pneg %p5031_p9 }
  0x24   : > { %p5037_p12 = pnand %p5035_p11, %p5032_p10 }
  0x26   : > { %5040 = shalt.err (!%p5037_p12)
}
  0x27   : > { %s5041_s26 = scalar_lea.vmem %s378_s18, 128  ;;  %p5049_p5 = scmp.lt.s32.totalorder %s378_s18, %s378_s18 }
  0x28   : > { %p5042_p13 = scmp.ne.s32.totalorder %s378_s18, %s5041_s26  ;;  %p5050_p4 = scmp.lt.s32.totalorder %s5041_s26, %s5041_s26 }
  0x2a   : > { %p5044_p0 = pnand %p5042_p13, %p5481_p8  ;;  %p5051_p1 = por %p5050_p4, %p5049_p5 }
  0x2c   : > { %p5045_p2 = pneg %p5044_p0 }
  0x2e   : > { %p5052_p3 = pnand %p5051_p1, %p5045_p2 }
  0x30   : > { %5055 = shalt.err (!%p5052_p3)
}
  0x31   : > { %4508 = dma.hbm_to_vmem [thread:$0]  (!%p5467_p6), %s5953_s1, 128, %s378_s18, [#allocation7]  }
  0x32   : > { %s5955_s3 = sld [smem:[#allocation25_spill]] }
  0x38   : > { %s5056_s17 = scalar_lea.hbm %s5955_s3, 32 }
  0x39   : > { %p5057_p7 = scmp.ne.s32.totalorder %s5955_s3, %s5056_s17  ;;  %p5063_p1 = scmp.lt.u32.totalorder %s5056_s17, %s5955_s3 }
  0x3b   : > { %p5059_p9 = pnand %p5057_p7, %p5481_p8 }
  0x3d   : > { %p5060_p4 = pneg %p5059_p9 }
  0x3f   : > { %p5065_p3 = pnand %p5063_p1, %p5060_p4 }
  0x41   : > { %5068 = shalt.err (!%p5065_p3)
}
  0x42   : > { %s5069_s18 = scalar_lea.vmem %s5463_s22, 32  ;;  %p5077_p13 = scmp.lt.s32.totalorder %s5463_s22, %s5463_s22 }
  0x43   : > { %p5070_p10 = scmp.ne.s32.totalorder %s5463_s22, %s5069_s18  ;;  %p5078_p0 = scmp.lt.s32.totalorder %s5069_s18, %s5069_s18 }
  0x45   : > { %p5072_p11 = pnand %p5070_p10, %p5481_p8  ;;  %p5079_p2 = por %p5078_p0, %p5077_p13 }
  0x47   : > { %p5073_p12 = pneg %p5072_p11 }
  0x49   : > { %p5080_p5 = pnand %p5079_p2, %p5073_p12 }
  0x4b   : > { %5083 = shalt.err (!%p5080_p5)
}
  0x4c   : > { %4514 = dma.hbm_to_vmem [thread:$0]  (!%p5467_p6), %s5955_s3, 32, %s5463_s22, [#allocation10]  }
  0x4d   : > { %s5084_s13 = scalar_lea.hbm %s5930_s6, 4096 }
  0x4e   : > { %p5085_p7 = scmp.ne.s32.totalorder %s5930_s6, %s5084_s13  ;;  %p5091_p1 = scmp.lt.u32.totalorder %s5084_s13, %s5930_s6 }
  0x50   : > { %p5087_p9 = pnand %p5085_p7, %p5481_p8 }
  0x52   : > { %p5088_p4 = pneg %p5087_p9 }
  0x54   : > { %p5093_p3 = pnand %p5091_p1, %p5088_p4 }
  0x56   : > { %5096 = shalt.err (!%p5093_p3)
}
  0x57   : > { %s5097_s22 = scalar_lea.vmem %s5471_s24, 4096  ;;  %p5105_p13 = scmp.lt.s32.totalorder %s5471_s24, %s5471_s24 }
  0x58   : > { %p5098_p10 = scmp.ne.s32.totalorder %s5471_s24, %s5097_s22  ;;  %p5106_p0 = scmp.lt.s32.totalorder %s5097_s22, %s5097_s22 }
  0x5a   : > { %p5100_p11 = pnand %p5098_p10, %p5481_p8  ;;  %p5107_p2 = por %p5106_p0, %p5105_p13 }
  0x5c   : > { %p5101_p12 = pneg %p5100_p11 }
  0x5e   : > { %p5108_p5 = pnand %p5107_p2, %p5101_p12 }
  0x60   : > { %5111 = shalt.err (!%p5108_p5)
}
  0x61   : > { %s5341_s18 = smov 128   ;;  %s5342_s9 = smov 8  }
  0x62   : > { %4520 = dma.hbm_to_vmem [thread:$0]  (!%p5467_p6), %s5930_s6, 4096, %s5471_s24, [#allocation13], %s5341_s18, %s5341_s18, %s5342_s9  }
  0x63   : > { %s5343_s27 = smov [#allocation8]   ;;  %s5344_s28 = smov [#allocation11]  }
  0x64   : > { %s388_s13 = sshll.u32 %s5343_s27, 4  ;;  %s409_s17 = sshll.u32 %s5344_s28, 4  ;;  %s389_s13 = int_to_ptr.vmem [resolvable:$true] %s388_s13  ;;  %s410_s17 = int_to_ptr.vmem [resolvable:$true] %s409_s17 }
  0x65   : > { %s5112_s22 = scalar_lea.hbm %s5926_s2, 32 }
  0x66   : > { %p5113_p7 = scmp.ne.s32.totalorder %s5926_s2, %s5112_s22  ;;  %p5119_p1 = scmp.lt.u32.totalorder %s5112_s22, %s5926_s2 }
  0x68   : > { %p5115_p9 = pnand %p5113_p7, %p5481_p8 }
  0x6a   : > { %p5116_p4 = pneg %p5115_p9 }
  0x6c   : > { %p5121_p3 = pnand %p5119_p1, %p5116_p4 }
  0x6e   : > { %5124 = shalt.err (!%p5121_p3)
}
  0x6f   : > { %s5125_s24 = scalar_lea.vmem %s389_s13, 32  ;;  %p5133_p13 = scmp.lt.s32.totalorder %s389_s13, %s389_s13 }
  0x70   : > { %p5126_p10 = scmp.ne.s32.totalorder %s389_s13, %s5125_s24  ;;  %p5134_p0 = scmp.lt.s32.totalorder %s5125_s24, %s5125_s24 }
  0x72   : > { %p5128_p11 = pnand %p5126_p10, %p5481_p8  ;;  %p5135_p2 = por %p5134_p0, %p5133_p13 }
  0x74   : > { %p5129_p12 = pneg %p5128_p11 }
  0x76   : > { %p5136_p5 = pnand %p5135_p2, %p5129_p12 }
  0x78   : > { %5139 = shalt.err (!%p5136_p5)
}
  0x79   : > { %4511 = dma.hbm_to_vmem [thread:$0]  (!%p5467_p6), %s5926_s2, 32, %s389_s13, [#allocation7]  }
  0x7a   : > { %s5140_s11 = scalar_lea.hbm %s5928_s4, 12288 }
  0x7b   : > { %p5141_p7 = scmp.ne.s32.totalorder %s5928_s4, %s5140_s11  ;;  %p5147_p1 = scmp.lt.u32.totalorder %s5140_s11, %s5928_s4 }
  0x7d   : > { %p5143_p9 = pnand %p5141_p7, %p5481_p8 }
  0x7f   : > { %p5144_p4 = pneg %p5143_p9 }
  0x81   : > { %p5149_p3 = pnand %p5147_p1, %p5144_p4 }
  0x83   : > { %5152 = shalt.err (!%p5149_p3)
}
  0x84   : > { %s5153_s26 = scalar_lea.vmem %s410_s17, 12288  ;;  %p5161_p13 = scmp.lt.s32.totalorder %s410_s17, %s410_s17 }
  0x85   : > { %p5154_p10 = scmp.ne.s32.totalorder %s410_s17, %s5153_s26  ;;  %p5162_p0 = scmp.lt.s32.totalorder %s5153_s26, %s5153_s26 }
  0x87   : > { %p5156_p11 = pnand %p5154_p10, %p5481_p8  ;;  %p5163_p2 = por %p5162_p0, %p5161_p13 }
  0x89   : > { %p5157_p12 = pneg %p5156_p11 }
  0x8b   : > { %p5164_p5 = pnand %p5163_p2, %p5157_p12 }
  0x8d   : > { %5167 = shalt.err (!%p5164_p5)
}
  0x8e   : > { %s5345_s13 = smov 384   ;;  %s5346_s22 = smov 24  }
  0x8f   : > { %4517 = dma.hbm_to_vmem [thread:$0]  (!%p5467_p6), %s5928_s4, 12288, %s410_s17, [#allocation10], %s5345_s13, %s5345_s13, %s5346_s22  }
  0x90   : > { %s5347_s3 = smov [#allocation14]   ;;  %s5168_s14 = scalar_lea.hbm %s5934_s10, 16384 }
  0x91   : > { %s447_s7 = sshll.u32 %s5347_s3, 4  ;;  %p5169_p7 = scmp.ne.s32.totalorder %s5934_s10, %s5168_s14  ;;  %s448_s7 = int_to_ptr.vmem [resolvable:$true] %s447_s7 }
  0x92   : > { %p5175_p1 = scmp.lt.u32.totalorder %s5168_s14, %s5934_s10 }
  0x93   : > { %p5171_p9 = pnand %p5169_p7, %p5481_p8 }
  0x95   : > { %p5172_p4 = pneg %p5171_p9 }
  0x97   : > { %p5177_p3 = pnand %p5175_p1, %p5172_p4 }
  0x99   : > { %5180 = shalt.err (!%p5177_p3)
}
  0x9a   : > { %s5181_s17 = scalar_lea.vmem %s448_s7, 16384  ;;  %p5189_p13 = scmp.lt.s32.totalorder %s448_s7, %s448_s7 }
  0x9b   : > { %p5182_p10 = scmp.ne.s32.totalorder %s448_s7, %s5181_s17  ;;  %p5190_p0 = scmp.lt.s32.totalorder %s5181_s17, %s5181_s17 }
  0x9d   : > { %p5184_p11 = pnand %p5182_p10, %p5481_p8  ;;  %p5191_p2 = por %p5190_p0, %p5189_p13 }
  0x9f   : > { %p5185_p12 = pneg %p5184_p11 }
  0xa1   : > { %p5192_p5 = pnand %p5191_p2, %p5185_p12 }
  0xa3   : > { %5195 = shalt.err (!%p5192_p5)
}
  0xa4   : > { %s5348_s13 = smov 512   ;;  %s5349_s22 = smov 32  }
  0xa5   : > { %4523 = dma.hbm_to_vmem [thread:$0]  (!%p5467_p6), %s5934_s10, 16384, %s448_s7, [#allocation13], %s5348_s13, %s5348_s13, %s5349_s22  }
  0xa6   : > { %s5350_s3 = smov [#allocation15]   ;;  %s5196_s27 = scalar_lea.hbm %s5936_s12, 16384 }
  0xa7   : > { %s463_s8 = sshll.u32 %s5350_s3, 4  ;;  %p5197_p7 = scmp.ne.s32.totalorder %s5936_s12, %s5196_s27  ;;  %s464_s8 = int_to_ptr.vmem [resolvable:$true] %s463_s8 }
  0xa8   : > { %p5203_p1 = scmp.lt.u32.totalorder %s5196_s27, %s5936_s12 }
  0xa9   : > { %p5199_p9 = pnand %p5197_p7, %p5481_p8 }
  0xab   : > { %p5200_p4 = pneg %p5199_p9 }
  0xad   : > { %p5205_p3 = pnand %p5203_p1, %p5200_p4 }
  0xaf   : > { %5208 = shalt.err (!%p5205_p3)
}
  0xb0   : > { %s5209_s7 = scalar_lea.vmem %s464_s8, 16384  ;;  %p5217_p13 = scmp.lt.s32.totalorder %s464_s8, %s464_s8 }
  0xb1   : > { %p5210_p10 = scmp.ne.s32.totalorder %s464_s8, %s5209_s7  ;;  %p5218_p0 = scmp.lt.s32.totalorder %s5209_s7, %s5209_s7 }
  0xb3   : > { %p5212_p11 = pnand %p5210_p10, %p5481_p8  ;;  %p5219_p2 = por %p5218_p0, %p5217_p13 }
  0xb5   : > { %p5213_p12 = pneg %p5212_p11 }
  0xb7   : > { %p5220_p5 = pnand %p5219_p2, %p5213_p12 }
  0xb9   : > { %5223 = shalt.err (!%p5220_p5)
}
  0xba   : > { %4526 = dma.hbm_to_vmem [thread:$0]  (!%p5467_p6), %s5936_s12, 16384, %s464_s8, [#allocation16], %s5341_s18, %s5341_s18, %s5342_s9  }
  0xbb   : > { %s4017_s25 = sadd.s32 4294967294, %s5336_s16   ;;  %s5623_s21 = sadd.s32 1, %s5336_s16  }
  0xbc   : > { %s41_s24 = sadd.s32 1, %s5332_s15  ;;  %s38_s1 = ssub.s32 %s5336_s16, %s5623_s21 }
  0xbd   : > { %p48_p8 = scmp.ne.s32.totalorder %s5332_s15, %s5328_s30  ;;  %p39_p7 = scmp.eq.s32.totalorder %s38_s1, 0 }
  0xbe   : > { %p49_p9 = scmp.eq.s32.totalorder %s5336_s16, 0  ;;  %p54_p4 = scmp.ne.s32.totalorder %s5328_s30, %s5324_s29 }
  0xbf   : > { %p351_p1 = scmp.eq.s32.totalorder %s5451_s19, 1  ;;  %p5956_p10 = scmp.eq.s32.totalorder %s5451_s19, 0 }
  0xc0   : > { %s5635_s3 = scalar_select %p39_p7, %s5332_s15, %s41_s24  }
  0xc1   : > { %p50_p3 = por %p49_p9, %p48_p8  ;;  %p5639_p11 = por %p5956_p10, %p54_p4 }
  0xc2   : > { %p5643_p6 = por %p351_p1, %p48_p8  ;;  %p357_p12 = scmp.eq.s32.totalorder %s4017_s25, 1 }
  0xc3   : > { %p4542_p13 = scmp.lt.s32.totalorder %s5336_s16, 2  ;;  %s480_s9 = sand.u32 1, %s5332_s15  }
  0xc4   : > { %s5958_s18 = scalar_select %p5643_p6, 1, 0 }
  0xc5   : > { %p5649_p0 = por %p357_p12, %p54_p4  ;;  %s4027_s14 = sshll.u32 %s480_s9, 4 }
  0xc6   : > { %s4439_s27 = sshll.u32 %s5336_s16, 8  ;;  %s484_s17 = scalar_lea.vmem [#allocation3], %s4027_s14 }
  0xc7   : > { %s5959_s8 = scalar_select %p5649_p0, 1, 0 }
  0xc8   : > { %s5657_s26 = scalar_lea.hbm %s5924_s0, %s4439_s27  ;;  %s492_s7 = sshll.u32 %s484_s17, 4  ;;  %s5663_s7 = int_to_ptr.vmem [resolvable:$true] %s492_s7 }
  0xc9   : > { %p5659_p2 = pnand %p4542_p13, %p50_p3  ;;  %s481_s22 = scalar_lea.sflag [#allocation4], %s480_s9 }
  0xca   : > { %s5224_s25 = scalar_lea.hbm %s5657_s26, 256  ;;  %s5229_s14 = scalar_lea.hbm %s5924_s0, 512 }
  0xcb   : > { %p5225_p5 = scmp.ne.s32.totalorder %s5657_s26, %s5224_s25  ;;  %p5226_p8 = pneg %p5659_p2 }
  0xcc   : > { %p5230_p4 = scmp.lt.u32.totalorder %s5657_s26, %s5924_s0  ;;  %p5231_p1 = scmp.lt.u32.totalorder %s5229_s14, %s5224_s25 }
  0xcd   : > { %p5227_p7 = pnand %p5226_p8, %p5225_p5  ;;  %p5233_p10 = scmp.lt.u32.totalorder %s5224_s25, %s5657_s26 }
  0xce   : > { %p5232_p3 = por %p5231_p1, %p5230_p4 }
  0xcf   : > { %p5228_p9 = pneg %p5227_p7 }
  0xd0   : > { %p5234_p12 = por %p5233_p10, %p5232_p3 }
  0xd2   : > { %p5235_p13 = pnand %p5234_p12, %p5228_p9 }
  0xd4   : > { %5238 = shalt.err (!%p5235_p13)
}
  0xd5   : > { %s5239_s9 = scalar_lea.vmem %s5663_s7, 256  ;;  %s5351_s23 = smov [#allocation3]  }
  0xd6   : > { %p5240_p5 = scmp.ne.s32.totalorder %s5663_s7, %s5239_s9  ;;  %s5244_s17 = sshll.u32 %s5351_s23, 4  ;;  %s5245_s17 = int_to_ptr.vmem [resolvable:$false] %s5244_s17 }
  0xd7   : > { %s5246_s24 = scalar_lea.vmem %s5245_s17, 512  ;;  %p5247_p6 = scmp.lt.s32.totalorder %s5663_s7, %s5245_s17 }
  0xd8   : > { %p5242_p7 = pnand %p5240_p5, %p5226_p8  ;;  %p5248_p4 = scmp.lt.s32.totalorder %s5246_s24, %s5239_s9 }
  0xda   : > { %p5243_p0 = pneg %p5242_p7  ;;  %p5249_p1 = por %p5248_p4, %p5247_p6 }
  0xdc   : > { %p5250_p3 = pnand %p5249_p1, %p5243_p0 }
  0xde   : > { %5253 = shalt.err (!%p5250_p3)
}
  0xdf   : > { %4530 = dma.hbm_to_vmem [thread:$0]  (!%p5659_p2), %s5657_s26, 256, %s5663_s7, %s481_s22  }
  0xe0   : > { %p5961_p9 = scmp.ne.s32.totalorder %s5951_s20, 0 }
  0xe1   : > { %s5693_s25 = sand.u32 (!%p5961_p9), 1, %s5328_s30  }
  0xe2   : > { %501 = sbr.rel (%p5961_p9) target bundleno = 2621 (0xa3d), region = 76  ;;  %s4031_s1 = sshll.u32 (!%p5961_p9), %s5693_s25, 4 }
  0xe3   : > { %s504_s14 = scalar_lea.sflag (!%p5961_p9), [#allocation4], %s5693_s25  ;;  %s5699_s27 = scalar_lea.vmem (!%p5961_p9), [#allocation3], %s4031_s1 }
  0xe9   : > { %5299 = dma.done.wait (%p5639_p11), %s504_s14, 256  }
  0xea   : > { %5301 = vsyncadd (%p5639_p11), %s504_s14, 4294967040  ;;  %p5962_p6 = scmp.eq.s32.totalorder %s5451_s19, 0 }
  0xec   : > { %5303 = dma.done.wait (%p5962_p6), [#allocation7], 160   ;;  %p5963_p0 = pmov %p5962_p6 }
  0xee   : > { %5305 = vsyncadd (%p5963_p0), [#allocation7], 4294967136  ;;  %p5964_p2 = pmov %p5963_p0 }
  0xef   : > { %p5965_p8 = pmov %p5963_p0 }
  0xf0   : > { %5307 = dma.done.wait (%p5964_p2), [#allocation10], 12320  }
  0xf1   : > { %5309 = vsyncadd (%p5965_p8), [#allocation10], 4294954976  ;;  %p5966_p10 = pmov %p5963_p0 }
  0xf2   : > { %p5967_p12 = pmov %p5963_p0 }
  0xf3   : > { %5311 = dma.done.wait (%p5966_p10), [#allocation13], 20480  }
  0xf4   : > { %5313 = vsyncadd (%p5967_p12), [#allocation13], 4294946816  ;;  %p5968_p11 = pmov %p5963_p0 }
  0xf5   : > { %p5969_p13 = pmov %p5963_p0 }
  0xf6   : > { %5315 = dma.done.wait (%p5968_p11), [#allocation16], 16384  }
  0xf7   : > { %5317 = vsyncadd (%p5969_p13), [#allocation16], 4294950912  ;;  %v5722_v0 = vld [vmem:[%s5699_s27] sm:$0xff]  ;;  %v5725_v1 = vld [vmem:[%s5699_s27 + $0x8] sm:$0xff]  ;;  %vm5353_vm0 = vmmov 0   ;;  %vm1423_vm1 = vcmask 1043456  }
  0xf8   : > { %v586_v2 = vadd.f32 %v5725_v1, %v5722_v0  ;;  %v4598_v3 = vld [vmem:[#allocation11 + $0x4] ss:$24 sps:$4 sm:$0xff]   ;;  %v4600_v4 = vld [vmem:[#allocation11] ss:$24 sps:$4 sm:$0xff]   ;;  %v4604_v7 = vld [vmem:[#allocation11 + $0x34] ss:$24 sps:$4 sm:$0xff]  }
  0xf9   : > { %v4601_v5 = vld [vmem:[#allocation11 + $0xc] ss:$24 sps:$4 sm:$0xff]   ;;  %v4603_v6 = vld [vmem:[#allocation11 + $0x8] ss:$24 sps:$4 sm:$0xff]   ;;  %1239 = vmatprep.subr.bf16.mxu0 %v4598_v3  ;;  %v4607_v8 = vld [vmem:[#allocation11 + $0x3c] ss:$24 sps:$4 sm:$0xff]  }
  0xfa   : > { %587 = vadd.xlane.f32.xlu0 %v586_v2  ;;  %1280 = vmatprep.subr.bf16.mxu1 %v4601_v5  ;;  %v4606_v9 = vld [vmem:[#allocation11 + $0x30] ss:$24 sps:$4 sm:$0xff]   ;;  %v4610_v11 = vld [vmem:[#allocation11 + $0x64] ss:$24 sps:$4 sm:$0xff]   ;;  %v4612_v13 = vld [vmem:[#allocation11 + $0x60] ss:$24 sps:$4 sm:$0xff]  }
  0xfb   : > { %1240 = vmatpush1.bf16.msra.mxu0 %v4600_v4  ;;  %1281 = vmatpush1.bf16.msra.mxu1 %v4603_v6  ;;  %v4609_v10 = vld [vmem:[#allocation11 + $0x38] ss:$24 sps:$4 sm:$0xff]   ;;  %v4613_v12 = vld [vmem:[#allocation11 + $0x6c] ss:$24 sps:$4 sm:$0xff]   ;;  %v4615_v14 = vld [vmem:[#allocation11 + $0x68] ss:$24 sps:$4 sm:$0xff]  }
  0xfc   : > { %1241 = vmatprep.subr.bf16.mxu0 %v4604_v7  ;;  %1282 = vmatprep.subr.bf16.mxu1 %v4607_v8  ;;  %v4616_v15 = vld [vmem:[#allocation11 + $0x94] ss:$24 sps:$4 sm:$0xff]   ;;  %v4618_v17 = vld [vmem:[#allocation11 + $0x90] ss:$24 sps:$4 sm:$0xff]   ;;  %v4622_v19 = vld [vmem:[#allocation11 + $0xc4] ss:$24 sps:$4 sm:$0xff]  }
  0xfd   : > { %v4619_v16 = vld [vmem:[#allocation11 + $0x9c] ss:$24 sps:$4 sm:$0xff]   ;;  %v4621_v18 = vld [vmem:[#allocation11 + $0x98] ss:$24 sps:$4 sm:$0xff]   ;;  %v4625_v20 = vld [vmem:[#allocation11 + $0xcc] ss:$24 sps:$4 sm:$0xff]  }
  0xfe   : > { %v4624_v21 = vld [vmem:[#allocation11 + $0xc0] ss:$24 sps:$4 sm:$0xff]   ;;  %v4628_v23 = vld [vmem:[#allocation11 + $0xf4] ss:$24 sps:$4 sm:$0xff]   ;;  %v4630_v25 = vld [vmem:[#allocation11 + $0xf0] ss:$24 sps:$4 sm:$0xff]  }
  0xff   : > { %1242 = vmatpush1.bf16.msra.mxu0 %v4606_v9  ;;  %1283 = vmatpush1.bf16.msra.mxu1 %v4609_v10  ;;  %v4627_v22 = vld [vmem:[#allocation11 + $0xc8] ss:$24 sps:$4 sm:$0xff]   ;;  %v4631_v24 = vld [vmem:[#allocation11 + $0xfc] ss:$24 sps:$4 sm:$0xff]   ;;  %v4633_v26 = vld [vmem:[#allocation11 + $0xf8] ss:$24 sps:$4 sm:$0xff]  }
 0x100   : > { %1243 = vmatprep.subr.bf16.mxu0 %v4610_v11  ;;  %1284 = vmatprep.subr.bf16.mxu1 %v4613_v12  ;;  %v4634_v27 = vld [vmem:[#allocation11 + $0x124] ss:$24 sps:$4 sm:$0xff]   ;;  %v4636_v29 = vld [vmem:[#allocation11 + $0x120] ss:$24 sps:$4 sm:$0xff]   ;;  %v4640_v31 = vld [vmem:[#allocation11 + $0x154] ss:$24 sps:$4 sm:$0xff]  }
 0x101   : > { %v4637_v28 = vld [vmem:[#allocation11 + $0x12c] ss:$24 sps:$4 sm:$0xff]   ;;  %v4639_v30 = vld [vmem:[#allocation11 + $0x128] ss:$24 sps:$4 sm:$0xff]   ;;  %v4643_v32 = vld [vmem:[#allocation11 + $0x15c] ss:$24 sps:$4 sm:$0xff]  }
 0x102   : > { %v4642_v33 = vld [vmem:[#allocation11 + $0x150] ss:$24 sps:$4 sm:$0xff]   ;;  %v4646_v35 = vld [vmem:[#allocation11 + $0x184] ss:$24 sps:$4 sm:$0xff]   ;;  %v4648_v37 = vld [vmem:[#allocation11 + $0x180] ss:$24 sps:$4 sm:$0xff]  }
 0x103   : > { %1244 = vmatpush1.bf16.msra.mxu0 %v4612_v13  ;;  %1285 = vmatpush1.bf16.msra.mxu1 %v4615_v14  ;;  %v4645_v34 = vld [vmem:[#allocation11 + $0x158] ss:$24 sps:$4 sm:$0xff]   ;;  %v4649_v36 = vld [vmem:[#allocation11 + $0x18c] ss:$24 sps:$4 sm:$0xff]   ;;  %v4651_v38 = vld [vmem:[#allocation11 + $0x188] ss:$24 sps:$4 sm:$0xff]   ;;  %v604_v13 = vlaneseq }
 0x104   : > { %1245 = vmatprep.subr.bf16.mxu0 %v4616_v15  ;;  %1286 = vmatprep.subr.bf16.mxu1 %v4619_v16  ;;  %v4652_v39 = vld [vmem:[#allocation11 + $0x1b4] ss:$24 sps:$4 sm:$0xff]   ;;  %v4654_v41 = vld [vmem:[#allocation11 + $0x1b0] ss:$24 sps:$4 sm:$0xff]   ;;  %v4658_v43 = vld [vmem:[#allocation11 + $0x1e4] ss:$24 sps:$4 sm:$0xff]  }
 0x105   : > { %v4655_v40 = vld [vmem:[#allocation11 + $0x1bc] ss:$24 sps:$4 sm:$0xff]   ;;  %v4657_v42 = vld [vmem:[#allocation11 + $0x1b8] ss:$24 sps:$4 sm:$0xff]   ;;  %v4661_v52 = vld [vmem:[#allocation11 + $0x1ec] ss:$24 sps:$4 sm:$0xff]  }
 0x106   : > { %v4660_v51 = vld [vmem:[#allocation11 + $0x1e0] ss:$24 sps:$4 sm:$0xff]   ;;  %v4664_v54 = vld [vmem:[#allocation11 + $0x214] ss:$24 sps:$4 sm:$0xff]   ;;  %v4666_v55 = vld [vmem:[#allocation11 + $0x210] ss:$24 sps:$4 sm:$0xff]  }
 0x107   : > { %1246 = vmatpush1.bf16.msra.mxu0 %v4618_v17  ;;  %1287 = vmatpush1.bf16.msra.mxu1 %v4621_v18  ;;  %v4663_v53 = vld [vmem:[#allocation11 + $0x1e8] ss:$24 sps:$4 sm:$0xff]   ;;  %v4667_v56 = vld [vmem:[#allocation11 + $0x21c] ss:$24 sps:$4 sm:$0xff]   ;;  %v4669_v57 = vld [vmem:[#allocation11 + $0x218] ss:$24 sps:$4 sm:$0xff]  }
 0x108   : > { %1247 = vmatprep.subr.bf16.mxu0 %v4622_v19  ;;  %1288 = vmatprep.subr.bf16.mxu1 %v4625_v20  ;;  %v4670_v58 = vld [vmem:[#allocation11 + $0x244] ss:$24 sps:$4 sm:$0xff]   ;;  %v4672_v59 = vld [vmem:[#allocation11 + $0x240] ss:$24 sps:$4 sm:$0xff]   ;;  %v4676_v62 = vld [vmem:[#allocation11 + $0x274] ss:$24 sps:$4 sm:$0xff]  }
 0x109   : > { %v4673_v60 = vld [vmem:[#allocation11 + $0x24c] ss:$24 sps:$4 sm:$0xff]   ;;  %v4675_v61 = vld [vmem:[#allocation11 + $0x248] ss:$24 sps:$4 sm:$0xff]   ;;  %v4679_v63 = vld [vmem:[#allocation11 + $0x27c] ss:$24 sps:$4 sm:$0xff]  }
 0x10a   : > { %v4682_v2 = vld [vmem:[#allocation11 + $0x2a4] ss:$24 sps:$4 sm:$0xff]   ;;  %v4684_v4 = vld [vmem:[#allocation11 + $0x2a0] ss:$24 sps:$4 sm:$0xff]   ;;  %v4688_v6 = vld [vmem:[#allocation11 + $0x2d4] ss:$24 sps:$4 sm:$0xff]  }
 0x10b   : > { %1248 = vmatpush1.bf16.msra.mxu0 %v4624_v21  ;;  %1289 = vmatpush1.bf16.msra.mxu1 %v4627_v22  ;;  %v4685_v3 = vld [vmem:[#allocation11 + $0x2ac] ss:$24 sps:$4 sm:$0xff]   ;;  %v4687_v5 = vld [vmem:[#allocation11 + $0x2a8] ss:$24 sps:$4 sm:$0xff]   ;;  %v4691_v7 = vld [vmem:[#allocation11 + $0x2dc] ss:$24 sps:$4 sm:$0xff]  }
 0x10c   : > { %1249 = vmatprep.subr.bf16.mxu0 %v4628_v23  ;;  %1290 = vmatprep.subr.bf16.mxu1 %v4631_v24  ;;  %v4690_v8 = vld [vmem:[#allocation11 + $0x2d0] ss:$24 sps:$4 sm:$0xff]   ;;  %v4696_v10 = vld [vmem:[#allocation11 + $0x14] ss:$24 sps:$4 sm:$0xff]   ;;  %v5739_v15 = vshrl.u32 %v604_v13, 7  ;;  %vm1407_vm2 = vcmask 64512  }
 0x10d   : > { %v4693_v9 = vld [vmem:[#allocation11 + $0x2d8] ss:$24 sps:$4 sm:$0xff]   ;;  %v584_v18 = vld [vmem:[#allocation8] sm:$0x3]  ;;  %v585_v19 = vld [vmem:[#allocation9] sm:$0x3] }
 0x10e   : > { %v5742_v16 = vsub.s32 1, %v5739_v15  ;;  %v5745_v17 = vsub.s32 0, %v5739_v15  ;;  %s5970_s13 = sld [smem:[#allocation26_spill]]  ;;  %s5971_s9 = sld [smem:[#allocation27_spill]] }
 0x10f   : > { %1250 = vmatpush1.bf16.msra.mxu0 %v4630_v25  ;;  %1291 = vmatpush1.bf16.msra.mxu1 %v4633_v26  ;;  %s5972_s24 = sld [smem:[#allocation28_spill]]  ;;  %s5973_s20 = sld [smem:[#allocation29_spill]] }
 0x110   : > { %1251 = vmatprep.subr.bf16.mxu0 %v4634_v27  ;;  %1292 = vmatprep.subr.bf16.mxu1 %v4637_v28  ;;  %v611_v20 = vrot.slane %v584_v18, %v5742_v16  ;;  %v607_v21 = vrot.slane %v584_v18, %v5745_v17  ;;  %v624_v24 = vrot.slane %v585_v19, %v5742_v16  ;;  %s5974_s7 = sld [smem:[#allocation30_spill]]  ;;  %s579_s22 = scalar_lea.vmem [#allocation17], %s4031_s1 }
 0x111   : > { %v620_v26 = vrot.slane %v585_v19, %v5745_v17  ;;  %s3880_s28 = sshll.u32 %s579_s22, 4  ;;  %s5975_s17 = sld [smem:[#allocation31_spill]]  ;;  %s5882_s28 = int_to_ptr.vmem [resolvable:$true] %s3880_s28 }
 0x112   : > { %s5254_s1 = scalar_lea.vmem %s5882_s28, 256  ;;  %p5976_p7 = scmp.ne.s32.totalorder %s5958_s18, 0 }
 0x113   : > { %1252 = vmatpush1.bf16.msra.mxu0 %v4636_v29  ;;  %1293 = vmatpush1.bf16.msra.mxu1 %v4639_v30  ;;  %p5255_p5 = scmp.ne.s32.totalorder %s5882_s28, %s5254_s1  ;;  %s5354_s14 = smov [#allocation17]  }
 0x114   : > { %1253 = vmatprep.subr.bf16.mxu0 %v4640_v31  ;;  %1294 = vmatprep.subr.bf16.mxu1 %v4643_v32  ;;  %v4694_v32 = vld [vmem:[#allocation11 + $0x10] ss:$24 sps:$4 sm:$0xff]  }
 0x115   : > { %p5256_p4 = pnand %p5255_p5, %p5976_p7 }
 0x117   : > { %1254 = vmatpush1.bf16.msra.mxu0 %v4642_v33  ;;  %1295 = vmatpush1.bf16.msra.mxu1 %v4645_v34  ;;  %v4699_v34 = vld [vmem:[#allocation11 + $0x44] ss:$24 sps:$4 sm:$0xff]   ;;  %p5257_p1 = pneg %p5256_p4 }
 0x118   : > { %1255 = vmatprep.subr.bf16.mxu0 %v4646_v35  ;;  %1296 = vmatprep.subr.bf16.mxu1 %v4649_v36  ;;  %v4697_v35 = vld [vmem:[#allocation11 + $0x40] ss:$24 sps:$4 sm:$0xff]   ;;  %v4702_v36 = vld [vmem:[#allocation11 + $0x74] ss:$24 sps:$4 sm:$0xff]  }
 0x11b   : > { %1256 = vmatpush1.bf16.msra.mxu0 %v4648_v37  ;;  %1297 = vmatpush1.bf16.msra.mxu1 %v4651_v38  ;;  %v4700_v37 = vld [vmem:[#allocation11 + $0x70] ss:$24 sps:$4 sm:$0xff]   ;;  %v4705_v38 = vld [vmem:[#allocation11 + $0xa4] ss:$24 sps:$4 sm:$0xff]  }
 0x11c   : > { %1257 = vmatprep.subr.bf16.mxu0 %v4652_v39  ;;  %1298 = vmatprep.subr.bf16.mxu1 %v4655_v40  ;;  %v4703_v39 = vld [vmem:[#allocation11 + $0xa0] ss:$24 sps:$4 sm:$0xff]   ;;  %v4708_v40 = vld [vmem:[#allocation11 + $0xd4] ss:$24 sps:$4 sm:$0xff]  }
 0x11f   : > { %1258 = vmatpush1.bf16.msra.mxu0 %v4654_v41  ;;  %1299 = vmatpush1.bf16.msra.mxu1 %v4657_v42  ;;  %v4706_v41 = vld [vmem:[#allocation11 + $0xd0] ss:$24 sps:$4 sm:$0xff]   ;;  %v4711_v42 = vld [vmem:[#allocation11 + $0x104] ss:$24 sps:$4 sm:$0xff]  }
 0x120   : > { %1259 = vmatprep.subr.bf16.mxu0 %v4658_v43  ;;  %1300 = vmatprep.subr.bf16.mxu1 %v4661_v52  ;;  %v4709_v43 = vld [vmem:[#allocation11 + $0x100] ss:$24 sps:$4 sm:$0xff]   ;;  %v4726_v52 = vld [vmem:[#allocation11 + $0x1f4] ss:$24 sps:$4 sm:$0xff]  }
 0x123   : > { %1260 = vmatpush1.bf16.msra.mxu0 %v4660_v51  ;;  %1301 = vmatpush1.bf16.msra.mxu1 %v4663_v53  ;;  %v4721_v51 = vld [vmem:[#allocation11 + $0x1c0] ss:$24 sps:$4 sm:$0xff]   ;;  %v4724_v53 = vld [vmem:[#allocation11 + $0x1f0] ss:$24 sps:$4 sm:$0xff]  }
 0x124   : > { %1261 = vmatprep.subr.bf16.mxu0 %v4664_v54  ;;  %1302 = vmatprep.subr.bf16.mxu1 %v4667_v56  ;;  %v4729_v54 = vld [vmem:[#allocation11 + $0x224] ss:$24 sps:$4 sm:$0xff]   ;;  %v4732_v56 = vld [vmem:[#allocation11 + $0x254] ss:$24 sps:$4 sm:$0xff]  }
 0x127   : > { %1262 = vmatpush1.bf16.msra.mxu0 %v4666_v55  ;;  %1303 = vmatpush1.bf16.msra.mxu1 %v4669_v57  ;;  %v4727_v55 = vld [vmem:[#allocation11 + $0x220] ss:$24 sps:$4 sm:$0xff]   ;;  %v4730_v57 = vld [vmem:[#allocation11 + $0x250] ss:$24 sps:$4 sm:$0xff]  }
 0x128   : > { %1263 = vmatprep.subr.bf16.mxu0 %v4670_v58  ;;  %1304 = vmatprep.subr.bf16.mxu1 %v4673_v60  ;;  %v4735_v58 = vld [vmem:[#allocation11 + $0x284] ss:$24 sps:$4 sm:$0xff]   ;;  %v4738_v60 = vld [vmem:[#allocation11 + $0x2b4] ss:$24 sps:$4 sm:$0xff]  }
 0x12b   : > { %1264 = vmatpush1.bf16.msra.mxu0 %v4672_v59  ;;  %1305 = vmatpush1.bf16.msra.mxu1 %v4675_v61  ;;  %v4733_v59 = vld [vmem:[#allocation11 + $0x280] ss:$24 sps:$4 sm:$0xff]   ;;  %v4736_v61 = vld [vmem:[#allocation11 + $0x2b0] ss:$24 sps:$4 sm:$0xff]  }
 0x12c   : > { %1265 = vmatprep.subr.bf16.mxu0 %v4676_v62  ;;  %1306 = vmatprep.subr.bf16.mxu1 %v4679_v63  ;;  %v4741_v62 = vld [vmem:[#allocation11 + $0x2e4] ss:$24 sps:$4 sm:$0xff]   ;;  %v4739_v63 = vld [vmem:[#allocation11 + $0x2e0] ss:$24 sps:$4 sm:$0xff]  }
 0x187   : > { %v588_v44 = vpop.xlane.xlu0 %587 }
 0x188   : > { %v590_v45 = vmul.f32 0.00390625, %v588_v44  ;;  %v4714_v44 = vld [vmem:[#allocation11 + $0x134] ss:$24 sps:$4 sm:$0xff]  }
 0x18a   : > { %v5730_v46 = vsub.f32 %v5722_v0, %v590_v45  ;;  %v5733_v47 = vsub.f32 %v5725_v1, %v590_v45  ;;  %v4678_v0 = vld [vmem:[#allocation11 + $0x270] ss:$24 sps:$4 sm:$0xff]  }
 0x18b   : > { %v4681_v1 = vld [vmem:[#allocation11 + $0x278] ss:$24 sps:$4 sm:$0xff]   ;;  %1266 = vmatpush1.bf16.msra.mxu0 %v4678_v0  ;;  %v5352_v0 = vmov 0.0  }
 0x18c   : > { %v593_v48 = vmul.f32 %v5730_v46, %v5730_v46  ;;  %v594_v49 = vmul.f32 %v5733_v47, %v5733_v47  ;;  %1307 = vmatpush1.bf16.msra.mxu1 %v4681_v1  ;;  %1267 = vmatprep.subr.bf16.mxu0 %v4682_v2  ;;  %v4712_v45 = vld [vmem:[#allocation11 + $0x130] ss:$24 sps:$4 sm:$0xff]   ;;  %v739_v1 = vsub.s32 2, %v5739_v15  ;;  %v727_v2 = vld [vmem:[%s5929_s5] sm:$0x3f] }
 0x18d   : > { %1308 = vmatprep.subr.bf16.mxu1 %v4685_v3  ;;  %v743_v3 = vsub.s32 3, %v5739_v15  ;;  %v736_v19 = vrot.slane %v727_v2, %v5742_v16 }
 0x18e   : > { %v595_v50 = vadd.f32 %v594_v49, %v593_v48  ;;  %v4720_v48 = vld [vmem:[#allocation11 + $0x194] ss:$24 sps:$4 sm:$0xff]   ;;  %v4718_v49 = vld [vmem:[#allocation11 + $0x190] ss:$24 sps:$4 sm:$0xff]  }
 0x18f   : > { %1268 = vmatpush1.bf16.msra.mxu0 %v4684_v4  ;;  %v740_v4 = vrot.slane %v727_v2, %v739_v1 }
 0x190   : > { %596 = vadd.xlane.f32.xlu0 %v595_v50  ;;  %1309 = vmatpush1.bf16.msra.mxu1 %v4687_v5  ;;  %v4723_v50 = vld [vmem:[#allocation11 + $0x1c4] ss:$24 sps:$4 sm:$0xff]   ;;  %v744_v5 = vrot.slane %v727_v2, %v743_v3 }
 0x191   : > { %1269 = vmatprep.subr.bf16.mxu0 %v4688_v6  ;;  %1310 = vmatprep.subr.bf16.mxu1 %v4691_v7 }
 0x193   : > { %1270 = vmatpush1.bf16.msra.mxu0 %v4690_v8 }
 0x194   : > { %1311 = vmatpush1.bf16.msra.mxu1 %v4693_v9  ;;  %1321 = vmatprep.subr.bf16.mxu0 %v4696_v10 }
 0x195   : > { %4461 = vmatprep.subr.bf16.mxu1 %v5352_v0 }
 0x21d   : > { %v597_v11 = vpop.xlane.xlu0 %596 }
 0x21e   : > { %v598_v12 = vmul.f32 0.00390625, %v597_v11  ;;  %v732_v11 = vrot.slane %v727_v2, %v5745_v17 }
 0x220   : > { %v599_v14 = vadd.f32 1e-05, %v598_v12 }
 0x222   : > { %4982 = vrsqrt.f32 %v599_v14 }
 0x22c   : > { %v4983_v22 = vpop.eup %4982 }
 0x22d   : > { %v602_v23 = vmul.f32 %v4983_v22, %v5733_v47  ;;  %v601_v25 = vmul.f32 %v4983_v22, %v5730_v46  ;;  %v4717_v46 = vld [vmem:[#allocation11 + $0x164] ss:$24 sps:$4 sm:$0xff]   ;;  %v4715_v47 = vld [vmem:[#allocation11 + $0x160] ss:$24 sps:$4 sm:$0xff]  }
 0x22f   : > { %v615_v27 = vmul.f32 %v611_v20, %v602_v23  ;;  %v614_v28 = vmul.f32 %v607_v21, %v601_v25 }
 0x231   : > { %v628_v29 = vadd.f32 %v624_v24, %v615_v27  ;;  %v627_v30 = vadd.f32 %v620_v26, %v614_v28  ;;  %v747_v27 = vsub.s32 4, %v5739_v15  ;;  %v751_v28 = vsub.s32 5, %v5739_v15 }
 0x233   : > { %v630_v31 = vpack.c.bf16 %v628_v29, %v628_v29  ;;  %v5753_v33 = vpack.c.bf16 %v627_v30, %v627_v30  ;;  %v748_v29 = vrot.slane %v727_v2, %v747_v27  ;;  %v752_v30 = vrot.slane %v727_v2, %v751_v28 }
 0x235   : > { %1271 = vmatprep.mubr.bf16.mxu0 %v630_v31  ;;  %1312 = vmatprep.mubr.bf16.mxu1 %v630_v31 }
 0x236   : > { %1272 = vmatmul.mubr.bf16.vlgmr.msra.gmra.mrb[0].mxu0 %v5753_v33  ;;  %1313 = vmatmul.mubr.bf16.vlgmr.msra.gmra.mrb[0].mxu1 %v5753_v33 }
 0x237   : > { %1322 = vmatpush1.bf16.msra.mxu0 %v4694_v32  ;;  %1353 = vmatprep.mubr.bf16.mxu0 %v630_v31 }
 0x238   : > { %1323 = vmatprep.subr.bf16.mxu0 %v4699_v34  ;;  %4463 = vmatprep.mubr.msk.bf16.mxu1 %vm5353_vm0, %v5352_v0 }
 0x23b   : > { %1324 = vmatpush1.bf16.msra.mxu0 %v4697_v35 }
 0x23c   : > { %1325 = vmatprep.subr.bf16.mxu0 %v4702_v36 }
 0x23f   : > { %1326 = vmatpush1.bf16.msra.mxu0 %v4700_v37 }
 0x240   : > { %1327 = vmatprep.subr.bf16.mxu0 %v4705_v38 }
 0x243   : > { %1328 = vmatpush1.bf16.msra.mxu0 %v4703_v39 }
 0x244   : > { %1329 = vmatprep.subr.bf16.mxu0 %v4708_v40 }
 0x247   : > { %1330 = vmatpush1.bf16.msra.mxu0 %v4706_v41 }
 0x248   : > { %1331 = vmatprep.subr.bf16.mxu0 %v4711_v42 }
 0x24b   : > { %1332 = vmatpush1.bf16.msra.mxu0 %v4709_v43 }
 0x24c   : > { %1333 = vmatprep.subr.bf16.mxu0 %v4714_v44  ;;  %v583_v44 = vld [vmem:[#allocation6] sm:$0xff] }
 0x24f   : > { %1334 = vmatpush1.bf16.msra.mxu0 %v4712_v45 }
 0x250   : > { %1335 = vmatprep.subr.bf16.mxu0 %v4717_v46 }
 0x253   : > { %1336 = vmatpush1.bf16.msra.mxu0 %v4715_v47 }
 0x254   : > { %1337 = vmatprep.subr.bf16.mxu0 %v4720_v48 }
 0x257   : > { %1338 = vmatpush1.bf16.msra.mxu0 %v4718_v49 }
 0x258   : > { %1339 = vmatprep.subr.bf16.mxu0 %v4723_v50 }
 0x25b   : > { %1340 = vmatpush1.bf16.msra.mxu0 %v4721_v51 }
 0x25c   : > { %1341 = vmatprep.subr.bf16.mxu0 %v4726_v52 }
 0x25f   : > { %1342 = vmatpush1.bf16.msra.mxu0 %v4724_v53 }
 0x260   : > { %1343 = vmatprep.subr.bf16.mxu0 %v4729_v54 }
 0x263   : > { %1344 = vmatpush1.bf16.msra.mxu0 %v4727_v55 }
 0x264   : > { %1345 = vmatprep.subr.bf16.mxu0 %v4732_v56 }
 0x267   : > { %1346 = vmatpush1.bf16.msra.mxu0 %v4730_v57 }
 0x268   : > { %1347 = vmatprep.subr.bf16.mxu0 %v4735_v58 }
 0x26b   : > { %1348 = vmatpush1.bf16.msra.mxu0 %v4733_v59 }
 0x26c   : > { %1349 = vmatprep.subr.bf16.mxu0 %v4738_v60 }
 0x26f   : > { %1350 = vmatpush1.bf16.msra.mxu0 %v4736_v61 }
 0x270   : > { %1351 = vmatprep.subr.bf16.mxu0 %v4741_v62 }
 0x273   : > { %1352 = vmatpush1.bf16.msra.mxu0 %v4739_v63 }
 0x274   : > { %4449 = vmatprep.subr.bf16.mxu0 %v5352_v0 }
 0x276   : > { %1354 = vmatmul.mubr.bf16.vlgmr.msra.gmra.mrb[4].mxu0 %v5753_v33 }
 0x277   : > { %4451 = vmatprep.mubr.msk.bf16.mxu0 %vm5353_vm0, %v5352_v0 }
 0x309   : > { %v1273_v6 = vpop.f32.mrb[0].mxu0  ;;  %v1314_v7 = vpop.f32.mrb[0].mxu1 }
 0x30a   : > { %v1315_v8 = vadd.f32 %v1314_v7, %v740_v4  ;;  %v1275_v9 = vpop.f32.mrb[1].mxu0  ;;  %v1316_v10 = vpop.f32.mrb[1].mxu1  ;;  %v1274_v23 = vadd.f32 %v1273_v6, %v732_v11  ;;  %v4744_v4 = vld [vmem:[#allocation12 + $0x4] ss:$8 sps:$4 sm:$0xff]   ;;  %v4747_v11 = vld [vmem:[#allocation12 + $0x14] ss:$8 sps:$4 sm:$0xff]  }
 0x30b   : > { %v1317_v12 = vadd.f32 %v1316_v10, %v744_v5  ;;  %v1277_v13 = vpop.f32.mrb[2].mxu0  ;;  %v1318_v14 = vpop.f32.mrb[2].mxu1  ;;  %v1276_v24 = vadd.f32 %v1275_v9, %v736_v19  ;;  %v4742_v9 = vld [vmem:[#allocation12] ss:$8 sps:$4 sm:$0xff]   ;;  %v4750_v19 = vld [vmem:[#allocation12 + $0x24] ss:$8 sps:$4 sm:$0xff]  }
 0x30c   : > { %v1363_v18 = vpack.c.bf16 %v1315_v8, %v1315_v8  ;;  %v1278_v20 = vpop.f32.mrb[3].mxu0  ;;  %v1319_v21 = vpop.f32.mrb[3].mxu1  ;;  %v1362_v25 = vpack.c.bf16 %v1274_v23, %v1274_v23  ;;  %v4745_v14 = vld [vmem:[#allocation12 + $0x10] ss:$8 sps:$4 sm:$0xff]   ;;  %v4756_v23 = vld [vmem:[#allocation12 + $0x44] ss:$8 sps:$4 sm:$0xff]  }
 0x30d   : > { %v1469_v22 = vpack.c.bf16 %v1317_v12, %v1317_v12  ;;  %v1468_v26 = vpack.c.bf16 %v1276_v24, %v1276_v24  ;;  %v4748_v20 = vld [vmem:[#allocation12 + $0x20] ss:$8 sps:$4 sm:$0xff]   ;;  %v4753_v21 = vld [vmem:[#allocation12 + $0x34] ss:$8 sps:$4 sm:$0xff]  }
 0x30e   : > { %4450 = vmatpush3.bf16.xpose.msra.mxu0 %v1363_v18  ;;  %v4754_v24 = vld [vmem:[#allocation12 + $0x40] ss:$8 sps:$4 sm:$0xff]  }
 0x30f   : > { %4462 = vmatpush3.bf16.xpose.msra.mxu1 %v1469_v22  ;;  %4455 = vmatprep.subr.bf16.mxu0 %v5352_v0  ;;  %v4751_v22 = vld [vmem:[#allocation12 + $0x30] ss:$8 sps:$4 sm:$0xff]  }
 0x310   : > { %4467 = vmatprep.subr.bf16.mxu1 %v5352_v0 }
 0x315   : > { %4452 = vmatmul.mubr.bf16.vlgmr.msra.gmra.mrb[8].mxu0 %v1362_v25  ;;  %v4759_v25 = vld [vmem:[#allocation12 + $0x54] ss:$8 sps:$4 sm:$0xff]  }
 0x316   : > { %4464 = vmatmul.mubr.bf16.vlgmr.msra.gmra.mrb[4].mxu1 %v1468_v26  ;;  %4457 = vmatprep.mubr.msk.bf16.mxu0 %vm5353_vm0, %v5352_v0  ;;  %v4757_v26 = vld [vmem:[#allocation12 + $0x50] ss:$8 sps:$4 sm:$0xff]  }
 0x317   : > { %4469 = vmatprep.mubr.msk.bf16.mxu1 %vm5353_vm0, %v5352_v0 }
 0x349   : > { %v1355_v31 = vpop.f32.mrb[4].mxu0 }
 0x34a   : > { %v1356_v32 = vadd.f32 %v1355_v31, %v748_v29  ;;  %v1357_v33 = vpop.f32.mrb[5].mxu0  ;;  %v4762_v29 = vld [vmem:[#allocation12 + $0x64] ss:$8 sps:$4 sm:$0xff]   ;;  %v4765_v31 = vld [vmem:[#allocation12 + $0x74] ss:$8 sps:$4 sm:$0xff]  }
 0x34b   : > { %v1358_v34 = vadd.f32 %v1357_v33, %v752_v30  ;;  %v1359_v35 = vpop.f32.mrb[6].mxu0  ;;  %v4760_v30 = vld [vmem:[#allocation12 + $0x60] ss:$8 sps:$4 sm:$0xff]   ;;  %v4768_v33 = vld [vmem:[#allocation12 + $0x84] ss:$8 sps:$4 sm:$0xff]  }
 0x34c   : > { %v1364_v36 = vpack.c.bf16 %v1356_v32, %v1356_v32  ;;  %v1360_v37 = vpop.f32.mrb[7].mxu0  ;;  %v4763_v32 = vld [vmem:[#allocation12 + $0x70] ss:$8 sps:$4 sm:$0xff]   ;;  %v4771_v35 = vld [vmem:[#allocation12 + $0x94] ss:$8 sps:$4 sm:$0xff]  }
 0x34d   : > { %v1470_v38 = vpack.c.bf16 %v1358_v34, %v1358_v34  ;;  %v4766_v34 = vld [vmem:[#allocation12 + $0x80] ss:$8 sps:$4 sm:$0xff]   ;;  %v4774_v37 = vld [vmem:[#allocation12 + $0xa4] ss:$8 sps:$4 sm:$0xff]  }
 0x34e   : > { %v1425_v39 = vsel %vm1423_vm1, %v1364_v36, 0  ;;  %v4769_v36 = vld [vmem:[#allocation12 + $0x90] ss:$8 sps:$4 sm:$0xff]  }
 0x34f   : > { %v1529_v40 = vsel %vm1423_vm1, %v1470_v38, 0  ;;  %4456 = vmatpush3.bf16.msra.mxu0 %v1425_v39  ;;  %v4772_v38 = vld [vmem:[#allocation12 + $0xa0] ss:$8 sps:$4 sm:$0xff]   ;;  %v4777_v39 = vld [vmem:[#allocation12 + $0xb4] ss:$8 sps:$4 sm:$0xff]  }
 0x350   : > { %4468 = vmatpush3.bf16.msra.mxu1 %v1529_v40  ;;  %v4775_v40 = vld [vmem:[#allocation12 + $0xb0] ss:$8 sps:$4 sm:$0xff]  }
 0x351   : > { %1768 = vmatprep.subr.bf16.mxu1 %v4744_v4  ;;  %v5027_v4 = vld [vmem:[%s5699_s27 + $0x8] sm:$0xff] }
 0x3e8   : > { %v1399_v41 = vpop.f32.mrb[8].mxu0 }
 0x3e9   : > { %v4453_v42 = vpop.f32.mrb[9].mxu0  ;;  %v1505_v43 = vpop.f32.mrb[4].mxu1  ;;  %v1405_v45 = vmul.f32 0.088388346, %v1399_v41  ;;  %v4780_v41 = vld [vmem:[#allocation12 + $0xc4] ss:$8 sps:$4 sm:$0xff]  }
 0x3ea   : > { %v1511_v46 = vmul.f32 0.088388346, %v1505_v43  ;;  %v1402_v47 = vpop.f32.mrb[10].mxu0  ;;  %v4465_v48 = vpop.f32.mrb[5].mxu1  ;;  %v4778_v42 = vld [vmem:[#allocation12 + $0xc0] ss:$8 sps:$4 sm:$0xff]  }
 0x3eb   : > { %v4454_v49 = vpop.f32.mrb[11].mxu0  ;;  %v1508_v50 = vpop.f32.mrb[6].mxu1  ;;  %v1406_v54 = vadd.f32 %v1405_v45, %v583_v44  ;;  %v4783_v43 = vld [vmem:[#allocation12 + $0xd4] ss:$8 sps:$4 sm:$0xff]   ;;  %v4786_v45 = vld [vmem:[#allocation12 + $0xe4] ss:$8 sps:$4 sm:$0xff]  }
 0x3ec   : > { %v4466_v51 = vpop.f32.mrb[7].mxu1  ;;  %v1512_v52 = vadd.f32 %v1511_v46, %v583_v44  ;;  %v4781_v44 = vld [vmem:[#allocation12 + $0xd0] ss:$8 sps:$4 sm:$0xff]   ;;  %v4784_v46 = vld [vmem:[#allocation12 + $0xe0] ss:$8 sps:$4 sm:$0xff]  }
 0x3ed   : > { %v1408_v55 = vsel %vm1407_vm2, %v1406_v54, -inf  ;;  %v4789_v47 = vld [vmem:[#allocation12 + $0xf4] ss:$8 sps:$4 sm:$0xff]   ;;  %v4787_v48 = vld [vmem:[#allocation12 + $0xf0] ss:$8 sps:$4 sm:$0xff]  }
 0x3ee   : > { %v1513_v53 = vsel %vm1407_vm2, %v1512_v52, -inf }
 0x3ef   : > { %1514 = vmax.xlane.f32.xlu1 %v1513_v53 }
 0x3f3   : > { %1409 = vmax.xlane.f32.xlu1 %v1408_v55 }
 0x47c   : > { %v1515_v56 = vpop.xlane.xlu1 %1514 }
 0x47d   : > { %v1516_v57 = vsub.f32 %v1512_v52, %v1515_v56 }
 0x47f   : > { %v1517_v58 = vmul.f32 1.442695, %v1516_v57 }
 0x480   : > { %v1410_v59 = vpop.xlane.xlu1 %1409 }
 0x481   : > { %4984 = vpow2.f32 %v1517_v58  ;;  %v1411_v60 = vsub.f32 %v1406_v54, %v1410_v59  ;;  %v1811_v59 = vld [vmem:[%s5970_s13] sm:$0x3]  ;;  %s4440_s13 = sshll.u32 %s5451_s19, 8  ;;  %s3866_s19 = scalar_lea.sflag [#allocation5], %s5693_s25 }
 0x483   : > { %v1412_v61 = vmul.f32 1.442695, %v1411_v60  ;;  %v1816_v60 = vrot.slane %v1811_v59, %v5745_v17 }
 0x485   : > { %4986 = vpow2.f32 %v1412_v61 }
 0x48b   : > { %v4985_v62 = vpop.eup %4984 }
 0x48c   : > { %v1519_v63 = vsel %vm1407_vm2, %v4985_v62, 0.0 }
 0x48d   : > { %1520 = vadd.xlane.f32.xlu0 %v1519_v63  ;;  %v5026_v63 = vld [vmem:[%s5699_s27] sm:$0xff]  ;;  %s5258_s27 = sshll.u32 %s5354_s14, 4  ;;  %s5259_s27 = int_to_ptr.vmem [resolvable:$false] %s5258_s27 }
 0x48e   : > { %p5261_p3 = scmp.lt.s32.totalorder %s5882_s28, %s5259_s27 }
 0x48f   : > { %v4987_v0 = vpop.eup %4986 }
 0x490   : > { %v1414_v2 = vsel %vm1407_vm2, %v4987_v0, 0.0 }
 0x491   : > { %1415 = vadd.xlane.f32.xlu1 %v1414_v2 }
 0x51a   : > { %v1521_v5 = vpop.xlane.xlu0 %1520 }
 0x51b   : > { %4988 = vrcp.f32 %v1521_v5 }
 0x51e   : > { %v1416_v6 = vpop.xlane.xlu1 %1415 }
 0x51f   : > { %4990 = vrcp.f32 %v1416_v6 }
 0x525   : > { %v4989_v7 = vpop.eup %4988 }
 0x526   : > { %v1523_v8 = vmul.f32 %v4989_v7, %v4985_v62  ;;  %v1820_v62 = vrot.slane %v1811_v59, %v5742_v16 }
 0x528   : > { %v1524_v10 = vpack.c.bf16 %v1523_v8, %v1523_v8 }
 0x529   : > { %v4991_v12 = vpop.eup %4990 }
 0x52a   : > { %v1418_v13 = vmul.f32 %v4991_v12, %v4987_v0  ;;  %4470 = vmatmul.mubr.msk.bf16.vlgmr.msra.gmra.mrb[8].mxu1 %vm1407_vm2, %v1524_v10  ;;  %v1875_v12 = vld [vmem:[#allocation14 + $0x20] sm:$0xff] }
 0x52b   : > { %1769 = vmatpush1.bf16.msra.mxu1 %v4742_v9 }
 0x52c   : > { %v1419_v18 = vpack.c.bf16 %v1418_v13, %v1418_v13  ;;  %1770 = vmatprep.subr.bf16.mxu1 %v4747_v11  ;;  %v1871_v11 = vld [vmem:[#allocation14] sm:$0xff]  ;;  %v1872_v13 = vld [vmem:[#allocation14 + $0x8] sm:$0xff] }
 0x52e   : > { %4458 = vmatmul.mubr.msk.bf16.vlgmr.msra.gmra.mrb[12].mxu0 %vm1407_vm2, %v1419_v18  ;;  %v4171_v18 = vcombine.high %v1871_v11, %v1875_v12 }
 0x52f   : > { %1771 = vmatpush1.bf16.msra.mxu1 %v4745_v14  ;;  %v4170_v14 = vcombine.low %v1871_v11, %v1875_v12  ;;  %v1931_v11 = vld [vmem:[#allocation14 + $0x1e0] sm:$0xff]  ;;  %v1928_v12 = vld [vmem:[#allocation14 + $0x1c8] sm:$0xff] }
 0x530   : > { %1772 = vmatprep.subr.bf16.mxu1 %v4750_v19  ;;  %v1876_v19 = vld [vmem:[#allocation14 + $0x28] sm:$0xff]  ;;  %2681 = vmatprep.subr.bf16.mxu0 %v4171_v18 }
 0x531   : > { %2682 = vmatpush1.bf16.msra.mxu0 %v4170_v14 }
 0x533   : > { %1773 = vmatpush1.bf16.msra.mxu1 %v4748_v20  ;;  %v1879_v20 = vld [vmem:[#allocation14 + $0x40] sm:$0xff] }
 0x534   : > { %1774 = vmatprep.subr.bf16.mxu1 %v4753_v21  ;;  %v1883_v21 = vld [vmem:[#allocation14 + $0x60] sm:$0xff] }
 0x537   : > { %1775 = vmatpush1.bf16.msra.mxu1 %v4751_v22  ;;  %v4172_v22 = vcombine.low %v1872_v13, %v1876_v19 }
 0x538   : > { %1776 = vmatprep.subr.bf16.mxu1 %v4756_v23  ;;  %v4173_v23 = vcombine.high %v1872_v13, %v1876_v19  ;;  %v1932_v13 = vld [vmem:[#allocation14 + $0x1e8] sm:$0xff] }
 0x53b   : > { %1777 = vmatpush1.bf16.msra.mxu1 %v4754_v24  ;;  %v4179_v24 = vcombine.high %v1879_v20, %v1883_v21 }
 0x53c   : > { %1778 = vmatprep.subr.bf16.mxu1 %v4759_v25  ;;  %v1880_v25 = vld [vmem:[#allocation14 + $0x48] sm:$0xff] }
 0x53d   : > { %2683 = vmatprep.subr.bf16.mxu0 %v4179_v24  ;;  %v1940_v24 = vld [vmem:[#allocation14 + $0x228] sm:$0xff] }
 0x53f   : > { %1779 = vmatpush1.bf16.msra.mxu1 %v4757_v26  ;;  %v1884_v26 = vld [vmem:[#allocation14 + $0x68] sm:$0xff] }
 0x540   : > { %1780 = vmatprep.subr.bf16.mxu1 %v4762_v29  ;;  %v1887_v29 = vld [vmem:[#allocation14 + $0x80] sm:$0xff] }
 0x543   : > { %1781 = vmatpush1.bf16.msra.mxu1 %v4760_v30  ;;  %v4181_v30 = vcombine.high %v1880_v25, %v1884_v26 }
 0x544   : > { %1782 = vmatprep.subr.bf16.mxu1 %v4765_v31  ;;  %v1891_v31 = vld [vmem:[#allocation14 + $0xa0] sm:$0xff] }
 0x547   : > { %1783 = vmatpush1.bf16.msra.mxu1 %v4763_v32  ;;  %v1888_v32 = vld [vmem:[#allocation14 + $0x88] sm:$0xff] }
 0x548   : > { %1784 = vmatprep.subr.bf16.mxu1 %v4768_v33  ;;  %v1892_v33 = vld [vmem:[#allocation14 + $0xa8] sm:$0xff] }
 0x54b   : > { %1785 = vmatpush1.bf16.msra.mxu1 %v4766_v34  ;;  %v4178_v34 = vcombine.low %v1879_v20, %v1883_v21  ;;  %v4229_v20 = vcombine.high %v1928_v12, %v1932_v13  ;;  %v1935_v21 = vld [vmem:[#allocation14 + $0x200] sm:$0xff] }
 0x54c   : > { %1786 = vmatprep.subr.bf16.mxu1 %v4771_v35  ;;  %v4180_v35 = vcombine.low %v1880_v25, %v1884_v26  ;;  %v4228_v26 = vcombine.low %v1928_v12, %v1932_v13  ;;  %v1975_v12 = vld [vmem:[#allocation14 + $0x340] sm:$0xff] }
 0x54d   : > { %2684 = vmatpush1.bf16.msra.mxu0 %v4178_v34  ;;  %v1948_v34 = vld [vmem:[#allocation14 + $0x268] sm:$0xff]  ;;  %v1979_v13 = vld [vmem:[#allocation14 + $0x360] sm:$0xff] }
 0x54f   : > { %1787 = vmatpush1.bf16.msra.mxu1 %v4769_v36  ;;  %v4187_v36 = vcombine.high %v1887_v29, %v1891_v31 }
 0x550   : > { %1788 = vmatprep.subr.bf16.mxu1 %v4774_v37  ;;  %v4189_v37 = vcombine.high %v1888_v32, %v1892_v33 }
 0x551   : > { %2685 = vmatprep.subr.bf16.mxu0 %v4187_v36 }
 0x553   : > { %1789 = vmatpush1.bf16.msra.mxu1 %v4772_v38  ;;  %v1895_v38 = vld [vmem:[#allocation14 + $0xc0] sm:$0xff] }
 0x554   : > { %1790 = vmatprep.subr.bf16.mxu1 %v4777_v39  ;;  %v1899_v39 = vld [vmem:[#allocation14 + $0xe0] sm:$0xff] }
 0x557   : > { %1791 = vmatpush1.bf16.msra.mxu1 %v4775_v40  ;;  %v1896_v40 = vld [vmem:[#allocation14 + $0xc8] sm:$0xff] }
 0x558   : > { %1792 = vmatprep.subr.bf16.mxu1 %v4780_v41  ;;  %v1900_v41 = vld [vmem:[#allocation14 + $0xe8] sm:$0xff] }
 0x55b   : > { %1793 = vmatpush1.bf16.msra.mxu1 %v4778_v42  ;;  %v4186_v42 = vcombine.low %v1887_v29, %v1891_v31  ;;  %v1943_v31 = vld [vmem:[#allocation14 + $0x240] sm:$0xff] }
 0x55c   : > { %1794 = vmatprep.subr.bf16.mxu1 %v4783_v43  ;;  %v4188_v43 = vcombine.low %v1888_v32, %v1892_v33  ;;  %v1947_v32 = vld [vmem:[#allocation14 + $0x260] sm:$0xff]  ;;  %v1944_v33 = vld [vmem:[#allocation14 + $0x248] sm:$0xff] }
 0x55d   : > { %2686 = vmatpush1.bf16.msra.mxu0 %v4186_v42  ;;  %v1956_v42 = vld [vmem:[#allocation14 + $0x2a8] sm:$0xff] }
 0x55f   : > { %1795 = vmatpush1.bf16.msra.mxu1 %v4781_v44  ;;  %v4195_v44 = vcombine.high %v1895_v38, %v1899_v39 }
 0x560   : > { %1796 = vmatprep.subr.bf16.mxu1 %v4786_v45  ;;  %v4197_v45 = vcombine.high %v1896_v40, %v1900_v41 }
 0x561   : > { %2687 = vmatprep.subr.bf16.mxu0 %v4195_v44  ;;  %v4244_v44 = vcombine.low %v1944_v33, %v1948_v34 }
 0x563   : > { %1797 = vmatpush1.bf16.msra.mxu1 %v4784_v46  ;;  %v1903_v46 = vld [vmem:[#allocation14 + $0x100] sm:$0xff] }
 0x564   : > { %1798 = vmatprep.subr.bf16.mxu1 %v4789_v47  ;;  %v1907_v47 = vld [vmem:[#allocation14 + $0x120] sm:$0xff] }
 0x567   : > { %1799 = vmatpush1.bf16.msra.mxu1 %v4787_v48  ;;  %v1904_v48 = vld [vmem:[#allocation14 + $0x108] sm:$0xff] }
 0x568   : > { %2722 = vmatprep.subr.bf16.mxu1 %v4173_v23  ;;  %v1936_v23 = vld [vmem:[#allocation14 + $0x208] sm:$0xff] }
 0x569   : > { %v4236_v36 = vcombine.low %v1936_v23, %v1940_v24 }
 0x5fd   : > { %v1565_v49 = vpop.f32.mrb[8].mxu1 }
 0x5fe   : > { %v1575_v50 = vpack.c.bf16 %v1565_v49, %v1565_v49  ;;  %v4471_v51 = vpop.f32.mrb[9].mxu1  ;;  %v1908_v49 = vld [vmem:[#allocation14 + $0x128] sm:$0xff] }
 0x5ff   : > { %v1568_v52 = vpop.f32.mrb[10].mxu1  ;;  %v4196_v51 = vcombine.low %v1896_v40, %v1900_v41  ;;  %v4204_v59 = vcombine.low %v1904_v48, %v1908_v49  ;;  %v1955_v40 = vld [vmem:[#allocation14 + $0x2a0] sm:$0xff]  ;;  %v1952_v41 = vld [vmem:[#allocation14 + $0x288] sm:$0xff] }
 0x600   : > { %v4472_v53 = vpop.f32.mrb[11].mxu1  ;;  %1800 = vmatprep.mubr.bf16.mxu1 %v1575_v50  ;;  %v4194_v50 = vcombine.low %v1895_v38, %v1899_v39  ;;  %v4203_v52 = vcombine.high %v1903_v46, %v1907_v47  ;;  %v4245_v38 = vcombine.high %v1944_v33, %v1948_v34  ;;  %v1951_v39 = vld [vmem:[#allocation14 + $0x280] sm:$0xff] }
 0x601   : > { %v1461_v54 = vpop.f32.mrb[12].mxu0  ;;  %v4205_v53 = vcombine.high %v1904_v48, %v1908_v49  ;;  %v4252_v48 = vcombine.low %v1952_v41, %v1956_v42  ;;  %v1991_v33 = vld [vmem:[#allocation14 + $0x3c0] sm:$0xff] }
 0x602   : > { %v1574_v55 = vpack.c.bf16 %v1461_v54, %v1461_v54  ;;  %v4459_v56 = vpop.f32.mrb[13].mxu0  ;;  %v1911_v54 = vld [vmem:[#allocation14 + $0x140] sm:$0xff]  ;;  %2688 = vmatpush1.bf16.msra.mxu0 %v4194_v50 }
 0x603   : > { %v1464_v57 = vpop.f32.mrb[14].mxu0  ;;  %v1912_v56 = vld [vmem:[#allocation14 + $0x148] sm:$0xff]  ;;  %2689 = vmatprep.subr.bf16.mxu0 %v4203_v52  ;;  %v1995_v34 = vld [vmem:[#allocation14 + $0x3e0] sm:$0xff] }
 0x604   : > { %v4460_v58 = vpop.f32.mrb[15].mxu0  ;;  %1801 = vmatmul.mubr.bf16.vlgmr.msra.gmra.mrb[12].mxu1 %v1574_v55  ;;  %v1915_v55 = vld [vmem:[#allocation14 + $0x160] sm:$0xff]  ;;  %v1916_v57 = vld [vmem:[#allocation14 + $0x168] sm:$0xff] }
 0x605   : > { %2723 = vmatpush1.bf16.msra.mxu1 %v4172_v22  ;;  %v4202_v58 = vcombine.low %v1903_v46, %v1907_v47  ;;  %v1939_v22 = vld [vmem:[#allocation14 + $0x220] sm:$0xff]  ;;  %v4253_v46 = vcombine.high %v1952_v41, %v1956_v42  ;;  %v4250_v47 = vcombine.low %v1951_v39, %v1955_v40  ;;  %v1873_v41 = vld [vmem:[#allocation14 + $0x10] sm:$0xff] }
 0x606   : > { %2724 = vmatprep.subr.bf16.mxu1 %v4181_v30  ;;  %v4235_v29 = vcombine.high %v1935_v21, %v1939_v22  ;;  %v4237_v30 = vcombine.high %v1936_v23, %v1940_v24  ;;  %v1983_v23 = vld [vmem:[#allocation14 + $0x380] sm:$0xff]  ;;  %v1877_v42 = vld [vmem:[#allocation14 + $0x30] sm:$0xff] }
 0x607   : > { %2690 = vmatpush1.bf16.msra.mxu0 %v4202_v58  ;;  %v1960_v58 = vld [vmem:[#allocation14 + $0x2c8] sm:$0xff]  ;;  %v1987_v24 = vld [vmem:[#allocation14 + $0x3a0] sm:$0xff] }
 0x609   : > { %2725 = vmatpush1.bf16.msra.mxu1 %v4180_v35  ;;  %v4234_v35 = vcombine.low %v1935_v21, %v1939_v22 }
 0x60a   : > { %2726 = vmatprep.subr.bf16.mxu1 %v4189_v37  ;;  %v4243_v37 = vcombine.high %v1943_v31, %v1947_v32 }
 0x60d   : > { %2727 = vmatpush1.bf16.msra.mxu1 %v4188_v43  ;;  %v4242_v43 = vcombine.low %v1943_v31, %v1947_v32 }
 0x60e   : > { %2728 = vmatprep.subr.bf16.mxu1 %v4197_v45  ;;  %v4251_v45 = vcombine.high %v1951_v39, %v1955_v40 }
 0x611   : > { %2729 = vmatpush1.bf16.msra.mxu1 %v4196_v51 }
 0x612   : > { %2730 = vmatprep.subr.bf16.mxu1 %v4205_v53 }
 0x615   : > { %2731 = vmatpush1.bf16.msra.mxu1 %v4204_v59 }
 0x6d7   : > { %v1802_v61 = vpop.f32.mrb[12].mxu1 }
 0x6d8   : > { %v1809_v0 = vadd.f32 %v5026_v63, %v1802_v61  ;;  %v1804_v2 = vpop.f32.mrb[13].mxu1  ;;  %v4213_v61 = vcombine.high %v1912_v56, %v1916_v57  ;;  %v1923_v63 = vld [vmem:[#allocation14 + $0x1a0] sm:$0xff] }
 0x6d9   : > { %v1810_v5 = vadd.f32 %v5027_v4, %v1804_v2  ;;  %v1806_v6 = vpop.f32.mrb[14].mxu1  ;;  %v1924_v2 = vld [vmem:[#allocation14 + $0x1a8] sm:$0xff]  ;;  %v4210_v4 = vcombine.low %v1911_v54, %v1915_v55 }
 0x6da   : > { %v5792_v7 = vadd.f32 %v1816_v60, %v1809_v0  ;;  %v1807_v8 = vpop.f32.mrb[15].mxu1  ;;  %v4211_v60 = vcombine.high %v1911_v54, %v1915_v55  ;;  %v1920_v0 = vld [vmem:[#allocation14 + $0x188] sm:$0xff]  ;;  %2732 = vmatprep.subr.bf16.mxu1 %v4213_v61 }
 0x6db   : > { %v5794_v9 = vadd.f32 %v1820_v62, %v1810_v5  ;;  %v1919_v62 = vld [vmem:[#allocation14 + $0x180] sm:$0xff]  ;;  %v4212_v5 = vcombine.low %v1912_v56, %v1916_v57  ;;  %v4221_v8 = vcombine.high %v1920_v0, %v1924_v2  ;;  %v4220_v18 = vcombine.low %v1920_v0, %v1924_v2 }
 0x6dc   : > { %2691 = vmatprep.subr.bf16.mxu0 %v4211_v60  ;;  %v4219_v6 = vcombine.high %v1919_v62, %v1923_v63  ;;  %v4218_v14 = vcombine.low %v1919_v62, %v1923_v63  ;;  %v1959_v56 = vld [vmem:[#allocation14 + $0x2c0] sm:$0xff]  ;;  %v1964_v60 = vld [vmem:[#allocation14 + $0x2e8] sm:$0xff] }
 0x6dd   : > { %v1827_v10 = vadd.f32 %v5794_v9, %v5792_v7  ;;  %2692 = vmatpush1.bf16.msra.mxu0 %v4210_v4  ;;  %2733 = vmatpush1.bf16.msra.mxu1 %v4212_v5  ;;  %v1963_v57 = vld [vmem:[#allocation14 + $0x2e0] sm:$0xff]  ;;  %v4260_v62 = vcombine.low %v1960_v58, %v1964_v60  ;;  %v4261_v63 = vcombine.high %v1960_v58, %v1964_v60  ;;  %v1968_v4 = vld [vmem:[#allocation14 + $0x308] sm:$0xff] }
 0x6de   : > { %2693 = vmatprep.subr.bf16.mxu0 %v4219_v6  ;;  %2734 = vmatprep.subr.bf16.mxu1 %v4221_v8  ;;  %v4259_v59 = vcombine.high %v1959_v56, %v1963_v57  ;;  %v4258_v61 = vcombine.low %v1959_v56, %v1963_v57  ;;  %v1967_v0 = vld [vmem:[#allocation14 + $0x300] sm:$0xff]  ;;  %v1972_v6 = vld [vmem:[#allocation14 + $0x328] sm:$0xff] }
 0x6df   : > { %1828 = vadd.xlane.f32.xlu0 %v1827_v10  ;;  %v1927_v10 = vld [vmem:[#allocation14 + $0x1c0] sm:$0xff] }
 0x6e0   : > { %v4227_v19 = vcombine.high %v1927_v10, %v1931_v11  ;;  %v4226_v25 = vcombine.low %v1927_v10, %v1931_v11  ;;  %v1971_v2 = vld [vmem:[#allocation14 + $0x320] sm:$0xff]  ;;  %v4268_v10 = vcombine.low %v1968_v4, %v1972_v6  ;;  %v4269_v11 = vcombine.high %v1968_v4, %v1972_v6  ;;  %v1885_v6 = vld [vmem:[#allocation14 + $0x70] sm:$0xff] }
 0x6e1   : > { %2694 = vmatpush1.bf16.msra.mxu0 %v4218_v14  ;;  %2735 = vmatpush1.bf16.msra.mxu1 %v4220_v18  ;;  %v4267_v5 = vcombine.high %v1967_v0, %v1971_v2  ;;  %v4266_v8 = vcombine.low %v1967_v0, %v1971_v2  ;;  %v1976_v14 = vld [vmem:[#allocation14 + $0x348] sm:$0xff]  ;;  %v4275_v18 = vcombine.high %v1975_v12, %v1979_v13 }
 0x6e2   : > { %2695 = vmatprep.subr.bf16.mxu0 %v4227_v19  ;;  %2736 = vmatprep.subr.bf16.mxu1 %v4229_v20  ;;  %v1980_v19 = vld [vmem:[#allocation14 + $0x368] sm:$0xff]  ;;  %v4274_v20 = vcombine.low %v1975_v12, %v1979_v13  ;;  %v1889_v13 = vld [vmem:[#allocation14 + $0x90] sm:$0xff] }
 0x6e3   : > { %v4276_v21 = vcombine.low %v1976_v14, %v1980_v19  ;;  %v4277_v22 = vcombine.high %v1976_v14, %v1980_v19  ;;  %v1893_v14 = vld [vmem:[#allocation14 + $0xb0] sm:$0xff]  ;;  %v1894_v19 = vld [vmem:[#allocation14 + $0xb8] sm:$0xff] }
 0x6e5   : > { %2696 = vmatpush1.bf16.msra.mxu0 %v4226_v25  ;;  %2737 = vmatpush1.bf16.msra.mxu1 %v4228_v26  ;;  %v1984_v25 = vld [vmem:[#allocation14 + $0x388] sm:$0xff]  ;;  %v4283_v26 = vcombine.high %v1983_v23, %v1987_v24 }
 0x6e6   : > { %2697 = vmatprep.subr.bf16.mxu0 %v4235_v29  ;;  %2738 = vmatprep.subr.bf16.mxu1 %v4237_v30  ;;  %v1988_v29 = vld [vmem:[#allocation14 + $0x3a8] sm:$0xff]  ;;  %v4282_v30 = vcombine.low %v1983_v23, %v1987_v24  ;;  %v1897_v24 = vld [vmem:[#allocation14 + $0xd0] sm:$0xff] }
 0x6e7   : > { %v4284_v31 = vcombine.low %v1984_v25, %v1988_v29  ;;  %v4285_v32 = vcombine.high %v1984_v25, %v1988_v29  ;;  %v1901_v25 = vld [vmem:[#allocation14 + $0xf0] sm:$0xff]  ;;  %v1902_v29 = vld [vmem:[#allocation14 + $0xf8] sm:$0xff] }
 0x6e9   : > { %2698 = vmatpush1.bf16.msra.mxu0 %v4234_v35  ;;  %2739 = vmatpush1.bf16.msra.mxu1 %v4236_v36  ;;  %v1992_v35 = vld [vmem:[#allocation14 + $0x3c8] sm:$0xff]  ;;  %v4291_v36 = vcombine.high %v1991_v33, %v1995_v34 }
 0x6ea   : > { %2699 = vmatprep.subr.bf16.mxu0 %v4243_v37  ;;  %2740 = vmatprep.subr.bf16.mxu1 %v4245_v38  ;;  %v1996_v37 = vld [vmem:[#allocation14 + $0x3e8] sm:$0xff]  ;;  %v4290_v38 = vcombine.low %v1991_v33, %v1995_v34  ;;  %v1905_v34 = vld [vmem:[#allocation14 + $0x110] sm:$0xff] }
 0x6eb   : > { %v4293_v39 = vcombine.high %v1992_v35, %v1996_v37  ;;  %v4292_v40 = vcombine.low %v1992_v35, %v1996_v37  ;;  %v1909_v35 = vld [vmem:[#allocation14 + $0x130] sm:$0xff]  ;;  %v1910_v37 = vld [vmem:[#allocation14 + $0x138] sm:$0xff] }
 0x6ed   : > { %2700 = vmatpush1.bf16.msra.mxu0 %v4242_v43  ;;  %2741 = vmatpush1.bf16.msra.mxu1 %v4244_v44  ;;  %v1874_v43 = vld [vmem:[#allocation14 + $0x18] sm:$0xff]  ;;  %v4175_v44 = vcombine.high %v1873_v41, %v1877_v42 }
 0x6ee   : > { %2701 = vmatprep.subr.bf16.mxu0 %v4251_v45  ;;  %2742 = vmatprep.subr.bf16.mxu1 %v4253_v46  ;;  %v1878_v45 = vld [vmem:[#allocation14 + $0x38] sm:$0xff]  ;;  %v4174_v46 = vcombine.low %v1873_v41, %v1877_v42  ;;  %v1913_v42 = vld [vmem:[#allocation14 + $0x150] sm:$0xff] }
 0x6f1   : > { %2702 = vmatpush1.bf16.msra.mxu0 %v4250_v47  ;;  %2743 = vmatpush1.bf16.msra.mxu1 %v4252_v48  ;;  %v4176_v47 = vcombine.low %v1874_v43, %v1878_v45  ;;  %v4177_v48 = vcombine.high %v1874_v43, %v1878_v45  ;;  %v1917_v43 = vld [vmem:[#allocation14 + $0x170] sm:$0xff]  ;;  %v1918_v45 = vld [vmem:[#allocation14 + $0x178] sm:$0xff] }
 0x6f2   : > { %2703 = vmatprep.subr.bf16.mxu0 %v4259_v59  ;;  %2744 = vmatprep.subr.bf16.mxu1 %v4261_v63 }
 0x6f5   : > { %2704 = vmatpush1.bf16.msra.mxu0 %v4258_v61  ;;  %2745 = vmatpush1.bf16.msra.mxu1 %v4260_v62 }
 0x6f6   : > { %2705 = vmatprep.subr.bf16.mxu0 %v4267_v5  ;;  %2746 = vmatprep.subr.bf16.mxu1 %v4269_v11  ;;  %v1881_v5 = vld [vmem:[#allocation14 + $0x50] sm:$0xff] }
 0x6f9   : > { %2706 = vmatpush1.bf16.msra.mxu0 %v4266_v8  ;;  %2747 = vmatpush1.bf16.msra.mxu1 %v4268_v10  ;;  %v1882_v8 = vld [vmem:[#allocation14 + $0x58] sm:$0xff] }
 0x6fa   : > { %2707 = vmatprep.subr.bf16.mxu0 %v4275_v18  ;;  %2748 = vmatprep.subr.bf16.mxu1 %v4277_v22  ;;  %v1886_v10 = vld [vmem:[#allocation14 + $0x78] sm:$0xff]  ;;  %v4191_v22 = vcombine.high %v1889_v13, %v1893_v14 }
 0x6fb   : > { %v1890_v18 = vld [vmem:[#allocation14 + $0x98] sm:$0xff] }
 0x6fc   : > { %v4193_v23 = vcombine.high %v1890_v18, %v1894_v19 }
 0x6fd   : > { %2708 = vmatpush1.bf16.msra.mxu0 %v4274_v20  ;;  %2749 = vmatpush1.bf16.msra.mxu1 %v4276_v21  ;;  %v4182_v20 = vcombine.low %v1881_v5, %v1885_v6  ;;  %v4184_v21 = vcombine.low %v1882_v8, %v1886_v10 }
 0x6fe   : > { %2709 = vmatprep.subr.bf16.mxu0 %v4283_v26  ;;  %2750 = vmatprep.subr.bf16.mxu1 %v4285_v32  ;;  %v1898_v26 = vld [vmem:[#allocation14 + $0xd8] sm:$0xff]  ;;  %v4199_v32 = vcombine.high %v1897_v24, %v1901_v25 }
 0x6ff   : > { %v4201_v33 = vcombine.high %v1898_v26, %v1902_v29 }
 0x701   : > { %2710 = vmatpush1.bf16.msra.mxu0 %v4282_v30  ;;  %2751 = vmatpush1.bf16.msra.mxu1 %v4284_v31  ;;  %v4190_v30 = vcombine.low %v1889_v13, %v1893_v14  ;;  %v4192_v31 = vcombine.low %v1890_v18, %v1894_v19  ;;  %v1945_v18 = vld [vmem:[#allocation14 + $0x250] sm:$0xff] }
 0x702   : > { %2711 = vmatprep.subr.bf16.mxu0 %v4291_v36  ;;  %2752 = vmatprep.subr.bf16.mxu1 %v4293_v39  ;;  %v1906_v36 = vld [vmem:[#allocation14 + $0x118] sm:$0xff]  ;;  %v4200_v39 = vcombine.low %v1898_v26, %v1902_v29  ;;  %v1949_v19 = vld [vmem:[#allocation14 + $0x270] sm:$0xff] }
 0x703   : > { %v4209_v41 = vcombine.high %v1906_v36, %v1910_v37  ;;  %v1953_v26 = vld [vmem:[#allocation14 + $0x290] sm:$0xff] }
 0x704   : > { %v1957_v29 = vld [vmem:[#allocation14 + $0x2b0] sm:$0xff] }
 0x705   : > { %2712 = vmatpush1.bf16.msra.mxu0 %v4290_v38  ;;  %2753 = vmatpush1.bf16.msra.mxu1 %v4292_v40  ;;  %v4198_v38 = vcombine.low %v1897_v24, %v1901_v25  ;;  %v4207_v40 = vcombine.high %v1905_v34, %v1909_v35  ;;  %v4247_v24 = vcombine.high %v1945_v18, %v1949_v19 }
 0x706   : > { %2763 = vmatprep.subr.bf16.mxu0 %v4175_v44  ;;  %2804 = vmatprep.subr.bf16.mxu1 %v4177_v48  ;;  %v1914_v44 = vld [vmem:[#allocation14 + $0x158] sm:$0xff]  ;;  %v4215_v48 = vcombine.high %v1913_v42, %v1917_v43 }
 0x76c   : > { %v1829_v49 = vpop.xlane.xlu0 %1828 }
 0x76d   : > { %v1830_v50 = vmul.f32 0.00390625, %v1829_v49 }
 0x76f   : > { %v5799_v51 = vsub.f32 %v5792_v7, %v1830_v50  ;;  %v5802_v52 = vsub.f32 %v5794_v9, %v1830_v50 }
 0x771   : > { %v1833_v53 = vmul.f32 %v5799_v51, %v5799_v51  ;;  %v1834_v54 = vmul.f32 %v5802_v52, %v5802_v52 }
 0x773   : > { %v1835_v55 = vadd.f32 %v1834_v54, %v1833_v53  ;;  %v1825_v54 = vld [vmem:[%s5971_s9] sm:$0x3] }
 0x774   : > { %v1851_v56 = vrot.slane %v1825_v54, %v5742_v16  ;;  %v1847_v57 = vrot.slane %v1825_v54, %v5745_v17  ;;  %v1922_v54 = vld [vmem:[#allocation14 + $0x198] sm:$0xff] }
 0x775   : > { %1836 = vadd.xlane.f32.xlu1 %v1835_v55  ;;  %v1826_v55 = vld [vmem:[%s5972_s24] sm:$0x3]  ;;  %s5880_s24 = scalar_lea.hbm %s5975_s17, %s4440_s13 }
 0x776   : > { %v1864_v61 = vrot.slane %v1826_v55, %v5742_v16  ;;  %v1860_v62 = vrot.slane %v1826_v55, %v5745_v17  ;;  %v1926_v55 = vld [vmem:[#allocation14 + $0x1b8] sm:$0xff] }
 0x802   : > { %v1837_v49 = vpop.xlane.xlu1 %1836 }
 0x803   : > { %v1838_v50 = vmul.f32 0.00390625, %v1837_v49  ;;  %v4217_v49 = vcombine.high %v1914_v44, %v1918_v45 }
 0x805   : > { %v1839_v53 = vadd.f32 1e-05, %v1838_v50  ;;  %v1921_v50 = vld [vmem:[#allocation14 + $0x190] sm:$0xff] }
 0x807   : > { %4992 = vrsqrt.f32 %v1839_v53  ;;  %v1925_v53 = vld [vmem:[#allocation14 + $0x1b0] sm:$0xff] }
 0x811   : > { %v4993_v58 = vpop.eup %4992 }
 0x812   : > { %v1841_v59 = vmul.f32 %v4993_v58, %v5799_v51  ;;  %v1842_v60 = vmul.f32 %v4993_v58, %v5802_v52  ;;  %v4183_v51 = vcombine.high %v1881_v5, %v1885_v6  ;;  %v4185_v52 = vcombine.high %v1882_v8, %v1886_v10  ;;  %v1937_v6 = vld [vmem:[#allocation14 + $0x210] sm:$0xff]  ;;  %v1938_v10 = vld [vmem:[#allocation14 + $0x218] sm:$0xff] }
 0x813   : > { %v4223_v58 = vcombine.high %v1921_v50, %v1925_v53  ;;  %v1941_v8 = vld [vmem:[#allocation14 + $0x230] sm:$0xff] }
 0x814   : > { %v1855_v63 = vmul.f32 %v1851_v56, %v1842_v60  ;;  %v1854_v0 = vmul.f32 %v1847_v57, %v1841_v59  ;;  %v4214_v56 = vcombine.low %v1913_v42, %v1917_v43  ;;  %v4216_v57 = vcombine.low %v1914_v44, %v1918_v45  ;;  %v1929_v60 = vld [vmem:[#allocation14 + $0x1d0] sm:$0xff] }
 0x815   : > { %v4225_v59 = vcombine.high %v1922_v54, %v1926_v55  ;;  %v1969_v44 = vld [vmem:[#allocation14 + $0x310] sm:$0xff] }
 0x816   : > { %v1868_v2 = vadd.f32 %v1864_v61, %v1855_v63  ;;  %v1867_v4 = vadd.f32 %v1860_v62, %v1854_v0  ;;  %v1933_v61 = vld [vmem:[#allocation14 + $0x1f0] sm:$0xff]  ;;  %v1930_v62 = vld [vmem:[#allocation14 + $0x1d8] sm:$0xff]  ;;  %v4222_v0 = vcombine.low %v1921_v50, %v1925_v53 }
 0x817   : > { %v1934_v63 = vld [vmem:[#allocation14 + $0x1f8] sm:$0xff]  ;;  %v4230_v13 = vcombine.low %v1929_v60, %v1933_v61  ;;  %v1973_v45 = vld [vmem:[#allocation14 + $0x330] sm:$0xff] }
 0x818   : > { %v1870_v11 = vpack.c.bf16 %v1868_v2, %v1868_v2  ;;  %v5820_v12 = vpack.c.bf16 %v1867_v4, %v1867_v4  ;;  %v4224_v2 = vcombine.low %v1922_v54, %v1926_v55  ;;  %v4231_v4 = vcombine.high %v1929_v60, %v1933_v61  ;;  %v1977_v54 = vld [vmem:[#allocation14 + $0x350] sm:$0xff] }
 0x819   : > { %v4233_v5 = vcombine.high %v1930_v62, %v1934_v63  ;;  %v4271_v50 = vcombine.high %v1969_v44, %v1973_v45  ;;  %v1981_v55 = vld [vmem:[#allocation14 + $0x370] sm:$0xff] }
 0x81a   : > { %2713 = vmatprep.mubr.bf16.mxu0 %v1870_v11  ;;  %2754 = vmatprep.mubr.bf16.mxu1 %v1870_v11  ;;  %v4279_v60 = vcombine.high %v1977_v54, %v1981_v55 }
 0x81b   : > { %2714 = vmatmul.mubr.bf16.vlgmr.msra.gmra.mrb[16].mxu0 %v5820_v12  ;;  %2755 = vmatmul.mubr.bf16.vlgmr.msra.gmra.mrb[16].mxu1 %v5820_v12 }
 0x81c   : > { %2764 = vmatpush1.bf16.msra.mxu0 %v4174_v46  ;;  %2805 = vmatpush1.bf16.msra.mxu1 %v4176_v47  ;;  %v4206_v46 = vcombine.low %v1905_v34, %v1909_v35  ;;  %v4208_v47 = vcombine.low %v1906_v36, %v1910_v37  ;;  %v4255_v34 = vcombine.high %v1953_v26, %v1957_v29  ;;  %v1961_v36 = vld [vmem:[#allocation14 + $0x2d0] sm:$0xff] }
 0x81d   : > { %2795 = vmatprep.mubr.bf16.mxu0 %v1870_v11  ;;  %2836 = vmatprep.mubr.bf16.mxu1 %v1870_v11  ;;  %v1942_v11 = vld [vmem:[#allocation14 + $0x238] sm:$0xff]  ;;  %v1965_v37 = vld [vmem:[#allocation14 + $0x2f0] sm:$0xff] }
 0x81e   : > { %2765 = vmatprep.subr.bf16.mxu0 %v4183_v51  ;;  %2806 = vmatprep.subr.bf16.mxu1 %v4185_v52  ;;  %v4232_v51 = vcombine.low %v1930_v62, %v1934_v63  ;;  %v4239_v52 = vcombine.high %v1937_v6, %v1941_v8  ;;  %v4241_v14 = vcombine.high %v1938_v10, %v1942_v11  ;;  %v1985_v62 = vld [vmem:[#allocation14 + $0x390] sm:$0xff] }
 0x81f   : > { %v4263_v42 = vcombine.high %v1961_v36, %v1965_v37  ;;  %v1989_v63 = vld [vmem:[#allocation14 + $0x3b0] sm:$0xff] }
 0x820   : > { %2766 = vmatpush1.bf16.msra.mxu0 %v4182_v20  ;;  %2807 = vmatpush1.bf16.msra.mxu1 %v4184_v21  ;;  %v1946_v20 = vld [vmem:[#allocation14 + $0x258] sm:$0xff] }
 0x821   : > { %2767 = vmatprep.subr.bf16.mxu0 %v4191_v22  ;;  %2808 = vmatprep.subr.bf16.mxu1 %v4193_v23  ;;  %v1950_v21 = vld [vmem:[#allocation14 + $0x278] sm:$0xff]  ;;  %v4238_v22 = vcombine.low %v1937_v6, %v1941_v8  ;;  %v4240_v23 = vcombine.low %v1938_v10, %v1942_v11  ;;  %v4287_v6 = vcombine.high %v1985_v62, %v1989_v63  ;;  %v1993_v10 = vld [vmem:[#allocation14 + $0x3d0] sm:$0xff] }
 0x822   : > { %v4249_v25 = vcombine.high %v1946_v20, %v1950_v21  ;;  %v1997_v11 = vld [vmem:[#allocation14 + $0x3f0] sm:$0xff] }
 0x824   : > { %2768 = vmatpush1.bf16.msra.mxu0 %v4190_v30  ;;  %2809 = vmatpush1.bf16.msra.mxu1 %v4192_v31  ;;  %v1954_v30 = vld [vmem:[#allocation14 + $0x298] sm:$0xff] }
 0x825   : > { %2769 = vmatprep.subr.bf16.mxu0 %v4199_v32  ;;  %2810 = vmatprep.subr.bf16.mxu1 %v4201_v33  ;;  %v1958_v31 = vld [vmem:[#allocation14 + $0x2b8] sm:$0xff]  ;;  %v4246_v32 = vcombine.low %v1945_v18, %v1949_v19  ;;  %v4248_v33 = vcombine.low %v1946_v20, %v1950_v21  ;;  %v4295_v18 = vcombine.high %v1993_v10, %v1997_v11 }
 0x826   : > { %v4257_v35 = vcombine.high %v1954_v30, %v1958_v31  ;;  %v4294_v20 = vcombine.low %v1993_v10, %v1997_v11  ;;  %v4861_v10 = vld [vmem:[#allocation15 + $0x1b4] ss:$8 sps:$4 sm:$0xff]   ;;  %v4856_v11 = vld [vmem:[#allocation15 + $0xb0] ss:$8 sps:$4 sm:$0xff]  }
 0x828   : > { %2770 = vmatpush1.bf16.msra.mxu0 %v4198_v38  ;;  %2811 = vmatpush1.bf16.msra.mxu1 %v4200_v39  ;;  %v1962_v38 = vld [vmem:[#allocation14 + $0x2d8] sm:$0xff] }
 0x829   : > { %2771 = vmatprep.subr.bf16.mxu0 %v4207_v40  ;;  %2812 = vmatprep.subr.bf16.mxu1 %v4209_v41  ;;  %v1966_v39 = vld [vmem:[#allocation14 + $0x2f8] sm:$0xff]  ;;  %v4254_v40 = vcombine.low %v1953_v26, %v1957_v29  ;;  %v4256_v41 = vcombine.low %v1954_v30, %v1958_v31 }
 0x82a   : > { %v4265_v43 = vcombine.high %v1962_v38, %v1966_v39  ;;  %v4798_v26 = vld [vmem:[#allocation15 + $0x14] ss:$8 sps:$4 sm:$0xff]   ;;  %v4796_v30 = vld [vmem:[#allocation15 + $0x10] ss:$8 sps:$4 sm:$0xff]  }
 0x82b   : > { %v4801_v29 = vld [vmem:[#allocation15 + $0x114] ss:$8 sps:$4 sm:$0xff]   ;;  %v4799_v31 = vld [vmem:[#allocation15 + $0x110] ss:$8 sps:$4 sm:$0xff]  }
 0x82c   : > { %2772 = vmatpush1.bf16.msra.mxu0 %v4206_v46  ;;  %2813 = vmatpush1.bf16.msra.mxu1 %v4208_v47  ;;  %v1970_v46 = vld [vmem:[#allocation14 + $0x318] sm:$0xff] }
 0x82d   : > { %2773 = vmatprep.subr.bf16.mxu0 %v4215_v48  ;;  %2814 = vmatprep.subr.bf16.mxu1 %v4217_v49  ;;  %v1974_v47 = vld [vmem:[#allocation14 + $0x338] sm:$0xff]  ;;  %v4262_v48 = vcombine.low %v1961_v36, %v1965_v37  ;;  %v4264_v49 = vcombine.low %v1962_v38, %v1966_v39  ;;  %v4816_v39 = vld [vmem:[#allocation15 + $0x44] ss:$8 sps:$4 sm:$0xff]  }
 0x82e   : > { %v4273_v53 = vcombine.high %v1970_v46, %v1974_v47  ;;  %v4810_v36 = vld [vmem:[#allocation15 + $0x34] ss:$8 sps:$4 sm:$0xff]   ;;  %v4808_v38 = vld [vmem:[#allocation15 + $0x30] ss:$8 sps:$4 sm:$0xff]  }
 0x82f   : > { %v4813_v37 = vld [vmem:[#allocation15 + $0x134] ss:$8 sps:$4 sm:$0xff]  }
 0x830   : > { %2774 = vmatpush1.bf16.msra.mxu0 %v4214_v56  ;;  %2815 = vmatpush1.bf16.msra.mxu1 %v4216_v57  ;;  %v1978_v56 = vld [vmem:[#allocation14 + $0x358] sm:$0xff] }
 0x831   : > { %2775 = vmatprep.subr.bf16.mxu0 %v4223_v58  ;;  %2816 = vmatprep.subr.bf16.mxu1 %v4225_v59  ;;  %v1982_v57 = vld [vmem:[#allocation14 + $0x378] sm:$0xff]  ;;  %v4270_v58 = vcombine.low %v1969_v44, %v1973_v45  ;;  %v4272_v59 = vcombine.low %v1970_v46, %v1974_v47  ;;  %v4828_v47 = vld [vmem:[#allocation15 + $0x64] ss:$8 sps:$4 sm:$0xff]  }
 0x832   : > { %v4281_v61 = vcombine.high %v1978_v56, %v1982_v57  ;;  %v4825_v44 = vld [vmem:[#allocation15 + $0x154] ss:$8 sps:$4 sm:$0xff]   ;;  %v4820_v45 = vld [vmem:[#allocation15 + $0x50] ss:$8 sps:$4 sm:$0xff]  }
 0x833   : > { %v4823_v46 = vld [vmem:[#allocation15 + $0x150] ss:$8 sps:$4 sm:$0xff]  }
 0x834   : > { %2776 = vmatpush1.bf16.msra.mxu0 %v4222_v0  ;;  %2817 = vmatpush1.bf16.msra.mxu1 %v4224_v2  ;;  %v1986_v0 = vld [vmem:[#allocation14 + $0x398] sm:$0xff] }
 0x835   : > { %2777 = vmatprep.subr.bf16.mxu0 %v4231_v4  ;;  %2818 = vmatprep.subr.bf16.mxu1 %v4233_v5  ;;  %v1990_v2 = vld [vmem:[#allocation14 + $0x3b8] sm:$0xff]  ;;  %v4278_v4 = vcombine.low %v1977_v54, %v1981_v55  ;;  %v4280_v5 = vcombine.low %v1978_v56, %v1982_v57  ;;  %v4840_v57 = vld [vmem:[#allocation15 + $0x84] ss:$8 sps:$4 sm:$0xff]  }
 0x836   : > { %v4289_v8 = vcombine.high %v1986_v0, %v1990_v2  ;;  %v4837_v54 = vld [vmem:[#allocation15 + $0x174] ss:$8 sps:$4 sm:$0xff]   ;;  %v4832_v55 = vld [vmem:[#allocation15 + $0x70] ss:$8 sps:$4 sm:$0xff]  }
 0x837   : > { %v4835_v56 = vld [vmem:[#allocation15 + $0x170] ss:$8 sps:$4 sm:$0xff]  }
 0x838   : > { %2778 = vmatpush1.bf16.msra.mxu0 %v4230_v13  ;;  %2819 = vmatpush1.bf16.msra.mxu1 %v4232_v51  ;;  %v1994_v13 = vld [vmem:[#allocation14 + $0x3d8] sm:$0xff] }
 0x839   : > { %2779 = vmatprep.subr.bf16.mxu0 %v4239_v52  ;;  %2820 = vmatprep.subr.bf16.mxu1 %v4241_v14  ;;  %v1998_v51 = vld [vmem:[#allocation14 + $0x3f8] sm:$0xff]  ;;  %v4286_v52 = vcombine.low %v1985_v62, %v1989_v63  ;;  %v4288_v14 = vcombine.low %v1986_v0, %v1990_v2  ;;  %v4852_v2 = vld [vmem:[#allocation15 + $0xa4] ss:$8 sps:$4 sm:$0xff]  }
 0x83a   : > { %v4297_v19 = vcombine.high %v1994_v13, %v1998_v51  ;;  %v4296_v21 = vcombine.low %v1994_v13, %v1998_v51  ;;  %v4849_v62 = vld [vmem:[#allocation15 + $0x194] ss:$8 sps:$4 sm:$0xff]   ;;  %v4844_v63 = vld [vmem:[#allocation15 + $0x90] ss:$8 sps:$4 sm:$0xff]   ;;  %v4864_v51 = vld [vmem:[#allocation15 + $0xc4] ss:$8 sps:$4 sm:$0xff]  }
 0x83b   : > { %v4847_v0 = vld [vmem:[#allocation15 + $0x190] ss:$8 sps:$4 sm:$0xff]  }
 0x83c   : > { %2780 = vmatpush1.bf16.msra.mxu0 %v4238_v22  ;;  %2821 = vmatpush1.bf16.msra.mxu1 %v4240_v23  ;;  %v4792_v22 = vld [vmem:[#allocation15 + $0x4] ss:$8 sps:$4 sm:$0xff]   ;;  %v4859_v13 = vld [vmem:[#allocation15 + $0x1b0] ss:$8 sps:$4 sm:$0xff]  }
 0x83d   : > { %2781 = vmatprep.subr.bf16.mxu0 %v4247_v24  ;;  %2822 = vmatprep.subr.bf16.mxu1 %v4249_v25  ;;  %v4795_v23 = vld [vmem:[#allocation15 + $0x104] ss:$8 sps:$4 sm:$0xff]   ;;  %v4790_v24 = vld [vmem:[#allocation15] ss:$8 sps:$4 sm:$0xff]  }
 0x83e   : > { %v4793_v25 = vld [vmem:[#allocation15 + $0x100] ss:$8 sps:$4 sm:$0xff]  }
 0x840   : > { %2782 = vmatpush1.bf16.msra.mxu0 %v4246_v32  ;;  %2823 = vmatpush1.bf16.msra.mxu1 %v4248_v33  ;;  %v4804_v32 = vld [vmem:[#allocation15 + $0x24] ss:$8 sps:$4 sm:$0xff]  }
 0x841   : > { %2783 = vmatprep.subr.bf16.mxu0 %v4255_v34  ;;  %2824 = vmatprep.subr.bf16.mxu1 %v4257_v35  ;;  %v4807_v33 = vld [vmem:[#allocation15 + $0x124] ss:$8 sps:$4 sm:$0xff]   ;;  %v4802_v34 = vld [vmem:[#allocation15 + $0x20] ss:$8 sps:$4 sm:$0xff]  }
 0x842   : > { %v4805_v35 = vld [vmem:[#allocation15 + $0x120] ss:$8 sps:$4 sm:$0xff]  }
 0x844   : > { %2784 = vmatpush1.bf16.msra.mxu0 %v4254_v40  ;;  %2825 = vmatpush1.bf16.msra.mxu1 %v4256_v41  ;;  %v4819_v40 = vld [vmem:[#allocation15 + $0x144] ss:$8 sps:$4 sm:$0xff]   ;;  %v4814_v41 = vld [vmem:[#allocation15 + $0x40] ss:$8 sps:$4 sm:$0xff]  }
 0x845   : > { %2785 = vmatprep.subr.bf16.mxu0 %v4263_v42  ;;  %2826 = vmatprep.subr.bf16.mxu1 %v4265_v43  ;;  %v4817_v42 = vld [vmem:[#allocation15 + $0x140] ss:$8 sps:$4 sm:$0xff]   ;;  %v4822_v43 = vld [vmem:[#allocation15 + $0x54] ss:$8 sps:$4 sm:$0xff]  }
 0x848   : > { %2786 = vmatpush1.bf16.msra.mxu0 %v4262_v48  ;;  %2827 = vmatpush1.bf16.msra.mxu1 %v4264_v49  ;;  %v4831_v48 = vld [vmem:[#allocation15 + $0x164] ss:$8 sps:$4 sm:$0xff]   ;;  %v4826_v49 = vld [vmem:[#allocation15 + $0x60] ss:$8 sps:$4 sm:$0xff]  }
 0x849   : > { %2787 = vmatprep.subr.bf16.mxu0 %v4271_v50  ;;  %2828 = vmatprep.subr.bf16.mxu1 %v4273_v53  ;;  %v4829_v50 = vld [vmem:[#allocation15 + $0x160] ss:$8 sps:$4 sm:$0xff]   ;;  %v4834_v53 = vld [vmem:[#allocation15 + $0x74] ss:$8 sps:$4 sm:$0xff]  }
 0x84c   : > { %2788 = vmatpush1.bf16.msra.mxu0 %v4270_v58  ;;  %2829 = vmatpush1.bf16.msra.mxu1 %v4272_v59  ;;  %v4843_v58 = vld [vmem:[#allocation15 + $0x184] ss:$8 sps:$4 sm:$0xff]   ;;  %v4838_v59 = vld [vmem:[#allocation15 + $0x80] ss:$8 sps:$4 sm:$0xff]  }
 0x84d   : > { %2789 = vmatprep.subr.bf16.mxu0 %v4279_v60  ;;  %2830 = vmatprep.subr.bf16.mxu1 %v4281_v61  ;;  %v4841_v60 = vld [vmem:[#allocation15 + $0x180] ss:$8 sps:$4 sm:$0xff]   ;;  %v4846_v61 = vld [vmem:[#allocation15 + $0x94] ss:$8 sps:$4 sm:$0xff]  }
 0x850   : > { %2790 = vmatpush1.bf16.msra.mxu0 %v4278_v4  ;;  %2831 = vmatpush1.bf16.msra.mxu1 %v4280_v5  ;;  %v4855_v4 = vld [vmem:[#allocation15 + $0x1a4] ss:$8 sps:$4 sm:$0xff]   ;;  %v4850_v5 = vld [vmem:[#allocation15 + $0xa0] ss:$8 sps:$4 sm:$0xff]  }
 0x851   : > { %2791 = vmatprep.subr.bf16.mxu0 %v4287_v6  ;;  %2832 = vmatprep.subr.bf16.mxu1 %v4289_v8  ;;  %v4853_v6 = vld [vmem:[#allocation15 + $0x1a0] ss:$8 sps:$4 sm:$0xff]   ;;  %v4858_v8 = vld [vmem:[#allocation15 + $0xb4] ss:$8 sps:$4 sm:$0xff]  }
 0x854   : > { %2792 = vmatpush1.bf16.msra.mxu0 %v4286_v52  ;;  %2833 = vmatpush1.bf16.msra.mxu1 %v4288_v14  ;;  %v4867_v52 = vld [vmem:[#allocation15 + $0x1c4] ss:$8 sps:$4 sm:$0xff]   ;;  %v4862_v14 = vld [vmem:[#allocation15 + $0xc0] ss:$8 sps:$4 sm:$0xff]  }
 0x855   : > { %2793 = vmatprep.subr.bf16.mxu0 %v4295_v18  ;;  %2834 = vmatprep.subr.bf16.mxu1 %v4297_v19  ;;  %v4865_v18 = vld [vmem:[#allocation15 + $0x1c0] ss:$8 sps:$4 sm:$0xff]   ;;  %v4870_v19 = vld [vmem:[#allocation15 + $0xd4] ss:$8 sps:$4 sm:$0xff]  }
 0x858   : > { %2794 = vmatpush1.bf16.msra.mxu0 %v4294_v20  ;;  %2835 = vmatpush1.bf16.msra.mxu1 %v4296_v21  ;;  %v4873_v20 = vld [vmem:[#allocation15 + $0x1d4] ss:$8 sps:$4 sm:$0xff]   ;;  %v4868_v21 = vld [vmem:[#allocation15 + $0xd0] ss:$8 sps:$4 sm:$0xff]  }
 0x859   : > { %3697 = vmatprep.subr.bf16.mxu0 %v4792_v22  ;;  %3738 = vmatprep.subr.bf16.mxu1 %v4795_v23  ;;  %v4871_v22 = vld [vmem:[#allocation15 + $0x1d0] ss:$8 sps:$4 sm:$0xff]   ;;  %v4876_v23 = vld [vmem:[#allocation15 + $0xe4] ss:$8 sps:$4 sm:$0xff]  }
 0x85b   : > { %2796 = vmatmul.mubr.bf16.vlgmr.msra.gmra.mrb[20].mxu0 %v5820_v12  ;;  %2837 = vmatmul.mubr.bf16.vlgmr.msra.gmra.mrb[20].mxu1 %v5820_v12  ;;  %v4811_v12 = vld [vmem:[#allocation15 + $0x130] ss:$8 sps:$4 sm:$0xff]  }
 0x85c   : > { %3698 = vmatpush1.bf16.msra.mxu0 %v4790_v24  ;;  %3739 = vmatpush1.bf16.msra.mxu1 %v4793_v25  ;;  %v4879_v24 = vld [vmem:[#allocation15 + $0x1e4] ss:$8 sps:$4 sm:$0xff]   ;;  %v4874_v25 = vld [vmem:[#allocation15 + $0xe0] ss:$8 sps:$4 sm:$0xff]  }
 0x85d   : > { %3699 = vmatprep.subr.bf16.mxu0 %v4798_v26  ;;  %3740 = vmatprep.subr.bf16.mxu1 %v4801_v29  ;;  %v4877_v26 = vld [vmem:[#allocation15 + $0x1e0] ss:$8 sps:$4 sm:$0xff]   ;;  %v4882_v29 = vld [vmem:[#allocation15 + $0xf4] ss:$8 sps:$4 sm:$0xff]  }
 0x860   : > { %3700 = vmatpush1.bf16.msra.mxu0 %v4796_v30  ;;  %3741 = vmatpush1.bf16.msra.mxu1 %v4799_v31  ;;  %v4885_v30 = vld [vmem:[#allocation15 + $0x1f4] ss:$8 sps:$4 sm:$0xff]   ;;  %v4880_v31 = vld [vmem:[#allocation15 + $0xf0] ss:$8 sps:$4 sm:$0xff]  }
 0x861   : > { %3701 = vmatprep.subr.bf16.mxu0 %v4804_v32  ;;  %3742 = vmatprep.subr.bf16.mxu1 %v4807_v33  ;;  %v4883_v32 = vld [vmem:[#allocation15 + $0x1f0] ss:$8 sps:$4 sm:$0xff]   ;;  %v4888_v33 = vld [vmem:[#allocation15 + $0x204] ss:$8 sps:$4 sm:$0xff]  }
 0x864   : > { %3702 = vmatpush1.bf16.msra.mxu0 %v4802_v34  ;;  %3743 = vmatpush1.bf16.msra.mxu1 %v4805_v35  ;;  %v4891_v34 = vld [vmem:[#allocation15 + $0x304] ss:$8 sps:$4 sm:$0xff]   ;;  %v5829_v35 = vld [vmem:[%s5973_s20] sm:$0xff]  ;;  %s5260_s20 = scalar_lea.vmem %s5259_s27, 512 }
 0x865   : > { %3703 = vmatprep.subr.bf16.mxu0 %v4810_v36  ;;  %3744 = vmatprep.subr.bf16.mxu1 %v4813_v37  ;;  %v2004_v36 = vrot.slane %v5829_v35, %v5745_v17  ;;  %v2012_v37 = vrot.slane %v5829_v35, %v739_v1  ;;  %p5262_p9 = scmp.lt.s32.totalorder %s5260_s20, %s5254_s1 }
 0x867   : > { %p5263_p6 = por %p5262_p9, %p5261_p3 }
 0x868   : > { %3704 = vmatpush1.bf16.msra.mxu0 %v4808_v38  ;;  %3745 = vmatpush1.bf16.msra.mxu1 %v4811_v12  ;;  %v2008_v38 = vrot.slane %v5829_v35, %v5742_v16  ;;  %v2016_v12 = vrot.slane %v5829_v35, %v743_v3 }
 0x869   : > { %3705 = vmatprep.subr.bf16.mxu0 %v4816_v39  ;;  %3746 = vmatprep.subr.bf16.mxu1 %v4819_v40  ;;  %p5264_p0 = pnand %p5263_p6, %p5257_p1 }
 0x86c   : > { %3706 = vmatpush1.bf16.msra.mxu0 %v4814_v41  ;;  %3747 = vmatpush1.bf16.msra.mxu1 %v4817_v42 }
 0x86d   : > { %3707 = vmatprep.subr.bf16.mxu0 %v4822_v43  ;;  %3748 = vmatprep.subr.bf16.mxu1 %v4825_v44 }
 0x870   : > { %3708 = vmatpush1.bf16.msra.mxu0 %v4820_v45  ;;  %3749 = vmatpush1.bf16.msra.mxu1 %v4823_v46 }
 0x871   : > { %3709 = vmatprep.subr.bf16.mxu0 %v4828_v47  ;;  %3750 = vmatprep.subr.bf16.mxu1 %v4831_v48 }
 0x874   : > { %3710 = vmatpush1.bf16.msra.mxu0 %v4826_v49  ;;  %3751 = vmatpush1.bf16.msra.mxu1 %v4829_v50 }
 0x875   : > { %3711 = vmatprep.subr.bf16.mxu0 %v4834_v53  ;;  %3752 = vmatprep.subr.bf16.mxu1 %v4837_v54 }
 0x878   : > { %3712 = vmatpush1.bf16.msra.mxu0 %v4832_v55  ;;  %3753 = vmatpush1.bf16.msra.mxu1 %v4835_v56 }
 0x879   : > { %3713 = vmatprep.subr.bf16.mxu0 %v4840_v57  ;;  %3754 = vmatprep.subr.bf16.mxu1 %v4843_v58 }
 0x87c   : > { %3714 = vmatpush1.bf16.msra.mxu0 %v4838_v59  ;;  %3755 = vmatpush1.bf16.msra.mxu1 %v4841_v60 }
 0x87d   : > { %3715 = vmatprep.subr.bf16.mxu0 %v4846_v61  ;;  %3756 = vmatprep.subr.bf16.mxu1 %v4849_v62 }
 0x880   : > { %3716 = vmatpush1.bf16.msra.mxu0 %v4844_v63  ;;  %3757 = vmatpush1.bf16.msra.mxu1 %v4847_v0 }
 0x881   : > { %3717 = vmatprep.subr.bf16.mxu0 %v4852_v2  ;;  %3758 = vmatprep.subr.bf16.mxu1 %v4855_v4 }
 0x884   : > { %3718 = vmatpush1.bf16.msra.mxu0 %v4850_v5  ;;  %3759 = vmatpush1.bf16.msra.mxu1 %v4853_v6 }
 0x885   : > { %3719 = vmatprep.subr.bf16.mxu0 %v4858_v8  ;;  %3760 = vmatprep.subr.bf16.mxu1 %v4861_v10 }
 0x888   : > { %3720 = vmatpush1.bf16.msra.mxu0 %v4856_v11  ;;  %3761 = vmatpush1.bf16.msra.mxu1 %v4859_v13 }
 0x889   : > { %3721 = vmatprep.subr.bf16.mxu0 %v4864_v51  ;;  %3762 = vmatprep.subr.bf16.mxu1 %v4867_v52 }
 0x88c   : > { %3722 = vmatpush1.bf16.msra.mxu0 %v4862_v14  ;;  %3763 = vmatpush1.bf16.msra.mxu1 %v4865_v18  ;;  %v4886_v18 = vld [vmem:[#allocation15 + $0x200] ss:$8 sps:$4 sm:$0xff]  }
 0x88d   : > { %3723 = vmatprep.subr.bf16.mxu0 %v4870_v19  ;;  %3764 = vmatprep.subr.bf16.mxu1 %v4873_v20 }
 0x890   : > { %3724 = vmatpush1.bf16.msra.mxu0 %v4868_v21  ;;  %3765 = vmatpush1.bf16.msra.mxu1 %v4871_v22  ;;  %v4889_v21 = vld [vmem:[#allocation15 + $0x300] ss:$8 sps:$4 sm:$0xff]   ;;  %v4894_v22 = vld [vmem:[#allocation15 + $0x214] ss:$8 sps:$4 sm:$0xff]  }
 0x891   : > { %3725 = vmatprep.subr.bf16.mxu0 %v4876_v23  ;;  %3766 = vmatprep.subr.bf16.mxu1 %v4879_v24  ;;  %v4897_v24 = vld [vmem:[#allocation15 + $0x314] ss:$8 sps:$4 sm:$0xff]  }
 0x894   : > { %3726 = vmatpush1.bf16.msra.mxu0 %v4874_v25  ;;  %3767 = vmatpush1.bf16.msra.mxu1 %v4877_v26  ;;  %v4892_v25 = vld [vmem:[#allocation15 + $0x210] ss:$8 sps:$4 sm:$0xff]  }
 0x895   : > { %3727 = vmatprep.subr.bf16.mxu0 %v4882_v29  ;;  %3768 = vmatprep.subr.bf16.mxu1 %v4885_v30  ;;  %v4895_v26 = vld [vmem:[#allocation15 + $0x310] ss:$8 sps:$4 sm:$0xff]   ;;  %v4900_v29 = vld [vmem:[#allocation15 + $0x224] ss:$8 sps:$4 sm:$0xff]  }
 0x896   : > { %v4903_v30 = vld [vmem:[#allocation15 + $0x324] ss:$8 sps:$4 sm:$0xff]  }
 0x898   : > { %3728 = vmatpush1.bf16.msra.mxu0 %v4880_v31  ;;  %3769 = vmatpush1.bf16.msra.mxu1 %v4883_v32  ;;  %v4898_v31 = vld [vmem:[#allocation15 + $0x220] ss:$8 sps:$4 sm:$0xff]  }
 0x899   : > { %3779 = vmatprep.subr.bf16.mxu0 %v4888_v33  ;;  %3820 = vmatprep.subr.bf16.mxu1 %v4891_v34  ;;  %v4901_v32 = vld [vmem:[#allocation15 + $0x320] ss:$8 sps:$4 sm:$0xff]   ;;  %v4906_v33 = vld [vmem:[#allocation15 + $0x234] ss:$8 sps:$4 sm:$0xff]  }
 0x89a   : > { %v4909_v34 = vld [vmem:[#allocation15 + $0x334] ss:$8 sps:$4 sm:$0xff]  }
 0x8ee   : > { %v2715_v39 = vpop.f32.mrb[16].mxu0  ;;  %v2756_v40 = vpop.f32.mrb[16].mxu1 }
 0x8ef   : > { %v2716_v41 = vadd.f32 %v2715_v39, %v2004_v36  ;;  %v2757_v42 = vadd.f32 %v2756_v40, %v2012_v37  ;;  %v2717_v43 = vpop.f32.mrb[17].mxu0  ;;  %v2758_v44 = vpop.f32.mrb[17].mxu1  ;;  %v4904_v36 = vld [vmem:[#allocation15 + $0x230] ss:$8 sps:$4 sm:$0xff]   ;;  %v4910_v39 = vld [vmem:[#allocation15 + $0x240] ss:$8 sps:$4 sm:$0xff]  }
 0x8f0   : > { %v2718_v45 = vadd.f32 %v2717_v43, %v2008_v38  ;;  %v2759_v46 = vadd.f32 %v2758_v44, %v2016_v12  ;;  %v2719_v47 = vpop.f32.mrb[18].mxu0  ;;  %v2760_v48 = vpop.f32.mrb[18].mxu1  ;;  %v4907_v37 = vld [vmem:[#allocation15 + $0x330] ss:$8 sps:$4 sm:$0xff]   ;;  %v4912_v38 = vld [vmem:[#allocation15 + $0x244] ss:$8 sps:$4 sm:$0xff]  }
 0x8f1   : > { %v4298_v49 = vmul.f32 -1.702, %v2716_v41  ;;  %v4300_v50 = vmul.f32 -1.702, %v2757_v42  ;;  %v2720_v1 = vpop.f32.mrb[19].mxu0  ;;  %v2761_v53 = vpop.f32.mrb[19].mxu1 }
 0x8f2   : > { %v4299_v54 = vmul.f32 -1.702, %v2718_v45  ;;  %v4301_v55 = vmul.f32 -1.702, %v2759_v46  ;;  %v4915_v12 = vld [vmem:[#allocation15 + $0x344] ss:$8 sps:$4 sm:$0xff]   ;;  %v2020_v53 = vrot.slane %v5829_v35, %v747_v27 }
 0x8f3   : > { %v2861_v56 = vmul.f32 1.442695, %v4298_v49  ;;  %v2865_v57 = vmul.f32 1.442695, %v4300_v50  ;;  %v4913_v40 = vld [vmem:[#allocation15 + $0x340] ss:$8 sps:$4 sm:$0xff]  }
 0x8f4   : > { %v2863_v58 = vmul.f32 1.442695, %v4299_v54  ;;  %v2867_v3 = vmul.f32 1.442695, %v4301_v55  ;;  %v4916_v43 = vld [vmem:[#allocation15 + $0x250] ss:$8 sps:$4 sm:$0xff]  }
 0x8f5   : > { %4994 = vpow2.f32 %v2861_v56  ;;  %v4919_v44 = vld [vmem:[#allocation15 + $0x350] ss:$8 sps:$4 sm:$0xff]   ;;  %v2027_v47 = vsub.s32 6, %v5739_v15  ;;  %v2031_v48 = vsub.s32 7, %v5739_v15  ;;  %v4922_v49 = vld [vmem:[#allocation15 + $0x260] ss:$8 sps:$4 sm:$0xff]   ;;  %v2024_v56 = vrot.slane %v5829_v35, %v751_v28 }
 0x8f6   : > { %4996 = vpow2.f32 %v2865_v57  ;;  %v4925_v50 = vld [vmem:[#allocation15 + $0x360] ss:$8 sps:$4 sm:$0xff]   ;;  %v4930_v1 = vld [vmem:[#allocation15 + $0x274] ss:$8 sps:$4 sm:$0xff]   ;;  %v4939_v15 = vld [vmem:[#allocation15 + $0x384] ss:$8 sps:$4 sm:$0xff]  }
 0x8f7   : > { %4998 = vpow2.f32 %v2863_v58  ;;  %v2028_v54 = vrot.slane %v5829_v35, %v2027_v47  ;;  %v4933_v55 = vld [vmem:[#allocation15 + $0x374] ss:$8 sps:$4 sm:$0xff]   ;;  %v2032_v57 = vrot.slane %v5829_v35, %v2031_v48  ;;  %v4928_v58 = vld [vmem:[#allocation15 + $0x270] ss:$8 sps:$4 sm:$0xff]  }
 0x8f8   : > { %5000 = vpow2.f32 %v2867_v3  ;;  %v4969_v48 = vld [vmem:[#allocation15 + $0x3d4] ss:$8 sps:$4 sm:$0xff]  }
 0x8ff   : > { %v4995_v59 = vpop.eup %4994 }
 0x900   : > { %v4997_v60 = vpop.eup %4996  ;;  %v2877_v61 = vadd.f32 1.0, %v4995_v59 }
 0x901   : > { %v4999_v62 = vpop.eup %4998  ;;  %v2879_v63 = vadd.f32 1.0, %v4997_v60  ;;  %v4931_v60 = vld [vmem:[#allocation15 + $0x370] ss:$8 sps:$4 sm:$0xff]  }
 0x902   : > { %v5001_v0 = vpop.eup %5000  ;;  %5002 = vrcp.f32 %v2877_v61  ;;  %v2878_v2 = vadd.f32 1.0, %v4999_v62  ;;  %v4936_v61 = vld [vmem:[#allocation15 + $0x284] ss:$8 sps:$4 sm:$0xff]  }
 0x903   : > { %5004 = vrcp.f32 %v2879_v63  ;;  %v2880_v4 = vadd.f32 1.0, %v5001_v0 }
 0x904   : > { %5006 = vrcp.f32 %v2878_v2 }
 0x905   : > { %5008 = vrcp.f32 %v2880_v4 }
 0x90c   : > { %v5003_v5 = vpop.eup %5002 }
 0x90d   : > { %v5005_v6 = vpop.eup %5004  ;;  %v2901_v10 = vmul.f32 %v5003_v5, %v2716_v41  ;;  %v4918_v41 = vld [vmem:[#allocation15 + $0x254] ss:$8 sps:$4 sm:$0xff]   ;;  %v4934_v5 = vld [vmem:[#allocation15 + $0x280] ss:$8 sps:$4 sm:$0xff]  }
 0x90e   : > { %v5007_v8 = vpop.eup %5006  ;;  %v2903_v13 = vmul.f32 %v5005_v6, %v2757_v42  ;;  %v4921_v42 = vld [vmem:[#allocation15 + $0x354] ss:$8 sps:$4 sm:$0xff]   ;;  %v4937_v6 = vld [vmem:[#allocation15 + $0x380] ss:$8 sps:$4 sm:$0xff]  }
 0x90f   : > { %v5009_v11 = vpop.eup %5008  ;;  %v2902_v51 = vmul.f32 %v5007_v8, %v2718_v45  ;;  %v2909_v19 = vpack.c.bf16 %v2901_v10, %v2901_v10  ;;  %v4924_v45 = vld [vmem:[#allocation15 + $0x264] ss:$8 sps:$4 sm:$0xff]  }
 0x910   : > { %v2904_v52 = vmul.f32 %v5009_v11, %v2759_v46  ;;  %v2911_v23 = vpack.c.bf16 %v2903_v13, %v2903_v13  ;;  %v4927_v46 = vld [vmem:[#allocation15 + $0x364] ss:$8 sps:$4 sm:$0xff]  }
 0x911   : > { %v2910_v14 = vpack.c.bf16 %v2902_v51, %v2902_v51 }
 0x912   : > { %v2912_v20 = vpack.c.bf16 %v2904_v52, %v2904_v52 }
 0x913   : > { %3729 = vmatprep.mubr.bf16.mxu0 %v2910_v14  ;;  %v4942_v14 = vld [vmem:[#allocation15 + $0x294] ss:$8 sps:$4 sm:$0xff]  }
 0x914   : > { %3770 = vmatprep.mubr.bf16.mxu1 %v2912_v20  ;;  %3730 = vmatmul.mubr.bf16.vlgmr.msra.gmra.mrb[24].mxu0 %v2909_v19  ;;  %v4945_v20 = vld [vmem:[#allocation15 + $0x394] ss:$8 sps:$4 sm:$0xff]  }
 0x915   : > { %3771 = vmatmul.mubr.bf16.vlgmr.msra.gmra.mrb[24].mxu1 %v2911_v23  ;;  %3780 = vmatpush1.bf16.msra.mxu0 %v4886_v18  ;;  %v4940_v23 = vld [vmem:[#allocation15 + $0x290] ss:$8 sps:$4 sm:$0xff]  }
 0x916   : > { %3821 = vmatpush1.bf16.msra.mxu1 %v4889_v21  ;;  %3781 = vmatprep.subr.bf16.mxu0 %v4894_v22 }
 0x917   : > { %3822 = vmatprep.subr.bf16.mxu1 %v4897_v24  ;;  %v4943_v24 = vld [vmem:[#allocation15 + $0x390] ss:$8 sps:$4 sm:$0xff]  }
 0x919   : > { %3782 = vmatpush1.bf16.msra.mxu0 %v4892_v25  ;;  %v4948_v25 = vld [vmem:[#allocation15 + $0x2a4] ss:$8 sps:$4 sm:$0xff]  }
 0x91a   : > { %3823 = vmatpush1.bf16.msra.mxu1 %v4895_v26  ;;  %3783 = vmatprep.subr.bf16.mxu0 %v4900_v29  ;;  %v4951_v26 = vld [vmem:[#allocation15 + $0x3a4] ss:$8 sps:$4 sm:$0xff]   ;;  %v4946_v29 = vld [vmem:[#allocation15 + $0x2a0] ss:$8 sps:$4 sm:$0xff]  }
 0x91b   : > { %3824 = vmatprep.subr.bf16.mxu1 %v4903_v30  ;;  %v4949_v30 = vld [vmem:[#allocation15 + $0x3a0] ss:$8 sps:$4 sm:$0xff]  }
 0x91d   : > { %3784 = vmatpush1.bf16.msra.mxu0 %v4898_v31  ;;  %v4954_v31 = vld [vmem:[#allocation15 + $0x2b4] ss:$8 sps:$4 sm:$0xff]  }
 0x91e   : > { %3825 = vmatpush1.bf16.msra.mxu1 %v4901_v32  ;;  %3785 = vmatprep.subr.bf16.mxu0 %v4906_v33  ;;  %v4957_v32 = vld [vmem:[#allocation15 + $0x3b4] ss:$8 sps:$4 sm:$0xff]   ;;  %v4952_v33 = vld [vmem:[#allocation15 + $0x2b0] ss:$8 sps:$4 sm:$0xff]  }
 0x91f   : > { %3826 = vmatprep.subr.bf16.mxu1 %v4909_v34  ;;  %v4955_v34 = vld [vmem:[#allocation15 + $0x3b0] ss:$8 sps:$4 sm:$0xff]  }
 0x921   : > { %3786 = vmatpush1.bf16.msra.mxu0 %v4904_v36  ;;  %v4960_v36 = vld [vmem:[#allocation15 + $0x2c4] ss:$8 sps:$4 sm:$0xff]  }
 0x922   : > { %3827 = vmatpush1.bf16.msra.mxu1 %v4907_v37  ;;  %3787 = vmatprep.subr.bf16.mxu0 %v4912_v38  ;;  %v4963_v38 = vld [vmem:[#allocation15 + $0x3c4] ss:$8 sps:$4 sm:$0xff]  }
 0x923   : > { %3828 = vmatprep.subr.bf16.mxu1 %v4915_v12 }
 0x925   : > { %3788 = vmatpush1.bf16.msra.mxu0 %v4910_v39 }
 0x926   : > { %3829 = vmatpush1.bf16.msra.mxu1 %v4913_v40  ;;  %3789 = vmatprep.subr.bf16.mxu0 %v4918_v41 }
 0x927   : > { %3830 = vmatprep.subr.bf16.mxu1 %v4921_v42  ;;  %v4958_v42 = vld [vmem:[#allocation15 + $0x2c0] ss:$8 sps:$4 sm:$0xff]  }
 0x929   : > { %3790 = vmatpush1.bf16.msra.mxu0 %v4916_v43 }
 0x92a   : > { %3831 = vmatpush1.bf16.msra.mxu1 %v4919_v44  ;;  %3791 = vmatprep.subr.bf16.mxu0 %v4924_v45  ;;  %v4961_v45 = vld [vmem:[#allocation15 + $0x3c0] ss:$8 sps:$4 sm:$0xff]  }
 0x92b   : > { %3832 = vmatprep.subr.bf16.mxu1 %v4927_v46  ;;  %v4966_v46 = vld [vmem:[#allocation15 + $0x2d4] ss:$8 sps:$4 sm:$0xff]  }
 0x92d   : > { %3792 = vmatpush1.bf16.msra.mxu0 %v4922_v49  ;;  %v4964_v49 = vld [vmem:[#allocation15 + $0x2d0] ss:$8 sps:$4 sm:$0xff]  }
 0x92e   : > { %3833 = vmatpush1.bf16.msra.mxu1 %v4925_v50  ;;  %v2797_v3 = vpop.f32.mrb[20].mxu0  ;;  %v2838_v59 = vpop.f32.mrb[20].mxu1  ;;  %3793 = vmatprep.subr.bf16.mxu0 %v4930_v1  ;;  %v4967_v50 = vld [vmem:[#allocation15 + $0x3d0] ss:$8 sps:$4 sm:$0xff]   ;;  %v4972_v1 = vld [vmem:[#allocation15 + $0x2e4] ss:$8 sps:$4 sm:$0xff]  }
 0x92f   : > { %v5851_v62 = vadd.f32 %v2797_v3, %v2020_v53  ;;  %v5853_v27 = vadd.f32 %v2838_v59, %v2028_v54  ;;  %v2799_v63 = vpop.f32.mrb[21].mxu0  ;;  %v2840_v0 = vpop.f32.mrb[21].mxu1  ;;  %3834 = vmatprep.subr.bf16.mxu1 %v4933_v55  ;;  %v4975_v53 = vld [vmem:[#allocation15 + $0x3e4] ss:$8 sps:$4 sm:$0xff]   ;;  %v4970_v54 = vld [vmem:[#allocation15 + $0x2e0] ss:$8 sps:$4 sm:$0xff]  }
 0x930   : > { %v5855_v2 = vadd.f32 %v2799_v63, %v2024_v56  ;;  %v5857_v28 = vadd.f32 %v2840_v0, %v2032_v57  ;;  %v2801_v35 = vpop.f32.mrb[22].mxu0  ;;  %v2842_v4 = vpop.f32.mrb[22].mxu1  ;;  %v4973_v55 = vld [vmem:[#allocation15 + $0x3e0] ss:$8 sps:$4 sm:$0xff]   ;;  %v4978_v56 = vld [vmem:[#allocation15 + $0x2f4] ss:$8 sps:$4 sm:$0xff]  }
 0x931   : > { %v4302_v8 = vmul.f32 -1.702, %v5851_v62  ;;  %v4304_v10 = vmul.f32 -1.702, %v5853_v27  ;;  %3794 = vmatpush1.bf16.msra.mxu0 %v4928_v58  ;;  %v2802_v11 = vpop.f32.mrb[23].mxu0  ;;  %v2843_v13 = vpop.f32.mrb[23].mxu1 }
 0x932   : > { %v4303_v51 = vmul.f32 -1.702, %v5855_v2  ;;  %v4305_v52 = vmul.f32 -1.702, %v5857_v28  ;;  %3835 = vmatpush1.bf16.msra.mxu1 %v4931_v60  ;;  %3795 = vmatprep.subr.bf16.mxu0 %v4936_v61  ;;  %v4981_v57 = vld [vmem:[#allocation15 + $0x3f4] ss:$8 sps:$4 sm:$0xff]  }
 0x933   : > { %v2869_v18 = vmul.f32 1.442695, %v4302_v8  ;;  %v2873_v19 = vmul.f32 1.442695, %v4304_v10  ;;  %3836 = vmatprep.subr.bf16.mxu1 %v4939_v15  ;;  %v4976_v59 = vld [vmem:[#allocation15 + $0x2f0] ss:$8 sps:$4 sm:$0xff]  }
 0x934   : > { %v2871_v21 = vmul.f32 1.442695, %v4303_v51  ;;  %v2875_v22 = vmul.f32 1.442695, %v4305_v52  ;;  %v4979_v63 = vld [vmem:[#allocation15 + $0x3f0] ss:$8 sps:$4 sm:$0xff]  }
 0x935   : > { %5010 = vpow2.f32 %v2869_v18  ;;  %3796 = vmatpush1.bf16.msra.mxu0 %v4934_v5 }
 0x936   : > { %5012 = vpow2.f32 %v2873_v19  ;;  %3837 = vmatpush1.bf16.msra.mxu1 %v4937_v6  ;;  %3797 = vmatprep.subr.bf16.mxu0 %v4942_v14 }
 0x937   : > { %5014 = vpow2.f32 %v2871_v21  ;;  %3838 = vmatprep.subr.bf16.mxu1 %v4945_v20 }
 0x938   : > { %5016 = vpow2.f32 %v2875_v22 }
 0x939   : > { %3798 = vmatpush1.bf16.msra.mxu0 %v4940_v23 }
 0x93a   : > { %3839 = vmatpush1.bf16.msra.mxu1 %v4943_v24  ;;  %3799 = vmatprep.subr.bf16.mxu0 %v4948_v25 }
 0x93b   : > { %3840 = vmatprep.subr.bf16.mxu1 %v4951_v26 }
 0x93d   : > { %3800 = vmatpush1.bf16.msra.mxu0 %v4946_v29 }
 0x93e   : > { %3841 = vmatpush1.bf16.msra.mxu1 %v4949_v30  ;;  %3801 = vmatprep.subr.bf16.mxu0 %v4954_v31 }
 0x93f   : > { %v5011_v37 = vpop.eup %5010  ;;  %3842 = vmatprep.subr.bf16.mxu1 %v4957_v32 }
 0x940   : > { %v5013_v12 = vpop.eup %5012  ;;  %v2881_v39 = vadd.f32 1.0, %v5011_v37 }
 0x941   : > { %v5015_v40 = vpop.eup %5014  ;;  %v2883_v41 = vadd.f32 1.0, %v5013_v12  ;;  %3802 = vmatpush1.bf16.msra.mxu0 %v4952_v33 }
 0x942   : > { %v5017_v43 = vpop.eup %5016  ;;  %5018 = vrcp.f32 %v2881_v39  ;;  %v2882_v44 = vadd.f32 1.0, %v5015_v40  ;;  %3843 = vmatpush1.bf16.msra.mxu1 %v4955_v34  ;;  %3803 = vmatprep.subr.bf16.mxu0 %v4960_v36 }
 0x943   : > { %5020 = vrcp.f32 %v2883_v41  ;;  %v2884_v47 = vadd.f32 1.0, %v5017_v43  ;;  %3844 = vmatprep.subr.bf16.mxu1 %v4963_v38 }
 0x944   : > { %5022 = vrcp.f32 %v2882_v44 }
 0x945   : > { %5024 = vrcp.f32 %v2884_v47  ;;  %3804 = vmatpush1.bf16.msra.mxu0 %v4958_v42 }
 0x946   : > { %3845 = vmatpush1.bf16.msra.mxu1 %v4961_v45  ;;  %3805 = vmatprep.subr.bf16.mxu0 %v4966_v46 }
 0x947   : > { %3846 = vmatprep.subr.bf16.mxu1 %v4969_v48 }
 0x949   : > { %3806 = vmatpush1.bf16.msra.mxu0 %v4964_v49 }
 0x94a   : > { %3847 = vmatpush1.bf16.msra.mxu1 %v4967_v50  ;;  %3807 = vmatprep.subr.bf16.mxu0 %v4972_v1 }
 0x94b   : > { %3848 = vmatprep.subr.bf16.mxu1 %v4975_v53 }
 0x94c   : > { %v5019_v58 = vpop.eup %5018 }
 0x94d   : > { %v5021_v3 = vpop.eup %5020  ;;  %3808 = vmatpush1.bf16.msra.mxu0 %v4970_v54  ;;  %v2905_v61 = vmul.f32 %v5019_v58, %v5851_v62  ;;  %v3045_v62 = vld [vmem:[%s5974_s7] sm:$0x3] }
 0x94e   : > { %v5023_v60 = vpop.eup %5022  ;;  %3849 = vmatpush1.bf16.msra.mxu1 %v4973_v55  ;;  %3809 = vmatprep.subr.bf16.mxu0 %v4978_v56  ;;  %v2907_v15 = vmul.f32 %v5021_v3, %v5853_v27  ;;  %v3050_v27 = vrot.slane %v3045_v62, %v5745_v17 }
 0x94f   : > { %v5025_v0 = vpop.eup %5024  ;;  %v2906_v35 = vmul.f32 %v5023_v60, %v5855_v2  ;;  %3850 = vmatprep.subr.bf16.mxu1 %v4981_v57  ;;  %v2913_v6 = vpack.c.bf16 %v2905_v61, %v2905_v61  ;;  %v3054_v2 = vrot.slane %v3045_v62, %v5742_v16 }
 0x950   : > { %v2908_v4 = vmul.f32 %v5025_v0, %v5857_v28  ;;  %v2915_v10 = vpack.c.bf16 %v2907_v15, %v2907_v15 }
 0x951   : > { %v2914_v5 = vpack.c.bf16 %v2906_v35, %v2906_v35  ;;  %3810 = vmatpush1.bf16.msra.mxu0 %v4976_v59 }
 0x952   : > { %v2916_v8 = vpack.c.bf16 %v2908_v4, %v2908_v4  ;;  %3851 = vmatpush1.bf16.msra.mxu1 %v4979_v63 }
 0x953   : > { %3811 = vmatprep.mubr.bf16.mxu0 %v2914_v5 }
 0x954   : > { %3852 = vmatprep.mubr.bf16.mxu1 %v2916_v8  ;;  %3812 = vmatmul.mubr.bf16.vlgmr.msra.gmra.mrb[28].mxu0 %v2913_v6 }
 0x955   : > { %3853 = vmatmul.mubr.bf16.vlgmr.msra.gmra.mrb[28].mxu1 %v2915_v10 }
 0x9e7   : > { %v3731_v11 = vpop.f32.mrb[24].mxu0 }
 0x9e8   : > { %v3732_v28 = vadd.f32 %v3731_v11, %v3050_v27  ;;  %v3772_v13 = vpop.f32.mrb[24].mxu1  ;;  %v3733_v51 = vpop.f32.mrb[25].mxu0 }
 0x9e9   : > { %v3734_v52 = vadd.f32 %v3733_v51, %v3054_v2  ;;  %v3774_v14 = vpop.f32.mrb[25].mxu1  ;;  %v3735_v18 = vpop.f32.mrb[26].mxu0 }
 0x9ea   : > { %v3773_v19 = vadd.f32 %v3772_v13, %v3732_v28  ;;  %v3776_v20 = vpop.f32.mrb[26].mxu1  ;;  %v3736_v21 = vpop.f32.mrb[27].mxu0 }
 0x9eb   : > { %v3775_v22 = vadd.f32 %v3774_v14, %v3734_v52  ;;  %v3777_v23 = vpop.f32.mrb[27].mxu1 }
 0xa27   : > { %v3813_v24 = vpop.f32.mrb[28].mxu0 }
 0xa28   : > { %v3814_v25 = vadd.f32 %v3813_v24, %v3773_v19  ;;  %v3854_v26 = vpop.f32.mrb[28].mxu1  ;;  %v3815_v17 = vpop.f32.mrb[29].mxu0 }
 0xa29   : > { %v3816_v29 = vadd.f32 %v3815_v17, %v3775_v22  ;;  %v3856_v16 = vpop.f32.mrb[29].mxu1  ;;  %v3817_v30 = vpop.f32.mrb[30].mxu0 }
 0xa2a   : > { %v3855_v31 = vadd.f32 %v3854_v26, %v3814_v25  ;;  %v3858_v32 = vpop.f32.mrb[30].mxu1  ;;  %v3818_v33 = vpop.f32.mrb[31].mxu0 }
 0xa2b   : > { %v3857_v34 = vadd.f32 %v3856_v16, %v3816_v29  ;;  %v3859_v36 = vpop.f32.mrb[31].mxu1 }
 0xa2c   : > { %v3861_v37 = vadd.f32 %v3855_v31, %v5792_v7 }
 0xa2d   : > { %v3862_v38 = vadd.f32 %v3857_v34, %v5794_v9 }
 0xa2e   : > { %3863 = vst [vmem:[%s579_s22] sm:$0xff] %v3861_v37 }
 0xa2f   : > { %3864 = vst [vmem:[%s579_s22 + $0x8] sm:$0xff] %v3862_v38 }
 0xa30   : > { %5267 = shalt.err (!%p5264_p0)
}
 0xa31   : > { %s5268_s25 = scalar_lea.hbm %s5880_s24, 256  ;;  %s5272_s7 = scalar_lea.hbm %s5975_s17, 512 }
 0xa32   : > { %p5269_p2 = scmp.ne.s32.totalorder %s5880_s24, %s5268_s25  ;;  %p5273_p12 = scmp.lt.u32.totalorder %s5880_s24, %s5975_s17 }
 0xa33   : > { %p5274_p11 = scmp.lt.u32.totalorder %s5272_s7, %s5268_s25  ;;  %p5276_p5 = scmp.lt.u32.totalorder %s5268_s25, %s5880_s24 }
 0xa34   : > { %p5270_p8 = pnand %p5269_p2, %p5976_p7 }
 0xa35   : > { %p5275_p13 = por %p5274_p11, %p5273_p12 }
 0xa36   : > { %p5271_p10 = pneg %p5270_p8 }
 0xa37   : > { %p5277_p4 = por %p5276_p5, %p5275_p13 }
 0xa39   : > { %p5278_p1 = pnand %p5277_p4, %p5271_p10 }
 0xa3b   : > { %5281 = shalt.err (!%p5278_p1)
}
 0xa3c   : > { %4503 = dma.vmem_to_hbm [thread:$0]  (%p5976_p7), %s5882_s28, 256, %s5880_s24, %s3866_s19  }
 0xa3d PF: > { %s3892_s9 = sand.u32 1, %s5324_s29   ;;  %p5977_p3 = scmp.ne.s32.totalorder %s5959_s8, 0 }
 0xa3e   : > { %p5978_p9 = scmp.ge.s32.totalorder %s5336_s16, 2  ;;  %s3893_s23 = scalar_lea.sflag [#allocation5], %s3892_s9 }
 0xa40   : > { %p4532_p6 = pnand %p5978_p9, %p5977_p3 }
 0xa42   : > { %5319 = dma.done.wait (!%p4532_p6), %s3893_s23, 256  }
 0xa43   : > { %5321 = vsyncadd (!%p4532_p6), %s3893_s23, 4294967040  ;;  %p31_p0 = scmp.ge.s32.totalorder %s5623_s21, 4   ;;  %s5979_s29 = smov %s5328_s30 }
 0xa44   : > { %s5980_s30 = smov %s5332_s15  ;;  %s5981_s15 = smov %s5635_s3 }
 0xa45   : > { %s5982_s16 = smov %s5623_s21  ;;  %33 = sbr.rel (!%p31_p0) target bundleno = 18 (0x12), region = 149 }
 0xa4c   :  { %3898 = vsyncpa [#allocation4], 1 }
 0xa4d   :  { %3900 = vsyncpa [#allocation4 + $0x1], 1 }
 0xa4e   :  { %3901 = vsyncpa [#allocation7], 1 }
 0xa4f   :  { %3902 = vsyncpa [#allocation10], 1 }
 0xa50   :  { %3903 = vsyncpa [#allocation13], 1 }
 0xa51   :  { %3904 = vsyncpa [#allocation16], 1 }
 0xa52   :  { %3905 = vsyncpa [#allocation5], 1 }
 0xa53   :  { %3907 = vsyncpa [#allocation5 + $0x1], 1 }

// kernel: tpu_custom_call.1
= control target key start
LH: loop header
LB: loop body
LE: loop exit
PB: predicated region body
PF: predicated region fallthrough
CT: control target
= control target key end

     0   :  { %s5924_s0 = inlined_call_operand.hbm [shape: f32[2,8,256], index: 0, kind: input, shape index: {}]   ;;  %s5925_s1 = inlined_call_operand.hbm [shape: f32[8,8], index: 1, kind: input, shape index: {}]   ;;  %s5926_s2 = inlined_call_operand.hbm [shape: f32[1,256], index: 2, kind: input, shape index: {}]   ;;  %s5927_s3 = inlined_call_operand.hbm [shape: f32[1,256], index: 3, kind: input, shape index: {}]   ;;  %s5928_s4 = inlined_call_operand.hbm [shape: bf16[256,768], index: 4, kind: input, shape index: {}]   ;;  %s5929_s5 = inlined_call_operand.vmem [shape: f32[1,768], index: 5, kind: input, shape index: {}]   ;;  %s5930_s6 = inlined_call_operand.hbm [shape: bf16[256,256], index: 6, kind: input, shape index: {}]   ;;  %s5931_s7 = inlined_call_operand.vmem [shape: f32[1,256], index: 7, kind: input, shape index: {}]   ;;  %s5932_s8 = inlined_call_operand.vmem [shape: f32[1,256], index: 8, kind: input, shape index: {}]   ;;  %s5933_s9 = inlined_call_operand.vmem [shape: f32[1,256], index: 9, kind: input, shape index: {}]   ;;  %s5934_s10 = inlined_call_operand.hbm [shape: bf16[256,1024], index: 10, kind: input, shape index: {}]   ;;  %s5935_s11 = inlined_call_operand.vmem [shape: f32[1,1024], index: 11, kind: input, shape index: {}]   ;;  %s5936_s12 = inlined_call_operand.hbm [shape: bf16[1024,256], index: 12, kind: input, shape index: {}]   ;;  %s5937_s13 = inlined_call_operand.vmem [shape: f32[1,256], index: 13, kind: input, shape index: {}]   ;;  %s5938_s14 = inlined_call_operand.hbm [shape: f32[2,8,256], index: 14, kind: output, shape index: {}]  }
   0x1   :  { %5943 = sst [smem:[#allocation24_spill]] %s5925_s1 }
   0x2   :  { %5944 = sst [smem:[#allocation25_spill]] %s5927_s3 }
   0x3   :  { %5945 = sst [smem:[#allocation26_spill]] %s5931_s7 }
   0x4   :  { %5946 = sst [smem:[#allocation27_spill]] %s5932_s8 }
   0x5   :  { %5947 = sst [smem:[#allocation28_spill]] %s5933_s9 }
   0x6   :  { %5948 = sst [smem:[#allocation29_spill]] %s5935_s11 }
   0x7   :  { %5949 = sst [smem:[#allocation30_spill]] %s5937_s13 }
   0x8   :  { %5950 = sst [smem:[#allocation31_spill]] %s5938_s14 }
   0x9   :  { %19 = vsyncpa [#allocation4], 0 }
   0xa   :  { %21 = vsyncpa [#allocation4 + $0x1], 0 }
   0xb   :  { %22 = vsyncpa [#allocation7], 0 }
   0xc   :  { %23 = vsyncpa [#allocation10], 0 }
   0xd   :  { %24 = vsyncpa [#allocation13], 0 }
   0xe   :  { %25 = vsyncpa [#allocation16], 0 }
   0xf   :  { %26 = vsyncpa [#allocation5], 0 }
  0x10   :  { %28 = vsyncpa [#allocation5 + $0x1], 0  ;;  %s5430_s29 = smov 0   ;;  %s5432_s30 = smov 0  }
  0x11   :  { %s5434_s15 = smov 0   ;;  %s5436_s16 = smov 0  }
  0x12 LB: > { %s5338_s17 = smov [#allocation6]   ;;  %s5451_s19 = sadd.s32 4294967295, %s5336_s16   ;;  %s5336_s16 = sphi %s5436_s16, %s5982_s16   ;;  %s5332_s15 = sphi %s5434_s15, %s5981_s15   ;;  %s5328_s30 = sphi %s5432_s30, %s5980_s30   ;;  %s5324_s29 = sphi %s5430_s29, %s5979_s29  }
  0x13   : > { %s377_s18 = sshll.u32 %s5338_s17, 4  ;;  %p4018_p0 = scmp.ge.s32.totalorder %s5336_s16, 1  ;;  %s378_s18 = int_to_ptr.vmem [resolvable:$true] %s377_s18 }
  0x14   : > { %p5940_p1 = scmp.eq.s32.totalorder %s5451_s19, 0  ;;  %p364_p2 = scmp.lt.s32.totalorder %s5336_s16, 3 }
  0x15   : > { %s5339_s21 = smov [#allocation9]   ;;  %s5340_s23 = smov [#allocation12]  }
  0x16   : > { %p5456_p3 = pnand %p4018_p0, %p364_p2  ;;  %s399_s22 = sshll.u32 %s5339_s21, 4  ;;  %s5463_s22 = int_to_ptr.vmem [resolvable:$true] %s399_s22 }
  0x17   : > { %s425_s24 = sshll.u32 %s5340_s23, 4  ;;  %s5953_s1 = sld [smem:[#allocation24_spill]]  ;;  %s5471_s24 = int_to_ptr.vmem [resolvable:$true] %s425_s24 }
  0x18   : > { %s5951_s20 = scalar_select %p5456_p3, 1, 0 }
  0x19   : > { %p4505_p5 = pneg %p5456_p3 }
  0x1b   : > { %p5467_p6 = pnand %p4505_p5, %p5940_p1 }
  0x1d   : > { %s5028_s28 = scalar_lea.hbm %s5953_s1, 128  ;;  %p5481_p8 = pneg %p5467_p6 }
  0x1e   : > { %p5029_p7 = scmp.ne.s32.totalorder %s5953_s1, %s5028_s28  ;;  %p5035_p11 = scmp.lt.u32.totalorder %s5028_s28, %s5953_s1 }
  0x20   : > { %p5031_p9 = pnand %p5481_p8, %p5029_p7 }
  0x22   : > { %p5032_p10 = pneg %p5031_p9 }
  0x24   : > { %p5037_p12 = pnand %p5035_p11, %p5032_p10 }
  0x26   : > { %5040 = shalt.err (!%p5037_p12)
}
  0x27   : > { %s5041_s26 = scalar_lea.vmem %s378_s18, 128  ;;  %p5049_p5 = scmp.lt.s32.totalorder %s378_s18, %s378_s18 }
  0x28   : > { %p5042_p13 = scmp.ne.s32.totalorder %s378_s18, %s5041_s26  ;;  %p5050_p4 = scmp.lt.s32.totalorder %s5041_s26, %s5041_s26 }
  0x2a   : > { %p5044_p0 = pnand %p5042_p13, %p5481_p8  ;;  %p5051_p1 = por %p5050_p4, %p5049_p5 }
  0x2c   : > { %p5045_p2 = pneg %p5044_p0 }
  0x2e   : > { %p5052_p3 = pnand %p5051_p1, %p5045_p2 }
  0x30   : > { %5055 = shalt.err (!%p5052_p3)
}
  0x31   : > { %4508 = dma.hbm_to_vmem [thread:$0]  (!%p5467_p6), %s5953_s1, 128, %s378_s18, [#allocation7]  }
  0x32   : > { %s5955_s3 = sld [smem:[#allocation25_spill]] }
  0x38   : > { %s5056_s17 = scalar_lea.hbm %s5955_s3, 32 }
  0x39   : > { %p5057_p7 = scmp.ne.s32.totalorder %s5955_s3, %s5056_s17  ;;  %p5063_p1 = scmp.lt.u32.totalorder %s5056_s17, %s5955_s3 }
  0x3b   : > { %p5059_p9 = pnand %p5057_p7, %p5481_p8 }
  0x3d   : > { %p5060_p4 = pneg %p5059_p9 }
  0x3f   : > { %p5065_p3 = pnand %p5063_p1, %p5060_p4 }
  0x41   : > { %5068 = shalt.err (!%p5065_p3)
}
  0x42   : > { %s5069_s18 = scalar_lea.vmem %s5463_s22, 32  ;;  %p5077_p13 = scmp.lt.s32.totalorder %s5463_s22, %s5463_s22 }
  0x43   : > { %p5070_p10 = scmp.ne.s32.totalorder %s5463_s22, %s5069_s18  ;;  %p5078_p0 = scmp.lt.s32.totalorder %s5069_s18, %s5069_s18 }
  0x45   : > { %p5072_p11 = pnand %p5070_p10, %p5481_p8  ;;  %p5079_p2 = por %p5078_p0, %p5077_p13 }
  0x47   : > { %p5073_p12 = pneg %p5072_p11 }
  0x49   : > { %p5080_p5 = pnand %p5079_p2, %p5073_p12 }
  0x4b   : > { %5083 = shalt.err (!%p5080_p5)
}
  0x4c   : > { %4514 = dma.hbm_to_vmem [thread:$0]  (!%p5467_p6), %s5955_s3, 32, %s5463_s22, [#allocation10]  }
  0x4d   : > { %s5084_s13 = scalar_lea.hbm %s5930_s6, 4096 }
  0x4e   : > { %p5085_p7 = scmp.ne.s32.totalorder %s5930_s6, %s5084_s13  ;;  %p5091_p1 = scmp.lt.u32.totalorder %s5084_s13, %s5930_s6 }
  0x50   : > { %p5087_p9 = pnand %p5085_p7, %p5481_p8 }
  0x52   : > { %p5088_p4 = pneg %p5087_p9 }
  0x54   : > { %p5093_p3 = pnand %p5091_p1, %p5088_p4 }
  0x56   : > { %5096 = shalt.err (!%p5093_p3)
}
  0x57   : > { %s5097_s22 = scalar_lea.vmem %s5471_s24, 4096  ;;  %p5105_p13 = scmp.lt.s32.totalorder %s5471_s24, %s5471_s24 }
  0x58   : > { %p5098_p10 = scmp.ne.s32.totalorder %s5471_s24, %s5097_s22  ;;  %p5106_p0 = scmp.lt.s32.totalorder %s5097_s22, %s5097_s22 }
  0x5a   : > { %p5100_p11 = pnand %p5098_p10, %p5481_p8  ;;  %p5107_p2 = por %p5106_p0, %p5105_p13 }
  0x5c   : > { %p5101_p12 = pneg %p5100_p11 }
  0x5e   : > { %p5108_p5 = pnand %p5107_p2, %p5101_p12 }
  0x60   : > { %5111 = shalt.err (!%p5108_p5)
}
  0x61   : > { %s5341_s18 = smov 128   ;;  %s5342_s9 = smov 8  }
  0x62   : > { %4520 = dma.hbm_to_vmem [thread:$0]  (!%p5467_p6), %s5930_s6, 4096, %s5471_s24, [#allocation13], %s5341_s18, %s5341_s18, %s5342_s9  }
  0x63   : > { %s5343_s27 = smov [#allocation8]   ;;  %s5344_s28 = smov [#allocation11]  }
  0x64   : > { %s388_s13 = sshll.u32 %s5343_s27, 4  ;;  %s409_s17 = sshll.u32 %s5344_s28, 4  ;;  %s389_s13 = int_to_ptr.vmem [resolvable:$true] %s388_s13  ;;  %s410_s17 = int_to_ptr.vmem [resolvable:$true] %s409_s17 }
  0x65   : > { %s5112_s22 = scalar_lea.hbm %s5926_s2, 32 }
  0x66   : > { %p5113_p7 = scmp.ne.s32.totalorder %s5926_s2, %s5112_s22  ;;  %p5119_p1 = scmp.lt.u32.totalorder %s5112_s22, %s5926_s2 }
  0x68   : > { %p5115_p9 = pnand %p5113_p7, %p5481_p8 }
  0x6a   : > { %p5116_p4 = pneg %p5115_p9 }
  0x6c   : > { %p5121_p3 = pnand %p5119_p1, %p5116_p4 }
  0x6e   : > { %5124 = shalt.err (!%p5121_p3)
}
  0x6f   : > { %s5125_s24 = scalar_lea.vmem %s389_s13, 32  ;;  %p5133_p13 = scmp.lt.s32.totalorder %s389_s13, %s389_s13 }
  0x70   : > { %p5126_p10 = scmp.ne.s32.totalorder %s389_s13, %s5125_s24  ;;  %p5134_p0 = scmp.lt.s32.totalorder %s5125_s24, %s5125_s24 }
  0x72   : > { %p5128_p11 = pnand %p5126_p10, %p5481_p8  ;;  %p5135_p2 = por %p5134_p0, %p5133_p13 }
  0x74   : > { %p5129_p12 = pneg %p5128_p11 }
  0x76   : > { %p5136_p5 = pnand %p5135_p2, %p5129_p12 }
  0x78   : > { %5139 = shalt.err (!%p5136_p5)
}
  0x79   : > { %4511 = dma.hbm_to_vmem [thread:$0]  (!%p5467_p6), %s5926_s2, 32, %s389_s13, [#allocation7]  }
  0x7a   : > { %s5140_s11 = scalar_lea.hbm %s5928_s4, 12288 }
  0x7b   : > { %p5141_p7 = scmp.ne.s32.totalorder %s5928_s4, %s5140_s11  ;;  %p5147_p1 = scmp.lt.u32.totalorder %s5140_s11, %s5928_s4 }
  0x7d   : > { %p5143_p9 = pnand %p5141_p7, %p5481_p8 }
  0x7f   : > { %p5144_p4 = pneg %p5143_p9 }
  0x81   : > { %p5149_p3 = pnand %p5147_p1, %p5144_p4 }
  0x83   : > { %5152 = shalt.err (!%p5149_p3)
}
  0x84   : > { %s5153_s26 = scalar_lea.vmem %s410_s17, 12288  ;;  %p5161_p13 = scmp.lt.s32.totalorder %s410_s17, %s410_s17 }
  0x85   : > { %p5154_p10 = scmp.ne.s32.totalorder %s410_s17, %s5153_s26  ;;  %p5162_p0 = scmp.lt.s32.totalorder %s5153_s26, %s5153_s26 }
  0x87   : > { %p5156_p11 = pnand %p5154_p10, %p5481_p8  ;;  %p5163_p2 = por %p5162_p0, %p5161_p13 }
  0x89   : > { %p5157_p12 = pneg %p5156_p11 }
  0x8b   : > { %p5164_p5 = pnand %p5163_p2, %p5157_p12 }
  0x8d   : > { %5167 = shalt.err (!%p5164_p5)
}
  0x8e   : > { %s5345_s13 = smov 384   ;;  %s5346_s22 = smov 24  }
  0x8f   : > { %4517 = dma.hbm_to_vmem [thread:$0]  (!%p5467_p6), %s5928_s4, 12288, %s410_s17, [#allocation10], %s5345_s13, %s5345_s13, %s5346_s22  }
  0x90   : > { %s5347_s3 = smov [#allocation14]   ;;  %s5168_s14 = scalar_lea.hbm %s5934_s10, 16384 }
  0x91   : > { %s447_s7 = sshll.u32 %s5347_s3, 4  ;;  %p5169_p7 = scmp.ne.s32.totalorder %s5934_s10, %s5168_s14  ;;  %s448_s7 = int_to_ptr.vmem [resolvable:$true] %s447_s7 }
  0x92   : > { %p5175_p1 = scmp.lt.u32.totalorder %s5168_s14, %s5934_s10 }
  0x93   : > { %p5171_p9 = pnand %p5169_p7, %p5481_p8 }
  0x95   : > { %p5172_p4 = pneg %p5171_p9 }
  0x97   : > { %p5177_p3 = pnand %p5175_p1, %p5172_p4 }
  0x99   : > { %5180 = shalt.err (!%p5177_p3)
}
  0x9a   : > { %s5181_s17 = scalar_lea.vmem %s448_s7, 16384  ;;  %p5189_p13 = scmp.lt.s32.totalorder %s448_s7, %s448_s7 }
  0x9b   : > { %p5182_p10 = scmp.ne.s32.totalorder %s448_s7, %s5181_s17  ;;  %p5190_p0 = scmp.lt.s32.totalorder %s5181_s17, %s5181_s17 }
  0x9d   : > { %p5184_p11 = pnand %p5182_p10, %p5481_p8  ;;  %p5191_p2 = por %p5190_p0, %p5189_p13 }
  0x9f   : > { %p5185_p12 = pneg %p5184_p11 }
  0xa1   : > { %p5192_p5 = pnand %p5191_p2, %p5185_p12 }
  0xa3   : > { %5195 = shalt.err (!%p5192_p5)
}
  0xa4   : > { %s5348_s13 = smov 512   ;;  %s5349_s22 = smov 32  }
  0xa5   : > { %4523 = dma.hbm_to_vmem [thread:$0]  (!%p5467_p6), %s5934_s10, 16384, %s448_s7, [#allocation13], %s5348_s13, %s5348_s13, %s5349_s22  }
  0xa6   : > { %s5350_s3 = smov [#allocation15]   ;;  %s5196_s27 = scalar_lea.hbm %s5936_s12, 16384 }
  0xa7   : > { %s463_s8 = sshll.u32 %s5350_s3, 4  ;;  %p5197_p7 = scmp.ne.s32.totalorder %s5936_s12, %s5196_s27  ;;  %s464_s8 = int_to_ptr.vmem [resolvable:$true] %s463_s8 }
  0xa8   : > { %p5203_p1 = scmp.lt.u32.totalorder %s5196_s27, %s5936_s12 }
  0xa9   : > { %p5199_p9 = pnand %p5197_p7, %p5481_p8 }
  0xab   : > { %p5200_p4 = pneg %p5199_p9 }
  0xad   : > { %p5205_p3 = pnand %p5203_p1, %p5200_p4 }
  0xaf   : > { %5208 = shalt.err (!%p5205_p3)
}
  0xb0   : > { %s5209_s7 = scalar_lea.vmem %s464_s8, 16384  ;;  %p5217_p13 = scmp.lt.s32.totalorder %s464_s8, %s464_s8 }
  0xb1   : > { %p5210_p10 = scmp.ne.s32.totalorder %s464_s8, %s5209_s7  ;;  %p5218_p0 = scmp.lt.s32.totalorder %s5209_s7, %s5209_s7 }
  0xb3   : > { %p5212_p11 = pnand %p5210_p10, %p5481_p8  ;;  %p5219_p2 = por %p5218_p0, %p5217_p13 }
  0xb5   : > { %p5213_p12 = pneg %p5212_p11 }
  0xb7   : > { %p5220_p5 = pnand %p5219_p2, %p5213_p12 }
  0xb9   : > { %5223 = shalt.err (!%p5220_p5)
}
  0xba   : > { %4526 = dma.hbm_to_vmem [thread:$0]  (!%p5467_p6), %s5936_s12, 16384, %s464_s8, [#allocation16], %s5341_s18, %s5341_s18, %s5342_s9  }
  0xbb   : > { %s4017_s25 = sadd.s32 4294967294, %s5336_s16   ;;  %s5623_s21 = sadd.s32 1, %s5336_s16  }
  0xbc   : > { %s41_s24 = sadd.s32 1, %s5332_s15  ;;  %s38_s1 = ssub.s32 %s5336_s16, %s5623_s21 }
  0xbd   : > { %p48_p8 = scmp.ne.s32.totalorder %s5332_s15, %s5328_s30  ;;  %p39_p7 = scmp.eq.s32.totalorder %s38_s1, 0 }
  0xbe   : > { %p49_p9 = scmp.eq.s32.totalorder %s5336_s16, 0  ;;  %p54_p4 = scmp.ne.s32.totalorder %s5328_s30, %s5324_s29 }
  0xbf   : > { %p351_p1 = scmp.eq.s32.totalorder %s5451_s19, 1  ;;  %p5956_p10 = scmp.eq.s32.totalorder %s5451_s19, 0 }
  0xc0   : > { %s5635_s3 = scalar_select %p39_p7, %s5332_s15, %s41_s24  }
  0xc1   : > { %p50_p3 = por %p49_p9, %p48_p8  ;;  %p5639_p11 = por %p5956_p10, %p54_p4 }
  0xc2   : > { %p5643_p6 = por %p351_p1, %p48_p8  ;;  %p357_p12 = scmp.eq.s32.totalorder %s4017_s25, 1 }
  0xc3   : > { %p4542_p13 = scmp.lt.s32.totalorder %s5336_s16, 2  ;;  %s480_s9 = sand.u32 1, %s5332_s15  }
  0xc4   : > { %s5958_s18 = scalar_select %p5643_p6, 1, 0 }
  0xc5   : > { %p5649_p0 = por %p357_p12, %p54_p4  ;;  %s4027_s14 = sshll.u32 %s480_s9, 4 }
  0xc6   : > { %s4439_s27 = sshll.u32 %s5336_s16, 8  ;;  %s484_s17 = scalar_lea.vmem [#allocation3], %s4027_s14 }
  0xc7   : > { %s5959_s8 = scalar_select %p5649_p0, 1, 0 }
  0xc8   : > { %s5657_s26 = scalar_lea.hbm %s5924_s0, %s4439_s27  ;;  %s492_s7 = sshll.u32 %s484_s17, 4  ;;  %s5663_s7 = int_to_ptr.vmem [resolvable:$true] %s492_s7 }
  0xc9   : > { %p5659_p2 = pnand %p4542_p13, %p50_p3  ;;  %s481_s22 = scalar_lea.sflag [#allocation4], %s480_s9 }
  0xca   : > { %s5224_s25 = scalar_lea.hbm %s5657_s26, 256  ;;  %s5229_s14 = scalar_lea.hbm %s5924_s0, 512 }
  0xcb   : > { %p5225_p5 = scmp.ne.s32.totalorder %s5657_s26, %s5224_s25  ;;  %p5226_p8 = pneg %p5659_p2 }
  0xcc   : > { %p5230_p4 = scmp.lt.u32.totalorder %s5657_s26, %s5924_s0  ;;  %p5231_p1 = scmp.lt.u32.totalorder %s5229_s14, %s5224_s25 }
  0xcd   : > { %p5227_p7 = pnand %p5226_p8, %p5225_p5  ;;  %p5233_p10 = scmp.lt.u32.totalorder %s5224_s25, %s5657_s26 }
  0xce   : > { %p5232_p3 = por %p5231_p1, %p5230_p4 }
  0xcf   : > { %p5228_p9 = pneg %p5227_p7 }
  0xd0   : > { %p5234_p12 = por %p5233_p10, %p5232_p3 }
  0xd2   : > { %p5235_p13 = pnand %p5234_p12, %p5228_p9 }
  0xd4   : > { %5238 = shalt.err (!%p5235_p13)
}
  0xd5   : > { %s5239_s9 = scalar_lea.vmem %s5663_s7, 256  ;;  %s5351_s23 = smov [#allocation3]  }
  0xd6   : > { %p5240_p5 = scmp.ne.s32.totalorder %s5663_s7, %s5239_s9  ;;  %s5244_s17 = sshll.u32 %s5351_s23, 4  ;;  %s5245_s17 = int_to_ptr.vmem [resolvable:$false] %s5244_s17 }
  0xd7   : > { %s5246_s24 = scalar_lea.vmem %s5245_s17, 512  ;;  %p5247_p6 = scmp.lt.s32.totalorder %s5663_s7, %s5245_s17 }
  0xd8   : > { %p5242_p7 = pnand %p5240_p5, %p5226_p8  ;;  %p5248_p4 = scmp.lt.s32.totalorder %s5246_s24, %s5239_s9 }
  0xda   : > { %p5243_p0 = pneg %p5242_p7  ;;  %p5249_p1 = por %p5248_p4, %p5247_p6 }
  0xdc   : > { %p5250_p3 = pnand %p5249_p1, %p5243_p0 }
  0xde   : > { %5253 = shalt.err (!%p5250_p3)
}
  0xdf   : > { %4530 = dma.hbm_to_vmem [thread:$0]  (!%p5659_p2), %s5657_s26, 256, %s5663_s7, %s481_s22  }
  0xe0   : > { %p5961_p9 = scmp.ne.s32.totalorder %s5951_s20, 0 }
  0xe1   : > { %s5693_s25 = sand.u32 (!%p5961_p9), 1, %s5328_s30  }
  0xe2   : > { %501 = sbr.rel (%p5961_p9) target bundleno = 2621 (0xa3d), region = 76  ;;  %s4031_s1 = sshll.u32 (!%p5961_p9), %s5693_s25, 4 }
  0xe3   : > { %s504_s14 = scalar_lea.sflag (!%p5961_p9), [#allocation4], %s5693_s25  ;;  %s5699_s27 = scalar_lea.vmem (!%p5961_p9), [#allocation3], %s4031_s1 }
  0xe9   : > { %5299 = dma.done.wait (%p5639_p11), %s504_s14, 256  }
  0xea   : > { %5301 = vsyncadd (%p5639_p11), %s504_s14, 4294967040  ;;  %p5962_p6 = scmp.eq.s32.totalorder %s5451_s19, 0 }
  0xec   : > { %5303 = dma.done.wait (%p5962_p6), [#allocation7], 160   ;;  %p5963_p0 = pmov %p5962_p6 }
  0xee   : > { %5305 = vsyncadd (%p5963_p0), [#allocation7], 4294967136  ;;  %p5964_p2 = pmov %p5963_p0 }
  0xef   : > { %p5965_p8 = pmov %p5963_p0 }
  0xf0   : > { %5307 = dma.done.wait (%p5964_p2), [#allocation10], 12320  }
  0xf1   : > { %5309 = vsyncadd (%p5965_p8), [#allocation10], 4294954976  ;;  %p5966_p10 = pmov %p5963_p0 }
  0xf2   : > { %p5967_p12 = pmov %p5963_p0 }
  0xf3   : > { %5311 = dma.done.wait (%p5966_p10), [#allocation13], 20480  }
  0xf4   : > { %5313 = vsyncadd (%p5967_p12), [#allocation13], 4294946816  ;;  %p5968_p11 = pmov %p5963_p0 }
  0xf5   : > { %p5969_p13 = pmov %p5963_p0 }
  0xf6   : > { %5315 = dma.done.wait (%p5968_p11), [#allocation16], 16384  }
  0xf7   : > { %5317 = vsyncadd (%p5969_p13), [#allocation16], 4294950912  ;;  %v5722_v0 = vld [vmem:[%s5699_s27] sm:$0xff]  ;;  %v5725_v1 = vld [vmem:[%s5699_s27 + $0x8] sm:$0xff]  ;;  %vm5353_vm0 = vmmov 0   ;;  %vm1423_vm1 = vcmask 1043456  }
  0xf8   : > { %v586_v2 = vadd.f32 %v5725_v1, %v5722_v0  ;;  %v4598_v3 = vld [vmem:[#allocation11 + $0x4] ss:$24 sps:$4 sm:$0xff]   ;;  %v4600_v4 = vld [vmem:[#allocation11] ss:$24 sps:$4 sm:$0xff]   ;;  %v4604_v7 = vld [vmem:[#allocation11 + $0x34] ss:$24 sps:$4 sm:$0xff]  }
  0xf9   : > { %v4601_v5 = vld [vmem:[#allocation11 + $0xc] ss:$24 sps:$4 sm:$0xff]   ;;  %v4603_v6 = vld [vmem:[#allocation11 + $0x8] ss:$24 sps:$4 sm:$0xff]   ;;  %1239 = vmatprep.subr.bf16.mxu0 %v4598_v3  ;;  %v4607_v8 = vld [vmem:[#allocation11 + $0x3c] ss:$24 sps:$4 sm:$0xff]  }
  0xfa   : > { %587 = vadd.xlane.f32.xlu0 %v586_v2  ;;  %1280 = vmatprep.subr.bf16.mxu1 %v4601_v5  ;;  %v4606_v9 = vld [vmem:[#allocation11 + $0x30] ss:$24 sps:$4 sm:$0xff]   ;;  %v4610_v11 = vld [vmem:[#allocation11 + $0x64] ss:$24 sps:$4 sm:$0xff]   ;;  %v4612_v13 = vld [vmem:[#allocation11 + $0x60] ss:$24 sps:$4 sm:$0xff]  }
  0xfb   : > { %1240 = vmatpush1.bf16.msra.mxu0 %v4600_v4  ;;  %1281 = vmatpush1.bf16.msra.mxu1 %v4603_v6  ;;  %v4609_v10 = vld [vmem:[#allocation11 + $0x38] ss:$24 sps:$4 sm:$0xff]   ;;  %v4613_v12 = vld [vmem:[#allocation11 + $0x6c] ss:$24 sps:$4 sm:$0xff]   ;;  %v4615_v14 = vld [vmem:[#allocation11 + $0x68] ss:$24 sps:$4 sm:$0xff]  }
  0xfc   : > { %1241 = vmatprep.subr.bf16.mxu0 %v4604_v7  ;;  %1282 = vmatprep.subr.bf16.mxu1 %v4607_v8  ;;  %v4616_v15 = vld [vmem:[#allocation11 + $0x94] ss:$24 sps:$4 sm:$0xff]   ;;  %v4618_v17 = vld [vmem:[#allocation11 + $0x90] ss:$24 sps:$4 sm:$0xff]   ;;  %v4622_v19 = vld [vmem:[#allocation11 + $0xc4] ss:$24 sps:$4 sm:$0xff]  }
  0xfd   : > { %v4619_v16 = vld [vmem:[#allocation11 + $0x9c] ss:$24 sps:$4 sm:$0xff]   ;;  %v4621_v18 = vld [vmem:[#allocation11 + $0x98] ss:$24 sps:$4 sm:$0xff]   ;;  %v4625_v20 = vld [vmem:[#allocation11 + $0xcc] ss:$24 sps:$4 sm:$0xff]  }
  0xfe   : > { %v4624_v21 = vld [vmem:[#allocation11 + $0xc0] ss:$24 sps:$4 sm:$0xff]   ;;  %v4628_v23 = vld [vmem:[#allocation11 + $0xf4] ss:$24 sps:$4 sm:$0xff]   ;;  %v4630_v25 = vld [vmem:[#allocation11 + $0xf0] ss:$24 sps:$4 sm:$0xff]  }
  0xff   : > { %1242 = vmatpush1.bf16.msra.mxu0 %v4606_v9  ;;  %1283 = vmatpush1.bf16.msra.mxu1 %v4609_v10  ;;  %v4627_v22 = vld [vmem:[#allocation11 + $0xc8] ss:$24 sps:$4 sm:$0xff]   ;;  %v4631_v24 = vld [vmem:[#allocation11 + $0xfc] ss:$24 sps:$4 sm:$0xff]   ;;  %v4633_v26 = vld [vmem:[#allocation11 + $0xf8] ss:$24 sps:$4 sm:$0xff]  }
 0x100   : > { %1243 = vmatprep.subr.bf16.mxu0 %v4610_v11  ;;  %1284 = vmatprep.subr.bf16.mxu1 %v4613_v12  ;;  %v4634_v27 = vld [vmem:[#allocation11 + $0x124] ss:$24 sps:$4 sm:$0xff]   ;;  %v4636_v29 = vld [vmem:[#allocation11 + $0x120] ss:$24 sps:$4 sm:$0xff]   ;;  %v4640_v31 = vld [vmem:[#allocation11 + $0x154] ss:$24 sps:$4 sm:$0xff]  }
 0x101   : > { %v4637_v28 = vld [vmem:[#allocation11 + $0x12c] ss:$24 sps:$4 sm:$0xff]   ;;  %v4639_v30 = vld [vmem:[#allocation11 + $0x128] ss:$24 sps:$4 sm:$0xff]   ;;  %v4643_v32 = vld [vmem:[#allocation11 + $0x15c] ss:$24 sps:$4 sm:$0xff]  }
 0x102   : > { %v4642_v33 = vld [vmem:[#allocation11 + $0x150] ss:$24 sps:$4 sm:$0xff]   ;;  %v4646_v35 = vld [vmem:[#allocation11 + $0x184] ss:$24 sps:$4 sm:$0xff]   ;;  %v4648_v37 = vld [vmem:[#allocation11 + $0x180] ss:$24 sps:$4 sm:$0xff]  }
 0x103   : > { %1244 = vmatpush1.bf16.msra.mxu0 %v4612_v13  ;;  %1285 = vmatpush1.bf16.msra.mxu1 %v4615_v14  ;;  %v4645_v34 = vld [vmem:[#allocation11 + $0x158] ss:$24 sps:$4 sm:$0xff]   ;;  %v4649_v36 = vld [vmem:[#allocation11 + $0x18c] ss:$24 sps:$4 sm:$0xff]   ;;  %v4651_v38 = vld [vmem:[#allocation11 + $0x188] ss:$24 sps:$4 sm:$0xff]   ;;  %v604_v13 = vlaneseq }
 0x104   : > { %1245 = vmatprep.subr.bf16.mxu0 %v4616_v15  ;;  %1286 = vmatprep.subr.bf16.mxu1 %v4619_v16  ;;  %v4652_v39 = vld [vmem:[#allocation11 + $0x1b4] ss:$24 sps:$4 sm:$0xff]   ;;  %v4654_v41 = vld [vmem:[#allocation11 + $0x1b0] ss:$24 sps:$4 sm:$0xff]   ;;  %v4658_v43 = vld [vmem:[#allocation11 + $0x1e4] ss:$24 sps:$4 sm:$0xff]  }
 0x105   : > { %v4655_v40 = vld [vmem:[#allocation11 + $0x1bc] ss:$24 sps:$4 sm:$0xff]   ;;  %v4657_v42 = vld [vmem:[#allocation11 + $0x1b8] ss:$24 sps:$4 sm:$0xff]   ;;  %v4661_v52 = vld [vmem:[#allocation11 + $0x1ec] ss:$24 sps:$4 sm:$0xff]  }
 0x106   : > { %v4660_v51 = vld [vmem:[#allocation11 + $0x1e0] ss:$24 sps:$4 sm:$0xff]   ;;  %v4664_v54 = vld [vmem:[#allocation11 + $0x214] ss:$24 sps:$4 sm:$0xff]   ;;  %v4666_v55 = vld [vmem:[#allocation11 + $0x210] ss:$24 sps:$4 sm:$0xff]  }
 0x107   : > { %1246 = vmatpush1.bf16.msra.mxu0 %v4618_v17  ;;  %1287 = vmatpush1.bf16.msra.mxu1 %v4621_v18  ;;  %v4663_v53 = vld [vmem:[#allocation11 + $0x1e8] ss:$24 sps:$4 sm:$0xff]   ;;  %v4667_v56 = vld [vmem:[#allocation11 + $0x21c] ss:$24 sps:$4 sm:$0xff]   ;;  %v4669_v57 = vld [vmem:[#allocation11 + $0x218] ss:$24 sps:$4 sm:$0xff]  }
 0x108   : > { %1247 = vmatprep.subr.bf16.mxu0 %v4622_v19  ;;  %1288 = vmatprep.subr.bf16.mxu1 %v4625_v20  ;;  %v4670_v58 = vld [vmem:[#allocation11 + $0x244] ss:$24 sps:$4 sm:$0xff]   ;;  %v4672_v59 = vld [vmem:[#allocation11 + $0x240] ss:$24 sps:$4 sm:$0xff]   ;;  %v4676_v62 = vld [vmem:[#allocation11 + $0x274] ss:$24 sps:$4 sm:$0xff]  }
 0x109   : > { %v4673_v60 = vld [vmem:[#allocation11 + $0x24c] ss:$24 sps:$4 sm:$0xff]   ;;  %v4675_v61 = vld [vmem:[#allocation11 + $0x248] ss:$24 sps:$4 sm:$0xff]   ;;  %v4679_v63 = vld [vmem:[#allocation11 + $0x27c] ss:$24 sps:$4 sm:$0xff]  }
 0x10a   : > { %v4682_v2 = vld [vmem:[#allocation11 + $0x2a4] ss:$24 sps:$4 sm:$0xff]   ;;  %v4684_v4 = vld [vmem:[#allocation11 + $0x2a0] ss:$24 sps:$4 sm:$0xff]   ;;  %v4688_v6 = vld [vmem:[#allocation11 + $0x2d4] ss:$24 sps:$4 sm:$0xff]  }
 0x10b   : > { %1248 = vmatpush1.bf16.msra.mxu0 %v4624_v21  ;;  %1289 = vmatpush1.bf16.msra.mxu1 %v4627_v22  ;;  %v4685_v3 = vld [vmem:[#allocation11 + $0x2ac] ss:$24 sps:$4 sm:$0xff]   ;;  %v4687_v5 = vld [vmem:[#allocation11 + $0x2a8] ss:$24 sps:$4 sm:$0xff]   ;;  %v4691_v7 = vld [vmem:[#allocation11 + $0x2dc] ss:$24 sps:$4 sm:$0xff]  }
 0x10c   : > { %1249 = vmatprep.subr.bf16.mxu0 %v4628_v23  ;;  %1290 = vmatprep.subr.bf16.mxu1 %v4631_v24  ;;  %v4690_v8 = vld [vmem:[#allocation11 + $0x2d0] ss:$24 sps:$4 sm:$0xff]   ;;  %v4696_v10 = vld [vmem:[#allocation11 + $0x14] ss:$24 sps:$4 sm:$0xff]   ;;  %v5739_v15 = vshrl.u32 %v604_v13, 7  ;;  %vm1407_vm2 = vcmask 64512  }
 0x10d   : > { %v4693_v9 = vld [vmem:[#allocation11 + $0x2d8] ss:$24 sps:$4 sm:$0xff]   ;;  %v584_v18 = vld [vmem:[#allocation8] sm:$0x3]  ;;  %v585_v19 = vld [vmem:[#allocation9] sm:$0x3] }
 0x10e   : > { %v5742_v16 = vsub.s32 1, %v5739_v15  ;;  %v5745_v17 = vsub.s32 0, %v5739_v15  ;;  %s5970_s13 = sld [smem:[#allocation26_spill]]  ;;  %s5971_s9 = sld [smem:[#allocation27_spill]] }
 0x10f   : > { %1250 = vmatpush1.bf16.msra.mxu0 %v4630_v25  ;;  %1291 = vmatpush1.bf16.msra.mxu1 %v4633_v26  ;;  %s5972_s24 = sld [smem:[#allocation28_spill]]  ;;  %s5973_s20 = sld [smem:[#allocation29_spill]] }
 0x110   : > { %1251 = vmatprep.subr.bf16.mxu0 %v4634_v27  ;;  %1292 = vmatprep.subr.bf16.mxu1 %v4637_v28  ;;  %v611_v20 = vrot.slane %v584_v18, %v5742_v16  ;;  %v607_v21 = vrot.slane %v584_v18, %v5745_v17  ;;  %v624_v24 = vrot.slane %v585_v19, %v5742_v16  ;;  %s5974_s7 = sld [smem:[#allocation30_spill]]  ;;  %s579_s22 = scalar_lea.vmem [#allocation17], %s4031_s1 }
 0x111   : > { %v620_v26 = vrot.slane %v585_v19, %v5745_v17  ;;  %s3880_s28 = sshll.u32 %s579_s22, 4  ;;  %s5975_s17 = sld [smem:[#allocation31_spill]]  ;;  %s5882_s28 = int_to_ptr.vmem [resolvable:$true] %s3880_s28 }
 0x112   : > { %s5254_s1 = scalar_lea.vmem %s5882_s28, 256  ;;  %p5976_p7 = scmp.ne.s32.totalorder %s5958_s18, 0 }
 0x113   : > { %1252 = vmatpush1.bf16.msra.mxu0 %v4636_v29  ;;  %1293 = vmatpush1.bf16.msra.mxu1 %v4639_v30  ;;  %p5255_p5 = scmp.ne.s32.totalorder %s5882_s28, %s5254_s1  ;;  %s5354_s14 = smov [#allocation17]  }
 0x114   : > { %1253 = vmatprep.subr.bf16.mxu0 %v4640_v31  ;;  %1294 = vmatprep.subr.bf16.mxu1 %v4643_v32  ;;  %v4694_v32 = vld [vmem:[#allocation11 + $0x10] ss:$24 sps:$4 sm:$0xff]  }
 0x115   : > { %p5256_p4 = pnand %p5255_p5, %p5976_p7 }
 0x117   : > { %1254 = vmatpush1.bf16.msra.mxu0 %v4642_v33  ;;  %1295 = vmatpush1.bf16.msra.mxu1 %v4645_v34  ;;  %v4699_v34 = vld [vmem:[#allocation11 + $0x44] ss:$24 sps:$4 sm:$0xff]   ;;  %p5257_p1 = pneg %p5256_p4 }
 0x118   : > { %1255 = vmatprep.subr.bf16.mxu0 %v4646_v35  ;;  %1296 = vmatprep.subr.bf16.mxu1 %v4649_v36  ;;  %v4697_v35 = vld [vmem:[#allocation11 + $0x40] ss:$24 sps:$4 sm:$0xff]   ;;  %v4702_v36 = vld [vmem:[#allocation11 + $0x74] ss:$24 sps:$4 sm:$0xff]  }
 0x11b   : > { %1256 = vmatpush1.bf16.msra.mxu0 %v4648_v37  ;;  %1297 = vmatpush1.bf16.msra.mxu1 %v4651_v38  ;;  %v4700_v37 = vld [vmem:[#allocation11 + $0x70] ss:$24 sps:$4 sm:$0xff]   ;;  %v4705_v38 = vld [vmem:[#allocation11 + $0xa4] ss:$24 sps:$4 sm:$0xff]  }
 0x11c   : > { %1257 = vmatprep.subr.bf16.mxu0 %v4652_v39  ;;  %1298 = vmatprep.subr.bf16.mxu1 %v4655_v40  ;;  %v4703_v39 = vld [vmem:[#allocation11 + $0xa0] ss:$24 sps:$4 sm:$0xff]   ;;  %v4708_v40 = vld [vmem:[#allocation11 + $0xd4] ss:$24 sps:$4 sm:$0xff]  }
 0x11f   : > { %1258 = vmatpush1.bf16.msra.mxu0 %v4654_v41  ;;  %1299 = vmatpush1.bf16.msra.mxu1 %v4657_v42  ;;  %v4706_v41 = vld [vmem:[#allocation11 + $0xd0] ss:$24 sps:$4 sm:$0xff]   ;;  %v4711_v42 = vld [vmem:[#allocation11 + $0x104] ss:$24 sps:$4 sm:$0xff]  }
 0x120   : > { %1259 = vmatprep.subr.bf16.mxu0 %v4658_v43  ;;  %1300 = vmatprep.subr.bf16.mxu1 %v4661_v52  ;;  %v4709_v43 = vld [vmem:[#allocation11 + $0x100] ss:$24 sps:$4 sm:$0xff]   ;;  %v4726_v52 = vld [vmem:[#allocation11 + $0x1f4] ss:$24 sps:$4 sm:$0xff]  }
 0x123   : > { %1260 = vmatpush1.bf16.msra.mxu0 %v4660_v51  ;;  %1301 = vmatpush1.bf16.msra.mxu1 %v4663_v53  ;;  %v4721_v51 = vld [vmem:[#allocation11 + $0x1c0] ss:$24 sps:$4 sm:$0xff]   ;;  %v4724_v53 = vld [vmem:[#allocation11 + $0x1f0] ss:$24 sps:$4 sm:$0xff]  }
 0x124   : > { %1261 = vmatprep.subr.bf16.mxu0 %v4664_v54  ;;  %1302 = vmatprep.subr.bf16.mxu1 %v4667_v56  ;;  %v4729_v54 = vld [vmem:[#allocation11 + $0x224] ss:$24 sps:$4 sm:$0xff]   ;;  %v4732_v56 = vld [vmem:[#allocation11 + $0x254] ss:$24 sps:$4 sm:$0xff]  }
 0x127   : > { %1262 = vmatpush1.bf16.msra.mxu0 %v4666_v55  ;;  %1303 = vmatpush1.bf16.msra.mxu1 %v4669_v57  ;;  %v4727_v55 = vld [vmem:[#allocation11 + $0x220] ss:$24 sps:$4 sm:$0xff]   ;;  %v4730_v57 = vld [vmem:[#allocation11 + $0x250] ss:$24 sps:$4 sm:$0xff]  }
 0x128   : > { %1263 = vmatprep.subr.bf16.mxu0 %v4670_v58  ;;  %1304 = vmatprep.subr.bf16.mxu1 %v4673_v60  ;;  %v4735_v58 = vld [vmem:[#allocation11 + $0x284] ss:$24 sps:$4 sm:$0xff]   ;;  %v4738_v60 = vld [vmem:[#allocation11 + $0x2b4] ss:$24 sps:$4 sm:$0xff]  }
 0x12b   : > { %1264 = vmatpush1.bf16.msra.mxu0 %v4672_v59  ;;  %1305 = vmatpush1.bf16.msra.mxu1 %v4675_v61  ;;  %v4733_v59 = vld [vmem:[#allocation11 + $0x280] ss:$24 sps:$4 sm:$0xff]   ;;  %v4736_v61 = vld [vmem:[#allocation11 + $0x2b0] ss:$24 sps:$4 sm:$0xff]  }
 0x12c   : > { %1265 = vmatprep.subr.bf16.mxu0 %v4676_v62  ;;  %1306 = vmatprep.subr.bf16.mxu1 %v4679_v63  ;;  %v4741_v62 = vld [vmem:[#allocation11 + $0x2e4] ss:$24 sps:$4 sm:$0xff]   ;;  %v4739_v63 = vld [vmem:[#allocation11 + $0x2e0] ss:$24 sps:$4 sm:$0xff]  }
 0x187   : > { %v588_v44 = vpop.xlane.xlu0 %587 }
 0x188   : > { %v590_v45 = vmul.f32 0.00390625, %v588_v44  ;;  %v4714_v44 = vld [vmem:[#allocation11 + $0x134] ss:$24 sps:$4 sm:$0xff]  }
 0x18a   : > { %v5730_v46 = vsub.f32 %v5722_v0, %v590_v45  ;;  %v5733_v47 = vsub.f32 %v5725_v1, %v590_v45  ;;  %v4678_v0 = vld [vmem:[#allocation11 + $0x270] ss:$24 sps:$4 sm:$0xff]  }
 0x18b   : > { %v4681_v1 = vld [vmem:[#allocation11 + $0x278] ss:$24 sps:$4 sm:$0xff]   ;;  %1266 = vmatpush1.bf16.msra.mxu0 %v4678_v0  ;;  %v5352_v0 = vmov 0.0  }
 0x18c   : > { %v593_v48 = vmul.f32 %v5730_v46, %v5730_v46  ;;  %v594_v49 = vmul.f32 %v5733_v47, %v5733_v47  ;;  %1307 = vmatpush1.bf16.msra.mxu1 %v4681_v1  ;;  %1267 = vmatprep.subr.bf16.mxu0 %v4682_v2  ;;  %v4712_v45 = vld [vmem:[#allocation11 + $0x130] ss:$24 sps:$4 sm:$0xff]   ;;  %v739_v1 = vsub.s32 2, %v5739_v15  ;;  %v727_v2 = vld [vmem:[%s5929_s5] sm:$0x3f] }
 0x18d   : > { %1308 = vmatprep.subr.bf16.mxu1 %v4685_v3  ;;  %v743_v3 = vsub.s32 3, %v5739_v15  ;;  %v736_v19 = vrot.slane %v727_v2, %v5742_v16 }
 0x18e   : > { %v595_v50 = vadd.f32 %v594_v49, %v593_v48  ;;  %v4720_v48 = vld [vmem:[#allocation11 + $0x194] ss:$24 sps:$4 sm:$0xff]   ;;  %v4718_v49 = vld [vmem:[#allocation11 + $0x190] ss:$24 sps:$4 sm:$0xff]  }
 0x18f   : > { %1268 = vmatpush1.bf16.msra.mxu0 %v4684_v4  ;;  %v740_v4 = vrot.slane %v727_v2, %v739_v1 }
 0x190   : > { %596 = vadd.xlane.f32.xlu0 %v595_v50  ;;  %1309 = vmatpush1.bf16.msra.mxu1 %v4687_v5  ;;  %v4723_v50 = vld [vmem:[#allocation11 + $0x1c4] ss:$24 sps:$4 sm:$0xff]   ;;  %v744_v5 = vrot.slane %v727_v2, %v743_v3 }
 0x191   : > { %1269 = vmatprep.subr.bf16.mxu0 %v4688_v6  ;;  %1310 = vmatprep.subr.bf16.mxu1 %v4691_v7 }
 0x193   : > { %1270 = vmatpush1.bf16.msra.mxu0 %v4690_v8 }
 0x194   : > { %1311 = vmatpush1.bf16.msra.mxu1 %v4693_v9  ;;  %1321 = vmatprep.subr.bf16.mxu0 %v4696_v10 }
 0x195   : > { %4461 = vmatprep.subr.bf16.mxu1 %v5352_v0 }
 0x21d   : > { %v597_v11 = vpop.xlane.xlu0 %596 }
 0x21e   : > { %v598_v12 = vmul.f32 0.00390625, %v597_v11  ;;  %v732_v11 = vrot.slane %v727_v2, %v5745_v17 }
 0x220   : > { %v599_v14 = vadd.f32 1e-05, %v598_v12 }
 0x222   : > { %4982 = vrsqrt.f32 %v599_v14 }
 0x22c   : > { %v4983_v22 = vpop.eup %4982 }
 0x22d   : > { %v602_v23 = vmul.f32 %v4983_v22, %v5733_v47  ;;  %v601_v25 = vmul.f32 %v4983_v22, %v5730_v46  ;;  %v4717_v46 = vld [vmem:[#allocation11 + $0x164] ss:$24 sps:$4 sm:$0xff]   ;;  %v4715_v47 = vld [vmem:[#allocation11 + $0x160] ss:$24 sps:$4 sm:$0xff]  }
 0x22f   : > { %v615_v27 = vmul.f32 %v611_v20, %v602_v23  ;;  %v614_v28 = vmul.f32 %v607_v21, %v601_v25 }
 0x231   : > { %v628_v29 = vadd.f32 %v624_v24, %v615_v27  ;;  %v627_v30 = vadd.f32 %v620_v26, %v614_v28  ;;  %v747_v27 = vsub.s32 4, %v5739_v15  ;;  %v751_v28 = vsub.s32 5, %v5739_v15 }
 0x233   : > { %v630_v31 = vpack.c.bf16 %v628_v29, %v628_v29  ;;  %v5753_v33 = vpack.c.bf16 %v627_v30, %v627_v30  ;;  %v748_v29 = vrot.slane %v727_v2, %v747_v27  ;;  %v752_v30 = vrot.slane %v727_v2, %v751_v28 }
 0x235   : > { %1271 = vmatprep.mubr.bf16.mxu0 %v630_v31  ;;  %1312 = vmatprep.mubr.bf16.mxu1 %v630_v31 }
 0x236   : > { %1272 = vmatmul.mubr.bf16.vlgmr.msra.gmra.mrb[0].mxu0 %v5753_v33  ;;  %1313 = vmatmul.mubr.bf16.vlgmr.msra.gmra.mrb[0].mxu1 %v5753_v33 }
 0x237   : > { %1322 = vmatpush1.bf16.msra.mxu0 %v4694_v32  ;;  %1353 = vmatprep.mubr.bf16.mxu0 %v630_v31 }
 0x238   : > { %1323 = vmatprep.subr.bf16.mxu0 %v4699_v34  ;;  %4463 = vmatprep.mubr.msk.bf16.mxu1 %vm5353_vm0, %v5352_v0 }
 0x23b   : > { %1324 = vmatpush1.bf16.msra.mxu0 %v4697_v35 }
 0x23c   : > { %1325 = vmatprep.subr.bf16.mxu0 %v4702_v36 }
 0x23f   : > { %1326 = vmatpush1.bf16.msra.mxu0 %v4700_v37 }
 0x240   : > { %1327 = vmatprep.subr.bf16.mxu0 %v4705_v38 }
 0x243   : > { %1328 = vmatpush1.bf16.msra.mxu0 %v4703_v39 }
 0x244   : > { %1329 = vmatprep.subr.bf16.mxu0 %v4708_v40 }
 0x247   : > { %1330 = vmatpush1.bf16.msra.mxu0 %v4706_v41 }
 0x248   : > { %1331 = vmatprep.subr.bf16.mxu0 %v4711_v42 }
 0x24b   : > { %1332 = vmatpush1.bf16.msra.mxu0 %v4709_v43 }
 0x24c   : > { %1333 = vmatprep.subr.bf16.mxu0 %v4714_v44  ;;  %v583_v44 = vld [vmem:[#allocation6] sm:$0xff] }
 0x24f   : > { %1334 = vmatpush1.bf16.msra.mxu0 %v4712_v45 }
 0x250   : > { %1335 = vmatprep.subr.bf16.mxu0 %v4717_v46 }
 0x253   : > { %1336 = vmatpush1.bf16.msra.mxu0 %v4715_v47 }
 0x254   : > { %1337 = vmatprep.subr.bf16.mxu0 %v4720_v48 }
 0x257   : > { %1338 = vmatpush1.bf16.msra.mxu0 %v4718_v49 }
 0x258   : > { %1339 = vmatprep.subr.bf16.mxu0 %v4723_v50 }
 0x25b   : > { %1340 = vmatpush1.bf16.msra.mxu0 %v4721_v51 }
 0x25c   : > { %1341 = vmatprep.subr.bf16.mxu0 %v4726_v52 }
 0x25f   : > { %1342 = vmatpush1.bf16.msra.mxu0 %v4724_v53 }
 0x260   : > { %1343 = vmatprep.subr.bf16.mxu0 %v4729_v54 }
 0x263   : > { %1344 = vmatpush1.bf16.msra.mxu0 %v4727_v55 }
 0x264   : > { %1345 = vmatprep.subr.bf16.mxu0 %v4732_v56 }
 0x267   : > { %1346 = vmatpush1.bf16.msra.mxu0 %v4730_v57 }
 0x268   : > { %1347 = vmatprep.subr.bf16.mxu0 %v4735_v58 }
 0x26b   : > { %1348 = vmatpush1.bf16.msra.mxu0 %v4733_v59 }
 0x26c   : > { %1349 = vmatprep.subr.bf16.mxu0 %v4738_v60 }
 0x26f   : > { %1350 = vmatpush1.bf16.msra.mxu0 %v4736_v61 }
 0x270   : > { %1351 = vmatprep.subr.bf16.mxu0 %v4741_v62 }
 0x273   : > { %1352 = vmatpush1.bf16.msra.mxu0 %v4739_v63 }
 0x274   : > { %4449 = vmatprep.subr.bf16.mxu0 %v5352_v0 }
 0x276   : > { %1354 = vmatmul.mubr.bf16.vlgmr.msra.gmra.mrb[4].mxu0 %v5753_v33 }
 0x277   : > { %4451 = vmatprep.mubr.msk.bf16.mxu0 %vm5353_vm0, %v5352_v0 }
 0x309   : > { %v1273_v6 = vpop.f32.mrb[0].mxu0  ;;  %v1314_v7 = vpop.f32.mrb[0].mxu1 }
 0x30a   : > { %v1315_v8 = vadd.f32 %v1314_v7, %v740_v4  ;;  %v1275_v9 = vpop.f32.mrb[1].mxu0  ;;  %v1316_v10 = vpop.f32.mrb[1].mxu1  ;;  %v1274_v23 = vadd.f32 %v1273_v6, %v732_v11  ;;  %v4744_v4 = vld [vmem:[#allocation12 + $0x4] ss:$8 sps:$4 sm:$0xff]   ;;  %v4747_v11 = vld [vmem:[#allocation12 + $0x14] ss:$8 sps:$4 sm:$0xff]  }
 0x30b   : > { %v1317_v12 = vadd.f32 %v1316_v10, %v744_v5  ;;  %v1277_v13 = vpop.f32.mrb[2].mxu0  ;;  %v1318_v14 = vpop.f32.mrb[2].mxu1  ;;  %v1276_v24 = vadd.f32 %v1275_v9, %v736_v19  ;;  %v4742_v9 = vld [vmem:[#allocation12] ss:$8 sps:$4 sm:$0xff]   ;;  %v4750_v19 = vld [vmem:[#allocation12 + $0x24] ss:$8 sps:$4 sm:$0xff]  }
 0x30c   : > { %v1363_v18 = vpack.c.bf16 %v1315_v8, %v1315_v8  ;;  %v1278_v20 = vpop.f32.mrb[3].mxu0  ;;  %v1319_v21 = vpop.f32.mrb[3].mxu1  ;;  %v1362_v25 = vpack.c.bf16 %v1274_v23, %v1274_v23  ;;  %v4745_v14 = vld [vmem:[#allocation12 + $0x10] ss:$8 sps:$4 sm:$0xff]   ;;  %v4756_v23 = vld [vmem:[#allocation12 + $0x44] ss:$8 sps:$4 sm:$0xff]  }
 0x30d   : > { %v1469_v22 = vpack.c.bf16 %v1317_v12, %v1317_v12  ;;  %v1468_v26 = vpack.c.bf16 %v1276_v24, %v1276_v24  ;;  %v4748_v20 = vld [vmem:[#allocation12 + $0x20] ss:$8 sps:$4 sm:$0xff]   ;;  %v4753_v21 = vld [vmem:[#allocation12 + $0x34] ss:$8 sps:$4 sm:$0xff]  }
 0x30e   : > { %4450 = vmatpush3.bf16.xpose.msra.mxu0 %v1363_v18  ;;  %v4754_v24 = vld [vmem:[#allocation12 + $0x40] ss:$8 sps:$4 sm:$0xff]  }
 0x30f   : > { %4462 = vmatpush3.bf16.xpose.msra.mxu1 %v1469_v22  ;;  %4455 = vmatprep.subr.bf16.mxu0 %v5352_v0  ;;  %v4751_v22 = vld [vmem:[#allocation12 + $0x30] ss:$8 sps:$4 sm:$0xff]  }
 0x310   : > { %4467 = vmatprep.subr.bf16.mxu1 %v5352_v0 }
 0x315   : > { %4452 = vmatmul.mubr.bf16.vlgmr.msra.gmra.mrb[8].mxu0 %v1362_v25  ;;  %v4759_v25 = vld [vmem:[#allocation12 + $0x54] ss:$8 sps:$4 sm:$0xff]  }
 0x316   : > { %4464 = vmatmul.mubr.bf16.vlgmr.msra.gmra.mrb[4].mxu1 %v1468_v26  ;;  %4457 = vmatprep.mubr.msk.bf16.mxu0 %vm5353_vm0, %v5352_v0  ;;  %v4757_v26 = vld [vmem:[#allocation12 + $0x50] ss:$8 sps:$4 sm:$0xff]  }
 0x317   : > { %4469 = vmatprep.mubr.msk.bf16.mxu1 %vm5353_vm0, %v5352_v0 }
 0x349   : > { %v1355_v31 = vpop.f32.mrb[4].mxu0 }
 0x34a   : > { %v1356_v32 = vadd.f32 %v1355_v31, %v748_v29  ;;  %v1357_v33 = vpop.f32.mrb[5].mxu0  ;;  %v4762_v29 = vld [vmem:[#allocation12 + $0x64] ss:$8 sps:$4 sm:$0xff]   ;;  %v4765_v31 = vld [vmem:[#allocation12 + $0x74] ss:$8 sps:$4 sm:$0xff]  }
 0x34b   : > { %v1358_v34 = vadd.f32 %v1357_v33, %v752_v30  ;;  %v1359_v35 = vpop.f32.mrb[6].mxu0  ;;  %v4760_v30 = vld [vmem:[#allocation12 + $0x60] ss:$8 sps:$4 sm:$0xff]   ;;  %v4768_v33 = vld [vmem:[#allocation12 + $0x84] ss:$8 sps:$4 sm:$0xff]  }
 0x34c   : > { %v1364_v36 = vpack.c.bf16 %v1356_v32, %v1356_v32  ;;  %v1360_v37 = vpop.f32.mrb[7].mxu0  ;;  %v4763_v32 = vld [vmem:[#allocation12 + $0x70] ss:$8 sps:$4 sm:$0xff]   ;;  %v4771_v35 = vld [vmem:[#allocation12 + $0x94] ss:$8 sps:$4 sm:$0xff]  }
 0x34d   : > { %v1470_v38 = vpack.c.bf16 %v1358_v34, %v1358_v34  ;;  %v4766_v34 = vld [vmem:[#allocation12 + $0x80] ss:$8 sps:$4 sm:$0xff]   ;;  %v4774_v37 = vld [vmem:[#allocation12 + $0xa4] ss:$8 sps:$4 sm:$0xff]  }
 0x34e   : > { %v1425_v39 = vsel %vm1423_vm1, %v1364_v36, 0  ;;  %v4769_v36 = vld [vmem:[#allocation12 + $0x90] ss:$8 sps:$4 sm:$0xff]  }
 0x34f   : > { %v1529_v40 = vsel %vm1423_vm1, %v1470_v38, 0  ;;  %4456 = vmatpush3.bf16.msra.mxu0 %v1425_v39  ;;  %v4772_v38 = vld [vmem:[#allocation12 + $0xa0] ss:$8 sps:$4 sm:$0xff]   ;;  %v4777_v39 = vld [vmem:[#allocation12 + $0xb4] ss:$8 sps:$4 sm:$0xff]  }
 0x350   : > { %4468 = vmatpush3.bf16.msra.mxu1 %v1529_v40  ;;  %v4775_v40 = vld [vmem:[#allocation12 + $0xb0] ss:$8 sps:$4 sm:$0xff]  }
 0x351   : > { %1768 = vmatprep.subr.bf16.mxu1 %v4744_v4  ;;  %v5027_v4 = vld [vmem:[%s5699_s27 + $0x8] sm:$0xff] }
 0x3e8   : > { %v1399_v41 = vpop.f32.mrb[8].mxu0 }
 0x3e9   : > { %v4453_v42 = vpop.f32.mrb[9].mxu0  ;;  %v1505_v43 = vpop.f32.mrb[4].mxu1  ;;  %v1405_v45 = vmul.f32 0.088388346, %v1399_v41  ;;  %v4780_v41 = vld [vmem:[#allocation12 + $0xc4] ss:$8 sps:$4 sm:$0xff]  }
 0x3ea   : > { %v1511_v46 = vmul.f32 0.088388346, %v1505_v43  ;;  %v1402_v47 = vpop.f32.mrb[10].mxu0  ;;  %v4465_v48 = vpop.f32.mrb[5].mxu1  ;;  %v4778_v42 = vld [vmem:[#allocation12 + $0xc0] ss:$8 sps:$4 sm:$0xff]  }
 0x3eb   : > { %v4454_v49 = vpop.f32.mrb[11].mxu0  ;;  %v1508_v50 = vpop.f32.mrb[6].mxu1  ;;  %v1406_v54 = vadd.f32 %v1405_v45, %v583_v44  ;;  %v4783_v43 = vld [vmem:[#allocation12 + $0xd4] ss:$8 sps:$4 sm:$0xff]   ;;  %v4786_v45 = vld [vmem:[#allocation12 + $0xe4] ss:$8 sps:$4 sm:$0xff]  }
 0x3ec   : > { %v4466_v51 = vpop.f32.mrb[7].mxu1  ;;  %v1512_v52 = vadd.f32 %v1511_v46, %v583_v44  ;;  %v4781_v44 = vld [vmem:[#allocation12 + $0xd0] ss:$8 sps:$4 sm:$0xff]   ;;  %v4784_v46 = vld [vmem:[#allocation12 + $0xe0] ss:$8 sps:$4 sm:$0xff]  }
 0x3ed   : > { %v1408_v55 = vsel %vm1407_vm2, %v1406_v54, -inf  ;;  %v4789_v47 = vld [vmem:[#allocation12 + $0xf4] ss:$8 sps:$4 sm:$0xff]   ;;  %v4787_v48 = vld [vmem:[#allocation12 + $0xf0] ss:$8 sps:$4 sm:$0xff]  }
 0x3ee   : > { %v1513_v53 = vsel %vm1407_vm2, %v1512_v52, -inf }
 0x3ef   : > { %1514 = vmax.xlane.f32.xlu1 %v1513_v53 }
 0x3f3   : > { %1409 = vmax.xlane.f32.xlu1 %v1408_v55 }
 0x47c   : > { %v1515_v56 = vpop.xlane.xlu1 %1514 }
 0x47d   : > { %v1516_v57 = vsub.f32 %v1512_v52, %v1515_v56 }
 0x47f   : > { %v1517_v58 = vmul.f32 1.442695, %v1516_v57 }
 0x480   : > { %v1410_v59 = vpop.xlane.xlu1 %1409 }
 0x481   : > { %4984 = vpow2.f32 %v1517_v58  ;;  %v1411_v60 = vsub.f32 %v1406_v54, %v1410_v59  ;;  %v1811_v59 = vld [vmem:[%s5970_s13] sm:$0x3]  ;;  %s4440_s13 = sshll.u32 %s5451_s19, 8  ;;  %s3866_s19 = scalar_lea.sflag [#allocation5], %s5693_s25 }
 0x483   : > { %v1412_v61 = vmul.f32 1.442695, %v1411_v60  ;;  %v1816_v60 = vrot.slane %v1811_v59, %v5745_v17 }
 0x485   : > { %4986 = vpow2.f32 %v1412_v61 }
 0x48b   : > { %v4985_v62 = vpop.eup %4984 }
 0x48c   : > { %v1519_v63 = vsel %vm1407_vm2, %v4985_v62, 0.0 }
 0x48d   : > { %1520 = vadd.xlane.f32.xlu0 %v1519_v63  ;;  %v5026_v63 = vld [vmem:[%s5699_s27] sm:$0xff]  ;;  %s5258_s27 = sshll.u32 %s5354_s14, 4  ;;  %s5259_s27 = int_to_ptr.vmem [resolvable:$false] %s5258_s27 }
 0x48e   : > { %p5261_p3 = scmp.lt.s32.totalorder %s5882_s28, %s5259_s27 }
 0x48f   : > { %v4987_v0 = vpop.eup %4986 }
 0x490   : > { %v1414_v2 = vsel %vm1407_vm2, %v4987_v0, 0.0 }
 0x491   : > { %1415 = vadd.xlane.f32.xlu1 %v1414_v2 }
 0x51a   : > { %v1521_v5 = vpop.xlane.xlu0 %1520 }
 0x51b   : > { %4988 = vrcp.f32 %v1521_v5 }
 0x51e   : > { %v1416_v6 = vpop.xlane.xlu1 %1415 }
 0x51f   : > { %4990 = vrcp.f32 %v1416_v6 }
 0x525   : > { %v4989_v7 = vpop.eup %4988 }
 0x526   : > { %v1523_v8 = vmul.f32 %v4989_v7, %v4985_v62  ;;  %v1820_v62 = vrot.slane %v1811_v59, %v5742_v16 }
 0x528   : > { %v1524_v10 = vpack.c.bf16 %v1523_v8, %v1523_v8 }
 0x529   : > { %v4991_v12 = vpop.eup %4990 }
 0x52a   : > { %v1418_v13 = vmul.f32 %v4991_v12, %v4987_v0  ;;  %4470 = vmatmul.mubr.msk.bf16.vlgmr.msra.gmra.mrb[8].mxu1 %vm1407_vm2, %v1524_v10  ;;  %v1875_v12 = vld [vmem:[#allocation14 + $0x20] sm:$0xff] }
 0x52b   : > { %1769 = vmatpush1.bf16.msra.mxu1 %v4742_v9 }
 0x52c   : > { %v1419_v18 = vpack.c.bf16 %v1418_v13, %v1418_v13  ;;  %1770 = vmatprep.subr.bf16.mxu1 %v4747_v11  ;;  %v1871_v11 = vld [vmem:[#allocation14] sm:$0xff]  ;;  %v1872_v13 = vld [vmem:[#allocation14 + $0x8] sm:$0xff] }
 0x52e   : > { %4458 = vmatmul.mubr.msk.bf16.vlgmr.msra.gmra.mrb[12].mxu0 %vm1407_vm2, %v1419_v18  ;;  %v4171_v18 = vcombine.high %v1871_v11, %v1875_v12 }
 0x52f   : > { %1771 = vmatpush1.bf16.msra.mxu1 %v4745_v14  ;;  %v4170_v14 = vcombine.low %v1871_v11, %v1875_v12  ;;  %v1931_v11 = vld [vmem:[#allocation14 + $0x1e0] sm:$0xff]  ;;  %v1928_v12 = vld [vmem:[#allocation14 + $0x1c8] sm:$0xff] }
 0x530   : > { %1772 = vmatprep.subr.bf16.mxu1 %v4750_v19  ;;  %v1876_v19 = vld [vmem:[#allocation14 + $0x28] sm:$0xff]  ;;  %2681 = vmatprep.subr.bf16.mxu0 %v4171_v18 }
 0x531   : > { %2682 = vmatpush1.bf16.msra.mxu0 %v4170_v14 }
 0x533   : > { %1773 = vmatpush1.bf16.msra.mxu1 %v4748_v20  ;;  %v1879_v20 = vld [vmem:[#allocation14 + $0x40] sm:$0xff] }
 0x534   : > { %1774 = vmatprep.subr.bf16.mxu1 %v4753_v21  ;;  %v1883_v21 = vld [vmem:[#allocation14 + $0x60] sm:$0xff] }
 0x537   : > { %1775 = vmatpush1.bf16.msra.mxu1 %v4751_v22  ;;  %v4172_v22 = vcombine.low %v1872_v13, %v1876_v19 }
 0x538   : > { %1776 = vmatprep.subr.bf16.mxu1 %v4756_v23  ;;  %v4173_v23 = vcombine.high %v1872_v13, %v1876_v19  ;;  %v1932_v13 = vld [vmem:[#allocation14 + $0x1e8] sm:$0xff] }
 0x53b   : > { %1777 = vmatpush1.bf16.msra.mxu1 %v4754_v24  ;;  %v4179_v24 = vcombine.high %v1879_v20, %v1883_v21 }
 0x53c   : > { %1778 = vmatprep.subr.bf16.mxu1 %v4759_v25  ;;  %v1880_v25 = vld [vmem:[#allocation14 + $0x48] sm:$0xff] }
 0x53d   : > { %2683 = vmatprep.subr.bf16.mxu0 %v4179_v24  ;;  %v1940_v24 = vld [vmem:[#allocation14 + $0x228] sm:$0xff] }
 0x53f   : > { %1779 = vmatpush1.bf16.msra.mxu1 %v4757_v26  ;;  %v1884_v26 = vld [vmem:[#allocation14 + $0x68] sm:$0xff] }
 0x540   : > { %1780 = vmatprep.subr.bf16.mxu1 %v4762_v29  ;;  %v1887_v29 = vld [vmem:[#allocation14 + $0x80] sm:$0xff] }
 0x543   : > { %1781 = vmatpush1.bf16.msra.mxu1 %v4760_v30  ;;  %v4181_v30 = vcombine.high %v1880_v25, %v1884_v26 }
 0x544   : > { %1782 = vmatprep.subr.bf16.mxu1 %v4765_v31  ;;  %v1891_v31 = vld [vmem:[#allocation14 + $0xa0] sm:$0xff] }
 0x547   : > { %1783 = vmatpush1.bf16.msra.mxu1 %v4763_v32  ;;  %v1888_v32 = vld [vmem:[#allocation14 + $0x88] sm:$0xff] }
 0x548   : > { %1784 = vmatprep.subr.bf16.mxu1 %v4768_v33  ;;  %v1892_v33 = vld [vmem:[#allocation14 + $0xa8] sm:$0xff] }
 0x54b   : > { %1785 = vmatpush1.bf16.msra.mxu1 %v4766_v34  ;;  %v4178_v34 = vcombine.low %v1879_v20, %v1883_v21  ;;  %v4229_v20 = vcombine.high %v1928_v12, %v1932_v13  ;;  %v1935_v21 = vld [vmem:[#allocation14 + $0x200] sm:$0xff] }
 0x54c   : > { %1786 = vmatprep.subr.bf16.mxu1 %v4771_v35  ;;  %v4180_v35 = vcombine.low %v1880_v25, %v1884_v26  ;;  %v4228_v26 = vcombine.low %v1928_v12, %v1932_v13  ;;  %v1975_v12 = vld [vmem:[#allocation14 + $0x340] sm:$0xff] }
 0x54d   : > { %2684 = vmatpush1.bf16.msra.mxu0 %v4178_v34  ;;  %v1948_v34 = vld [vmem:[#allocation14 + $0x268] sm:$0xff]  ;;  %v1979_v13 = vld [vmem:[#allocation14 + $0x360] sm:$0xff] }
 0x54f   : > { %1787 = vmatpush1.bf16.msra.mxu1 %v4769_v36  ;;  %v4187_v36 = vcombine.high %v1887_v29, %v1891_v31 }
 0x550   : > { %1788 = vmatprep.subr.bf16.mxu1 %v4774_v37  ;;  %v4189_v37 = vcombine.high %v1888_v32, %v1892_v33 }
 0x551   : > { %2685 = vmatprep.subr.bf16.mxu0 %v4187_v36 }
 0x553   : > { %1789 = vmatpush1.bf16.msra.mxu1 %v4772_v38  ;;  %v1895_v38 = vld [vmem:[#allocation14 + $0xc0] sm:$0xff] }
 0x554   : > { %1790 = vmatprep.subr.bf16.mxu1 %v4777_v39  ;;  %v1899_v39 = vld [vmem:[#allocation14 + $0xe0] sm:$0xff] }
 0x557   : > { %1791 = vmatpush1.bf16.msra.mxu1 %v4775_v40  ;;  %v1896_v40 = vld [vmem:[#allocation14 + $0xc8] sm:$0xff] }
 0x558   : > { %1792 = vmatprep.subr.bf16.mxu1 %v4780_v41  ;;  %v1900_v41 = vld [vmem:[#allocation14 + $0xe8] sm:$0xff] }
 0x55b   : > { %1793 = vmatpush1.bf16.msra.mxu1 %v4778_v42  ;;  %v4186_v42 = vcombine.low %v1887_v29, %v1891_v31  ;;  %v1943_v31 = vld [vmem:[#allocation14 + $0x240] sm:$0xff] }
 0x55c   : > { %1794 = vmatprep.subr.bf16.mxu1 %v4783_v43  ;;  %v4188_v43 = vcombine.low %v1888_v32, %v1892_v33  ;;  %v1947_v32 = vld [vmem:[#allocation14 + $0x260] sm:$0xff]  ;;  %v1944_v33 = vld [vmem:[#allocation14 + $0x248] sm:$0xff] }
 0x55d   : > { %2686 = vmatpush1.bf16.msra.mxu0 %v4186_v42  ;;  %v1956_v42 = vld [vmem:[#allocation14 + $0x2a8] sm:$0xff] }
 0x55f   : > { %1795 = vmatpush1.bf16.msra.mxu1 %v4781_v44  ;;  %v4195_v44 = vcombine.high %v1895_v38, %v1899_v39 }
 0x560   : > { %1796 = vmatprep.subr.bf16.mxu1 %v4786_v45  ;;  %v4197_v45 = vcombine.high %v1896_v40, %v1900_v41 }
 0x561   : > { %2687 = vmatprep.subr.bf16.mxu0 %v4195_v44  ;;  %v4244_v44 = vcombine.low %v1944_v33, %v1948_v34 }
 0x563   : > { %1797 = vmatpush1.bf16.msra.mxu1 %v4784_v46  ;;  %v1903_v46 = vld [vmem:[#allocation14 + $0x100] sm:$0xff] }
 0x564   : > { %1798 = vmatprep.subr.bf16.mxu1 %v4789_v47  ;;  %v1907_v47 = vld [vmem:[#allocation14 + $0x120] sm:$0xff] }
 0x567   : > { %1799 = vmatpush1.bf16.msra.mxu1 %v4787_v48  ;;  %v1904_v48 = vld [vmem:[#allocation14 + $0x108] sm:$0xff] }
 0x568   : > { %2722 = vmatprep.subr.bf16.mxu1 %v4173_v23  ;;  %v1936_v23 = vld [vmem:[#allocation14 + $0x208] sm:$0xff] }
 0x569   : > { %v4236_v36 = vcombine.low %v1936_v23, %v1940_v24 }
 0x5fd   : > { %v1565_v49 = vpop.f32.mrb[8].mxu1 }
 0x5fe   : > { %v1575_v50 = vpack.c.bf16 %v1565_v49, %v1565_v49  ;;  %v4471_v51 = vpop.f32.mrb[9].mxu1  ;;  %v1908_v49 = vld [vmem:[#allocation14 + $0x128] sm:$0xff] }
 0x5ff   : > { %v1568_v52 = vpop.f32.mrb[10].mxu1  ;;  %v4196_v51 = vcombine.low %v1896_v40, %v1900_v41  ;;  %v4204_v59 = vcombine.low %v1904_v48, %v1908_v49  ;;  %v1955_v40 = vld [vmem:[#allocation14 + $0x2a0] sm:$0xff]  ;;  %v1952_v41 = vld [vmem:[#allocation14 + $0x288] sm:$0xff] }
 0x600   : > { %v4472_v53 = vpop.f32.mrb[11].mxu1  ;;  %1800 = vmatprep.mubr.bf16.mxu1 %v1575_v50  ;;  %v4194_v50 = vcombine.low %v1895_v38, %v1899_v39  ;;  %v4203_v52 = vcombine.high %v1903_v46, %v1907_v47  ;;  %v4245_v38 = vcombine.high %v1944_v33, %v1948_v34  ;;  %v1951_v39 = vld [vmem:[#allocation14 + $0x280] sm:$0xff] }
 0x601   : > { %v1461_v54 = vpop.f32.mrb[12].mxu0  ;;  %v4205_v53 = vcombine.high %v1904_v48, %v1908_v49  ;;  %v4252_v48 = vcombine.low %v1952_v41, %v1956_v42  ;;  %v1991_v33 = vld [vmem:[#allocation14 + $0x3c0] sm:$0xff] }
 0x602   : > { %v1574_v55 = vpack.c.bf16 %v1461_v54, %v1461_v54  ;;  %v4459_v56 = vpop.f32.mrb[13].mxu0  ;;  %v1911_v54 = vld [vmem:[#allocation14 + $0x140] sm:$0xff]  ;;  %2688 = vmatpush1.bf16.msra.mxu0 %v4194_v50 }
 0x603   : > { %v1464_v57 = vpop.f32.mrb[14].mxu0  ;;  %v1912_v56 = vld [vmem:[#allocation14 + $0x148] sm:$0xff]  ;;  %2689 = vmatprep.subr.bf16.mxu0 %v4203_v52  ;;  %v1995_v34 = vld [vmem:[#allocation14 + $0x3e0] sm:$0xff] }
 0x604   : > { %v4460_v58 = vpop.f32.mrb[15].mxu0  ;;  %1801 = vmatmul.mubr.bf16.vlgmr.msra.gmra.mrb[12].mxu1 %v1574_v55  ;;  %v1915_v55 = vld [vmem:[#allocation14 + $0x160] sm:$0xff]  ;;  %v1916_v57 = vld [vmem:[#allocation14 + $0x168] sm:$0xff] }
 0x605   : > { %2723 = vmatpush1.bf16.msra.mxu1 %v4172_v22  ;;  %v4202_v58 = vcombine.low %v1903_v46, %v1907_v47  ;;  %v1939_v22 = vld [vmem:[#allocation14 + $0x220] sm:$0xff]  ;;  %v4253_v46 = vcombine.high %v1952_v41, %v1956_v42  ;;  %v4250_v47 = vcombine.low %v1951_v39, %v1955_v40  ;;  %v1873_v41 = vld [vmem:[#allocation14 + $0x10] sm:$0xff] }
 0x606   : > { %2724 = vmatprep.subr.bf16.mxu1 %v4181_v30  ;;  %v4235_v29 = vcombine.high %v1935_v21, %v1939_v22  ;;  %v4237_v30 = vcombine.high %v1936_v23, %v1940_v24  ;;  %v1983_v23 = vld [vmem:[#allocation14 + $0x380] sm:$0xff]  ;;  %v1877_v42 = vld [vmem:[#allocation14 + $0x30] sm:$0xff] }
 0x607   : > { %2690 = vmatpush1.bf16.msra.mxu0 %v4202_v58  ;;  %v1960_v58 = vld [vmem:[#allocation14 + $0x2c8] sm:$0xff]  ;;  %v1987_v24 = vld [vmem:[#allocation14 + $0x3a0] sm:$0xff] }
 0x609   : > { %2725 = vmatpush1.bf16.msra.mxu1 %v4180_v35  ;;  %v4234_v35 = vcombine.low %v1935_v21, %v1939_v22 }
 0x60a   : > { %2726 = vmatprep.subr.bf16.mxu1 %v4189_v37  ;;  %v4243_v37 = vcombine.high %v1943_v31, %v1947_v32 }
 0x60d   : > { %2727 = vmatpush1.bf16.msra.mxu1 %v4188_v43  ;;  %v4242_v43 = vcombine.low %v1943_v31, %v1947_v32 }
 0x60e   : > { %2728 = vmatprep.subr.bf16.mxu1 %v4197_v45  ;;  %v4251_v45 = vcombine.high %v1951_v39, %v1955_v40 }
 0x611   : > { %2729 = vmatpush1.bf16.msra.mxu1 %v4196_v51 }
 0x612   : > { %2730 = vmatprep.subr.bf16.mxu1 %v4205_v53 }
 0x615   : > { %2731 = vmatpush1.bf16.msra.mxu1 %v4204_v59 }
 0x6d7   : > { %v1802_v61 = vpop.f32.mrb[12].mxu1 }
 0x6d8   : > { %v1809_v0 = vadd.f32 %v5026_v63, %v1802_v61  ;;  %v1804_v2 = vpop.f32.mrb[13].mxu1  ;;  %v4213_v61 = vcombine.high %v1912_v56, %v1916_v57  ;;  %v1923_v63 = vld [vmem:[#allocation14 + $0x1a0] sm:$0xff] }
 0x6d9   : > { %v1810_v5 = vadd.f32 %v5027_v4, %v1804_v2  ;;  %v1806_v6 = vpop.f32.mrb[14].mxu1  ;;  %v1924_v2 = vld [vmem:[#allocation14 + $0x1a8] sm:$0xff]  ;;  %v4210_v4 = vcombine.low %v1911_v54, %v1915_v55 }
 0x6da   : > { %v5792_v7 = vadd.f32 %v1816_v60, %v1809_v0  ;;  %v1807_v8 = vpop.f32.mrb[15].mxu1  ;;  %v4211_v60 = vcombine.high %v1911_v54, %v1915_v55  ;;  %v1920_v0 = vld [vmem:[#allocation14 + $0x188] sm:$0xff]  ;;  %2732 = vmatprep.subr.bf16.mxu1 %v4213_v61 }
 0x6db   : > { %v5794_v9 = vadd.f32 %v1820_v62, %v1810_v5  ;;  %v1919_v62 = vld [vmem:[#allocation14 + $0x180] sm:$0xff]  ;;  %v4212_v5 = vcombine.low %v1912_v56, %v1916_v57  ;;  %v4221_v8 = vcombine.high %v1920_v0, %v1924_v2  ;;  %v4220_v18 = vcombine.low %v1920_v0, %v1924_v2 }
 0x6dc   : > { %2691 = vmatprep.subr.bf16.mxu0 %v4211_v60  ;;  %v4219_v6 = vcombine.high %v1919_v62, %v1923_v63  ;;  %v4218_v14 = vcombine.low %v1919_v62, %v1923_v63  ;;  %v1959_v56 = vld [vmem:[#allocation14 + $0x2c0] sm:$0xff]  ;;  %v1964_v60 = vld [vmem:[#allocation14 + $0x2e8] sm:$0xff] }
 0x6dd   : > { %v1827_v10 = vadd.f32 %v5794_v9, %v5792_v7  ;;  %2692 = vmatpush1.bf16.msra.mxu0 %v4210_v4  ;;  %2733 = vmatpush1.bf16.msra.mxu1 %v4212_v5  ;;  %v1963_v57 = vld [vmem:[#allocation14 + $0x2e0] sm:$0xff]  ;;  %v4260_v62 = vcombine.low %v1960_v58, %v1964_v60  ;;  %v4261_v63 = vcombine.high %v1960_v58, %v1964_v60  ;;  %v1968_v4 = vld [vmem:[#allocation14 + $0x308] sm:$0xff] }
 0x6de   : > { %2693 = vmatprep.subr.bf16.mxu0 %v4219_v6  ;;  %2734 = vmatprep.subr.bf16.mxu1 %v4221_v8  ;;  %v4259_v59 = vcombine.high %v1959_v56, %v1963_v57  ;;  %v4258_v61 = vcombine.low %v1959_v56, %v1963_v57  ;;  %v1967_v0 = vld [vmem:[#allocation14 + $0x300] sm:$0xff]  ;;  %v1972_v6 = vld [vmem:[#allocation14 + $0x328] sm:$0xff] }
 0x6df   : > { %1828 = vadd.xlane.f32.xlu0 %v1827_v10  ;;  %v1927_v10 = vld [vmem:[#allocation14 + $0x1c0] sm:$0xff] }
 0x6e0   : > { %v4227_v19 = vcombine.high %v1927_v10, %v1931_v11  ;;  %v4226_v25 = vcombine.low %v1927_v10, %v1931_v11  ;;  %v1971_v2 = vld [vmem:[#allocation14 + $0x320] sm:$0xff]  ;;  %v4268_v10 = vcombine.low %v1968_v4, %v1972_v6  ;;  %v4269_v11 = vcombine.high %v1968_v4, %v1972_v6  ;;  %v1885_v6 = vld [vmem:[#allocation14 + $0x70] sm:$0xff] }
 0x6e1   : > { %2694 = vmatpush1.bf16.msra.mxu0 %v4218_v14  ;;  %2735 = vmatpush1.bf16.msra.mxu1 %v4220_v18  ;;  %v4267_v5 = vcombine.high %v1967_v0, %v1971_v2  ;;  %v4266_v8 = vcombine.low %v1967_v0, %v1971_v2  ;;  %v1976_v14 = vld [vmem:[#allocation14 + $0x348] sm:$0xff]  ;;  %v4275_v18 = vcombine.high %v1975_v12, %v1979_v13 }
 0x6e2   : > { %2695 = vmatprep.subr.bf16.mxu0 %v4227_v19  ;;  %2736 = vmatprep.subr.bf16.mxu1 %v4229_v20  ;;  %v1980_v19 = vld [vmem:[#allocation14 + $0x368] sm:$0xff]  ;;  %v4274_v20 = vcombine.low %v1975_v12, %v1979_v13  ;;  %v1889_v13 = vld [vmem:[#allocation14 + $0x90] sm:$0xff] }
 0x6e3   : > { %v4276_v21 = vcombine.low %v1976_v14, %v1980_v19  ;;  %v4277_v22 = vcombine.high %v1976_v14, %v1980_v19  ;;  %v1893_v14 = vld [vmem:[#allocation14 + $0xb0] sm:$0xff]  ;;  %v1894_v19 = vld [vmem:[#allocation14 + $0xb8] sm:$0xff] }
 0x6e5   : > { %2696 = vmatpush1.bf16.msra.mxu0 %v4226_v25  ;;  %2737 = vmatpush1.bf16.msra.mxu1 %v4228_v26  ;;  %v1984_v25 = vld [vmem:[#allocation14 + $0x388] sm:$0xff]  ;;  %v4283_v26 = vcombine.high %v1983_v23, %v1987_v24 }
 0x6e6   : > { %2697 = vmatprep.subr.bf16.mxu0 %v4235_v29  ;;  %2738 = vmatprep.subr.bf16.mxu1 %v4237_v30  ;;  %v1988_v29 = vld [vmem:[#allocation14 + $0x3a8] sm:$0xff]  ;;  %v4282_v30 = vcombine.low %v1983_v23, %v1987_v24  ;;  %v1897_v24 = vld [vmem:[#allocation14 + $0xd0] sm:$0xff] }
 0x6e7   : > { %v4284_v31 = vcombine.low %v1984_v25, %v1988_v29  ;;  %v4285_v32 = vcombine.high %v1984_v25, %v1988_v29  ;;  %v1901_v25 = vld [vmem:[#allocation14 + $0xf0] sm:$0xff]  ;;  %v1902_v29 = vld [vmem:[#allocation14 + $0xf8] sm:$0xff] }
 0x6e9   : > { %2698 = vmatpush1.bf16.msra.mxu0 %v4234_v35  ;;  %2739 = vmatpush1.bf16.msra.mxu1 %v4236_v36  ;;  %v1992_v35 = vld [vmem:[#allocation14 + $0x3c8] sm:$0xff]  ;;  %v4291_v36 = vcombine.high %v1991_v33, %v1995_v34 }
 0x6ea   : > { %2699 = vmatprep.subr.bf16.mxu0 %v4243_v37  ;;  %2740 = vmatprep.subr.bf16.mxu1 %v4245_v38  ;;  %v1996_v37 = vld [vmem:[#allocation14 + $0x3e8] sm:$0xff]  ;;  %v4290_v38 = vcombine.low %v1991_v33, %v1995_v34  ;;  %v1905_v34 = vld [vmem:[#allocation14 + $0x110] sm:$0xff] }
 0x6eb   : > { %v4293_v39 = vcombine.high %v1992_v35, %v1996_v37  ;;  %v4292_v40 = vcombine.low %v1992_v35, %v1996_v37  ;;  %v1909_v35 = vld [vmem:[#allocation14 + $0x130] sm:$0xff]  ;;  %v1910_v37 = vld [vmem:[#allocation14 + $0x138] sm:$0xff] }
 0x6ed   : > { %2700 = vmatpush1.bf16.msra.mxu0 %v4242_v43  ;;  %2741 = vmatpush1.bf16.msra.mxu1 %v4244_v44  ;;  %v1874_v43 = vld [vmem:[#allocation14 + $0x18] sm:$0xff]  ;;  %v4175_v44 = vcombine.high %v1873_v41, %v1877_v42 }
 0x6ee   : > { %2701 = vmatprep.subr.bf16.mxu0 %v4251_v45  ;;  %2742 = vmatprep.subr.bf16.mxu1 %v4253_v46  ;;  %v1878_v45 = vld [vmem:[#allocation14 + $0x38] sm:$0xff]  ;;  %v4174_v46 = vcombine.low %v1873_v41, %v1877_v42  ;;  %v1913_v42 = vld [vmem:[#allocation14 + $0x150] sm:$0xff] }
 0x6f1   : > { %2702 = vmatpush1.bf16.msra.mxu0 %v4250_v47  ;;  %2743 = vmatpush1.bf16.msra.mxu1 %v4252_v48  ;;  %v4176_v47 = vcombine.low %v1874_v43, %v1878_v45  ;;  %v4177_v48 = vcombine.high %v1874_v43, %v1878_v45  ;;  %v1917_v43 = vld [vmem:[#allocation14 + $0x170] sm:$0xff]  ;;  %v1918_v45 = vld [vmem:[#allocation14 + $0x178] sm:$0xff] }
 0x6f2   : > { %2703 = vmatprep.subr.bf16.mxu0 %v4259_v59  ;;  %2744 = vmatprep.subr.bf16.mxu1 %v4261_v63 }
 0x6f5   : > { %2704 = vmatpush1.bf16.msra.mxu0 %v4258_v61  ;;  %2745 = vmatpush1.bf16.msra.mxu1 %v4260_v62 }
 0x6f6   : > { %2705 = vmatprep.subr.bf16.mxu0 %v4267_v5  ;;  %2746 = vmatprep.subr.bf16.mxu1 %v4269_v11  ;;  %v1881_v5 = vld [vmem:[#allocation14 + $0x50] sm:$0xff] }
 0x6f9   : > { %2706 = vmatpush1.bf16.msra.mxu0 %v4266_v8  ;;  %2747 = vmatpush1.bf16.msra.mxu1 %v4268_v10  ;;  %v1882_v8 = vld [vmem:[#allocation14 + $0x58] sm:$0xff] }
 0x6fa   : > { %2707 = vmatprep.subr.bf16.mxu0 %v4275_v18  ;;  %2748 = vmatprep.subr.bf16.mxu1 %v4277_v22  ;;  %v1886_v10 = vld [vmem:[#allocation14 + $0x78] sm:$0xff]  ;;  %v4191_v22 = vcombine.high %v1889_v13, %v1893_v14 }
 0x6fb   : > { %v1890_v18 = vld [vmem:[#allocation14 + $0x98] sm:$0xff] }
 0x6fc   : > { %v4193_v23 = vcombine.high %v1890_v18, %v1894_v19 }
 0x6fd   : > { %2708 = vmatpush1.bf16.msra.mxu0 %v4274_v20  ;;  %2749 = vmatpush1.bf16.msra.mxu1 %v4276_v21  ;;  %v4182_v20 = vcombine.low %v1881_v5, %v1885_v6  ;;  %v4184_v21 = vcombine.low %v1882_v8, %v1886_v10 }
 0x6fe   : > { %2709 = vmatprep.subr.bf16.mxu0 %v4283_v26  ;;  %2750 = vmatprep.subr.bf16.mxu1 %v4285_v32  ;;  %v1898_v26 = vld [vmem:[#allocation14 + $0xd8] sm:$0xff]  ;;  %v4199_v32 = vcombine.high %v1897_v24, %v1901_v25 }
 0x6ff   : > { %v4201_v33 = vcombine.high %v1898_v26, %v1902_v29 }
 0x701   : > { %2710 = vmatpush1.bf16.msra.mxu0 %v4282_v30  ;;  %2751 = vmatpush1.bf16.msra.mxu1 %v4284_v31  ;;  %v4190_v30 = vcombine.low %v1889_v13, %v1893_v14  ;;  %v4192_v31 = vcombine.low %v1890_v18, %v1894_v19  ;;  %v1945_v18 = vld [vmem:[#allocation14 + $0x250] sm:$0xff] }
 0x702   : > { %2711 = vmatprep.subr.bf16.mxu0 %v4291_v36  ;;  %2752 = vmatprep.subr.bf16.mxu1 %v4293_v39  ;;  %v1906_v36 = vld [vmem:[#allocation14 + $0x118] sm:$0xff]  ;;  %v4200_v39 = vcombine.low %v1898_v26, %v1902_v29  ;;  %v1949_v19 = vld [vmem:[#allocation14 + $0x270] sm:$0xff] }
 0x703   : > { %v4209_v41 = vcombine.high %v1906_v36, %v1910_v37  ;;  %v1953_v26 = vld [vmem:[#allocation14 + $0x290] sm:$0xff] }
 0x704   : > { %v1957_v29 = vld [vmem:[#allocation14 + $0x2b0] sm:$0xff] }
 0x705   : > { %2712 = vmatpush1.bf16.msra.mxu0 %v4290_v38  ;;  %2753 = vmatpush1.bf16.msra.mxu1 %v4292_v40  ;;  %v4198_v38 = vcombine.low %v1897_v24, %v1901_v25  ;;  %v4207_v40 = vcombine.high %v1905_v34, %v1909_v35  ;;  %v4247_v24 = vcombine.high %v1945_v18, %v1949_v19 }
 0x706   : > { %2763 = vmatprep.subr.bf16.mxu0 %v4175_v44  ;;  %2804 = vmatprep.subr.bf16.mxu1 %v4177_v48  ;;  %v1914_v44 = vld [vmem:[#allocation14 + $0x158] sm:$0xff]  ;;  %v4215_v48 = vcombine.high %v1913_v42, %v1917_v43 }
 0x76c   : > { %v1829_v49 = vpop.xlane.xlu0 %1828 }
 0x76d   : > { %v1830_v50 = vmul.f32 0.00390625, %v1829_v49 }
 0x76f   : > { %v5799_v51 = vsub.f32 %v5792_v7, %v1830_v50  ;;  %v5802_v52 = vsub.f32 %v5794_v9, %v1830_v50 }
 0x771   : > { %v1833_v53 = vmul.f32 %v5799_v51, %v5799_v51  ;;  %v1834_v54 = vmul.f32 %v5802_v52, %v5802_v52 }
 0x773   : > { %v1835_v55 = vadd.f32 %v1834_v54, %v1833_v53  ;;  %v1825_v54 = vld [vmem:[%s5971_s9] sm:$0x3] }
 0x774   : > { %v1851_v56 = vrot.slane %v1825_v54, %v5742_v16  ;;  %v1847_v57 = vrot.slane %v1825_v54, %v5745_v17  ;;  %v1922_v54 = vld [vmem:[#allocation14 + $0x198] sm:$0xff] }
 0x775   : > { %1836 = vadd.xlane.f32.xlu1 %v1835_v55  ;;  %v1826_v55 = vld [vmem:[%s5972_s24] sm:$0x3]  ;;  %s5880_s24 = scalar_lea.hbm %s5975_s17, %s4440_s13 }
 0x776   : > { %v1864_v61 = vrot.slane %v1826_v55, %v5742_v16  ;;  %v1860_v62 = vrot.slane %v1826_v55, %v5745_v17  ;;  %v1926_v55 = vld [vmem:[#allocation14 + $0x1b8] sm:$0xff] }
 0x802   : > { %v1837_v49 = vpop.xlane.xlu1 %1836 }
 0x803   : > { %v1838_v50 = vmul.f32 0.00390625, %v1837_v49  ;;  %v4217_v49 = vcombine.high %v1914_v44, %v1918_v45 }
 0x805   : > { %v1839_v53 = vadd.f32 1e-05, %v1838_v50  ;;  %v1921_v50 = vld [vmem:[#allocation14 + $0x190] sm:$0xff] }
 0x807   : > { %4992 = vrsqrt.f32 %v1839_v53  ;;  %v1925_v53 = vld [vmem:[#allocation14 + $0x1b0] sm:$0xff] }
 0x811   : > { %v4993_v58 = vpop.eup %4992 }
 0x812   : > { %v1841_v59 = vmul.f32 %v4993_v58, %v5799_v51  ;;  %v1842_v60 = vmul.f32 %v4993_v58, %v5802_v52  ;;  %v4183_v51 = vcombine.high %v1881_v5, %v1885_v6  ;;  %v4185_v52 = vcombine.high %v1882_v8, %v1886_v10  ;;  %v1937_v6 = vld [vmem:[#allocation14 + $0x210] sm:$0xff]  ;;  %v1938_v10 = vld [vmem:[#allocation14 + $0x218] sm:$0xff] }
 0x813   : > { %v4223_v58 = vcombine.high %v1921_v50, %v1925_v53  ;;  %v1941_v8 = vld [vmem:[#allocation14 + $0x230] sm:$0xff] }
 0x814   : > { %v1855_v63 = vmul.f32 %v1851_v56, %v1842_v60  ;;  %v1854_v0 = vmul.f32 %v1847_v57, %v1841_v59  ;;  %v4214_v56 = vcombine.low %v1913_v42, %v1917_v43  ;;  %v4216_v57 = vcombine.low %v1914_v44, %v1918_v45  ;;  %v1929_v60 = vld [vmem:[#allocation14 + $0x1d0] sm:$0xff] }
 0x815   : > { %v4225_v59 = vcombine.high %v1922_v54, %v1926_v55  ;;  %v1969_v44 = vld [vmem:[#allocation14 + $0x310] sm:$0xff] }
 0x816   : > { %v1868_v2 = vadd.f32 %v1864_v61, %v1855_v63  ;;  %v1867_v4 = vadd.f32 %v1860_v62, %v1854_v0  ;;  %v1933_v61 = vld [vmem:[#allocation14 + $0x1f0] sm:$0xff]  ;;  %v1930_v62 = vld [vmem:[#allocation14 + $0x1d8] sm:$0xff]  ;;  %v4222_v0 = vcombine.low %v1921_v50, %v1925_v53 }
 0x817   : > { %v1934_v63 = vld [vmem:[#allocation14 + $0x1f8] sm:$0xff]  ;;  %v4230_v13 = vcombine.low %v1929_v60, %v1933_v61  ;;  %v1973_v45 = vld [vmem:[#allocation14 + $0x330] sm:$0xff] }
 0x818   : > { %v1870_v11 = vpack.c.bf16 %v1868_v2, %v1868_v2  ;;  %v5820_v12 = vpack.c.bf16 %v1867_v4, %v1867_v4  ;;  %v4224_v2 = vcombine.low %v1922_v54, %v1926_v55  ;;  %v4231_v4 = vcombine.high %v1929_v60, %v1933_v61  ;;  %v1977_v54 = vld [vmem:[#allocation14 + $0x350] sm:$0xff] }
 0x819   : > { %v4233_v5 = vcombine.high %v1930_v62, %v1934_v63  ;;  %v4271_v50 = vcombine.high %v1969_v44, %v1973_v45  ;;  %v1981_v55 = vld [vmem:[#allocation14 + $0x370] sm:$0xff] }
 0x81a   : > { %2713 = vmatprep.mubr.bf16.mxu0 %v1870_v11  ;;  %2754 = vmatprep.mubr.bf16.mxu1 %v1870_v11  ;;  %v4279_v60 = vcombine.high %v1977_v54, %v1981_v55 }
 0x81b   : > { %2714 = vmatmul.mubr.bf16.vlgmr.msra.gmra.mrb[16].mxu0 %v5820_v12  ;;  %2755 = vmatmul.mubr.bf16.vlgmr.msra.gmra.mrb[16].mxu1 %v5820_v12 }
 0x81c   : > { %2764 = vmatpush1.bf16.msra.mxu0 %v4174_v46  ;;  %2805 = vmatpush1.bf16.msra.mxu1 %v4176_v47  ;;  %v4206_v46 = vcombine.low %v1905_v34, %v1909_v35  ;;  %v4208_v47 = vcombine.low %v1906_v36, %v1910_v37  ;;  %v4255_v34 = vcombine.high %v1953_v26, %v1957_v29  ;;  %v1961_v36 = vld [vmem:[#allocation14 + $0x2d0] sm:$0xff] }
 0x81d   : > { %2795 = vmatprep.mubr.bf16.mxu0 %v1870_v11  ;;  %2836 = vmatprep.mubr.bf16.mxu1 %v1870_v11  ;;  %v1942_v11 = vld [vmem:[#allocation14 + $0x238] sm:$0xff]  ;;  %v1965_v37 = vld [vmem:[#allocation14 + $0x2f0] sm:$0xff] }
 0x81e   : > { %2765 = vmatprep.subr.bf16.mxu0 %v4183_v51  ;;  %2806 = vmatprep.subr.bf16.mxu1 %v4185_v52  ;;  %v4232_v51 = vcombine.low %v1930_v62, %v1934_v63  ;;  %v4239_v52 = vcombine.high %v1937_v6, %v1941_v8  ;;  %v4241_v14 = vcombine.high %v1938_v10, %v1942_v11  ;;  %v1985_v62 = vld [vmem:[#allocation14 + $0x390] sm:$0xff] }
 0x81f   : > { %v4263_v42 = vcombine.high %v1961_v36, %v1965_v37  ;;  %v1989_v63 = vld [vmem:[#allocation14 + $0x3b0] sm:$0xff] }
 0x820   : > { %2766 = vmatpush1.bf16.msra.mxu0 %v4182_v20  ;;  %2807 = vmatpush1.bf16.msra.mxu1 %v4184_v21  ;;  %v1946_v20 = vld [vmem:[#allocation14 + $0x258] sm:$0xff] }
 0x821   : > { %2767 = vmatprep.subr.bf16.mxu0 %v4191_v22  ;;  %2808 = vmatprep.subr.bf16.mxu1 %v4193_v23  ;;  %v1950_v21 = vld [vmem:[#allocation14 + $0x278] sm:$0xff]  ;;  %v4238_v22 = vcombine.low %v1937_v6, %v1941_v8  ;;  %v4240_v23 = vcombine.low %v1938_v10, %v1942_v11  ;;  %v4287_v6 = vcombine.high %v1985_v62, %v1989_v63  ;;  %v1993_v10 = vld [vmem:[#allocation14 + $0x3d0] sm:$0xff] }
 0x822   : > { %v4249_v25 = vcombine.high %v1946_v20, %v1950_v21  ;;  %v1997_v11 = vld [vmem:[#allocation14 + $0x3f0] sm:$0xff] }
 0x824   : > { %2768 = vmatpush1.bf16.msra.mxu0 %v4190_v30  ;;  %2809 = vmatpush1.bf16.msra.mxu1 %v4192_v31  ;;  %v1954_v30 = vld [vmem:[#allocation14 + $0x298] sm:$0xff] }
 0x825   : > { %2769 = vmatprep.subr.bf16.mxu0 %v4199_v32  ;;  %2810 = vmatprep.subr.bf16.mxu1 %v4201_v33  ;;  %v1958_v31 = vld [vmem:[#allocation14 + $0x2b8] sm:$0xff]  ;;  %v4246_v32 = vcombine.low %v1945_v18, %v1949_v19  ;;  %v4248_v33 = vcombine.low %v1946_v20, %v1950_v21  ;;  %v4295_v18 = vcombine.high %v1993_v10, %v1997_v11 }
 0x826   : > { %v4257_v35 = vcombine.high %v1954_v30, %v1958_v31  ;;  %v4294_v20 = vcombine.low %v1993_v10, %v1997_v11  ;;  %v4861_v10 = vld [vmem:[#allocation15 + $0x1b4] ss:$8 sps:$4 sm:$0xff]   ;;  %v4856_v11 = vld [vmem:[#allocation15 + $0xb0] ss:$8 sps:$4 sm:$0xff]  }
 0x828   : > { %2770 = vmatpush1.bf16.msra.mxu0 %v4198_v38  ;;  %2811 = vmatpush1.bf16.msra.mxu1 %v4200_v39  ;;  %v1962_v38 = vld [vmem:[#allocation14 + $0x2d8] sm:$0xff] }
 0x829   : > { %2771 = vmatprep.subr.bf16.mxu0 %v4207_v40  ;;  %2812 = vmatprep.subr.bf16.mxu1 %v4209_v41  ;;  %v1966_v39 = vld [vmem:[#allocation14 + $0x2f8] sm:$0xff]  ;;  %v4254_v40 = vcombine.low %v1953_v26, %v1957_v29  ;;  %v4256_v41 = vcombine.low %v1954_v30, %v1958_v31 }
 0x82a   : > { %v4265_v43 = vcombine.high %v1962_v38, %v1966_v39  ;;  %v4798_v26 = vld [vmem:[#allocation15 + $0x14] ss:$8 sps:$4 sm:$0xff]   ;;  %v4796_v30 = vld [vmem:[#allocation15 + $0x10] ss:$8 sps:$4 sm:$0xff]  }
 0x82b   : > { %v4801_v29 = vld [vmem:[#allocation15 + $0x114] ss:$8 sps:$4 sm:$0xff]   ;;  %v4799_v31 = vld [vmem:[#allocation15 + $0x110] ss:$8 sps:$4 sm:$0xff]  }
 0x82c   : > { %2772 = vmatpush1.bf16.msra.mxu0 %v4206_v46  ;;  %2813 = vmatpush1.bf16.msra.mxu1 %v4208_v47  ;;  %v1970_v46 = vld [vmem:[#allocation14 + $0x318] sm:$0xff] }
 0x82d   : > { %2773 = vmatprep.subr.bf16.mxu0 %v4215_v48  ;;  %2814 = vmatprep.subr.bf16.mxu1 %v4217_v49  ;;  %v1974_v47 = vld [vmem:[#allocation14 + $0x338] sm:$0xff]  ;;  %v4262_v48 = vcombine.low %v1961_v36, %v1965_v37  ;;  %v4264_v49 = vcombine.low %v1962_v38, %v1966_v39  ;;  %v4816_v39 = vld [vmem:[#allocation15 + $0x44] ss:$8 sps:$4 sm:$0xff]  }
 0x82e   : > { %v4273_v53 = vcombine.high %v1970_v46, %v1974_v47  ;;  %v4810_v36 = vld [vmem:[#allocation15 + $0x34] ss:$8 sps:$4 sm:$0xff]   ;;  %v4808_v38 = vld [vmem:[#allocation15 + $0x30] ss:$8 sps:$4 sm:$0xff]  }
 0x82f   : > { %v4813_v37 = vld [vmem:[#allocation15 + $0x134] ss:$8 sps:$4 sm:$0xff]  }
 0x830   : > { %2774 = vmatpush1.bf16.msra.mxu0 %v4214_v56  ;;  %2815 = vmatpush1.bf16.msra.mxu1 %v4216_v57  ;;  %v1978_v56 = vld [vmem:[#allocation14 + $0x358] sm:$0xff] }
 0x831   : > { %2775 = vmatprep.subr.bf16.mxu0 %v4223_v58  ;;  %2816 = vmatprep.subr.bf16.mxu1 %v4225_v59  ;;  %v1982_v57 = vld [vmem:[#allocation14 + $0x378] sm:$0xff]  ;;  %v4270_v58 = vcombine.low %v1969_v44, %v1973_v45  ;;  %v4272_v59 = vcombine.low %v1970_v46, %v1974_v47  ;;  %v4828_v47 = vld [vmem:[#allocation15 + $0x64] ss:$8 sps:$4 sm:$0xff]  }
 0x832   : > { %v4281_v61 = vcombine.high %v1978_v56, %v1982_v57  ;;  %v4825_v44 = vld [vmem:[#allocation15 + $0x154] ss:$8 sps:$4 sm:$0xff]   ;;  %v4820_v45 = vld [vmem:[#allocation15 + $0x50] ss:$8 sps:$4 sm:$0xff]  }
 0x833   : > { %v4823_v46 = vld [vmem:[#allocation15 + $0x150] ss:$8 sps:$4 sm:$0xff]  }
 0x834   : > { %2776 = vmatpush1.bf16.msra.mxu0 %v4222_v0  ;;  %2817 = vmatpush1.bf16.msra.mxu1 %v4224_v2  ;;  %v1986_v0 = vld [vmem:[#allocation14 + $0x398] sm:$0xff] }
 0x835   : > { %2777 = vmatprep.subr.bf16.mxu0 %v4231_v4  ;;  %2818 = vmatprep.subr.bf16.mxu1 %v4233_v5  ;;  %v1990_v2 = vld [vmem:[#allocation14 + $0x3b8] sm:$0xff]  ;;  %v4278_v4 = vcombine.low %v1977_v54, %v1981_v55  ;;  %v4280_v5 = vcombine.low %v1978_v56, %v1982_v57  ;;  %v4840_v57 = vld [vmem:[#allocation15 + $0x84] ss:$8 sps:$4 sm:$0xff]  }
 0x836   : > { %v4289_v8 = vcombine.high %v1986_v0, %v1990_v2  ;;  %v4837_v54 = vld [vmem:[#allocation15 + $0x174] ss:$8 sps:$4 sm:$0xff]   ;;  %v4832_v55 = vld [vmem:[#allocation15 + $0x70] ss:$8 sps:$4 sm:$0xff]  }
 0x837   : > { %v4835_v56 = vld [vmem:[#allocation15 + $0x170] ss:$8 sps:$4 sm:$0xff]  }
 0x838   : > { %2778 = vmatpush1.bf16.msra.mxu0 %v4230_v13  ;;  %2819 = vmatpush1.bf16.msra.mxu1 %v4232_v51  ;;  %v1994_v13 = vld [vmem:[#allocation14 + $0x3d8] sm:$0xff] }
 0x839   : > { %2779 = vmatprep.subr.bf16.mxu0 %v4239_v52  ;;  %2820 = vmatprep.subr.bf16.mxu1 %v4241_v14  ;;  %v1998_v51 = vld [vmem:[#allocation14 + $0x3f8] sm:$0xff]  ;;  %v4286_v52 = vcombine.low %v1985_v62, %v1989_v63  ;;  %v4288_v14 = vcombine.low %v1986_v0, %v1990_v2  ;;  %v4852_v2 = vld [vmem:[#allocation15 + $0xa4] ss:$8 sps:$4 sm:$0xff]  }
 0x83a   : > { %v4297_v19 = vcombine.high %v1994_v13, %v1998_v51  ;;  %v4296_v21 = vcombine.low %v1994_v13, %v1998_v51  ;;  %v4849_v62 = vld [vmem:[#allocation15 + $0x194] ss:$8 sps:$4 sm:$0xff]   ;;  %v4844_v63 = vld [vmem:[#allocation15 + $0x90] ss:$8 sps:$4 sm:$0xff]   ;;  %v4864_v51 = vld [vmem:[#allocation15 + $0xc4] ss:$8 sps:$4 sm:$0xff]  }
 0x83b   : > { %v4847_v0 = vld [vmem:[#allocation15 + $0x190] ss:$8 sps:$4 sm:$0xff]  }
 0x83c   : > { %2780 = vmatpush1.bf16.msra.mxu0 %v4238_v22  ;;  %2821 = vmatpush1.bf16.msra.mxu1 %v4240_v23  ;;  %v4792_v22 = vld [vmem:[#allocation15 + $0x4] ss:$8 sps:$4 sm:$0xff]   ;;  %v4859_v13 = vld [vmem:[#allocation15 + $0x1b0] ss:$8 sps:$4 sm:$0xff]  }
 0x83d   : > { %2781 = vmatprep.subr.bf16.mxu0 %v4247_v24  ;;  %2822 = vmatprep.subr.bf16.mxu1 %v4249_v25  ;;  %v4795_v23 = vld [vmem:[#allocation15 + $0x104] ss:$8 sps:$4 sm:$0xff]   ;;  %v4790_v24 = vld [vmem:[#allocation15] ss:$8 sps:$4 sm:$0xff]  }
 0x83e   : > { %v4793_v25 = vld [vmem:[#allocation15 + $0x100] ss:$8 sps:$4 sm:$0xff]  }
 0x840   : > { %2782 = vmatpush1.bf16.msra.mxu0 %v4246_v32  ;;  %2823 = vmatpush1.bf16.msra.mxu1 %v4248_v33  ;;  %v4804_v32 = vld [vmem:[#allocation15 + $0x24] ss:$8 sps:$4 sm:$0xff]  }
 0x841   : > { %2783 = vmatprep.subr.bf16.mxu0 %v4255_v34  ;;  %2824 = vmatprep.subr.bf16.mxu1 %v4257_v35  ;;  %v4807_v33 = vld [vmem:[#allocation15 + $0x124] ss:$8 sps:$4 sm:$0xff]   ;;  %v4802_v34 = vld [vmem:[#allocation15 + $0x20] ss:$8 sps:$4 sm:$0xff]  }
 0x842   : > { %v4805_v35 = vld [vmem:[#allocation15 + $0x120] ss:$8 sps:$4 sm:$0xff]  }
 0x844   : > { %2784 = vmatpush1.bf16.msra.mxu0 %v4254_v40  ;;  %2825 = vmatpush1.bf16.msra.mxu1 %v4256_v41  ;;  %v4819_v40 = vld [vmem:[#allocation15 + $0x144] ss:$8 sps:$4 sm:$0xff]   ;;  %v4814_v41 = vld [vmem:[#allocation15 + $0x40] ss:$8 sps:$4 sm:$0xff]  }
 0x845   : > { %2785 = vmatprep.subr.bf16.mxu0 %v4263_v42  ;;  %2826 = vmatprep.subr.bf16.mxu1 %v4265_v43  ;;  %v4817_v42 = vld [vmem:[#allocation15 + $0x140] ss:$8 sps:$4 sm:$0xff]   ;;  %v4822_v43 = vld [vmem:[#allocation15 + $0x54] ss:$8 sps:$4 sm:$0xff]  }
 0x848   : > { %2786 = vmatpush1.bf16.msra.mxu0 %v4262_v48  ;;  %2827 = vmatpush1.bf16.msra.mxu1 %v4264_v49  ;;  %v4831_v48 = vld [vmem:[#allocation15 + $0x164] ss:$8 sps:$4 sm:$0xff]   ;;  %v4826_v49 = vld [vmem:[#allocation15 + $0x60] ss:$8 sps:$4 sm:$0xff]  }
 0x849   : > { %2787 = vmatprep.subr.bf16.mxu0 %v4271_v50  ;;  %2828 = vmatprep.subr.bf16.mxu1 %v4273_v53  ;;  %v4829_v50 = vld [vmem:[#allocation15 + $0x160] ss:$8 sps:$4 sm:$0xff]   ;;  %v4834_v53 = vld [vmem:[#allocation15 + $0x74] ss:$8 sps:$4 sm:$0xff]  }
 0x84c   : > { %2788 = vmatpush1.bf16.msra.mxu0 %v4270_v58  ;;  %2829 = vmatpush1.bf16.msra.mxu1 %v4272_v59  ;;  %v4843_v58 = vld [vmem:[#allocation15 + $0x184] ss:$8 sps:$4 sm:$0xff]   ;;  %v4838_v59 = vld [vmem:[#allocation15 + $0x80] ss:$8 sps:$4 sm:$0xff]  }
 0x84d   : > { %2789 = vmatprep.subr.bf16.mxu0 %v4279_v60  ;;  %2830 = vmatprep.subr.bf16.mxu1 %v4281_v61  ;;  %v4841_v60 = vld [vmem:[#allocation15 + $0x180] ss:$8 sps:$4 sm:$0xff]   ;;  %v4846_v61 = vld [vmem:[#allocation15 + $0x94] ss:$8 sps:$4 sm:$0xff]  }
 0x850   : > { %2790 = vmatpush1.bf16.msra.mxu0 %v4278_v4  ;;  %2831 = vmatpush1.bf16.msra.mxu1 %v4280_v5  ;;  %v4855_v4 = vld [vmem:[#allocation15 + $0x1a4] ss:$8 sps:$4 sm:$0xff]   ;;  %v4850_v5 = vld [vmem:[#allocation15 + $0xa0] ss:$8 sps:$4 sm:$0xff]  }
 0x851   : > { %2791 = vmatprep.subr.bf16.mxu0 %v4287_v6  ;;  %2832 = vmatprep.subr.bf16.mxu1 %v4289_v8  ;;  %v4853_v6 = vld [vmem:[#allocation15 + $0x1a0] ss:$8 sps:$4 sm:$0xff]   ;;  %v4858_v8 = vld [vmem:[#allocation15 + $0xb4] ss:$8 sps:$4 sm:$0xff]  }
 0x854   : > { %2792 = vmatpush1.bf16.msra.mxu0 %v4286_v52  ;;  %2833 = vmatpush1.bf16.msra.mxu1 %v4288_v14  ;;  %v4867_v52 = vld [vmem:[#allocation15 + $0x1c4] ss:$8 sps:$4 sm:$0xff]   ;;  %v4862_v14 = vld [vmem:[#allocation15 + $0xc0] ss:$8 sps:$4 sm:$0xff]  }
 0x855   : > { %2793 = vmatprep.subr.bf16.mxu0 %v4295_v18  ;;  %2834 = vmatprep.subr.bf16.mxu1 %v4297_v19  ;;  %v4865_v18 = vld [vmem:[#allocation15 + $0x1c0] ss:$8 sps:$4 sm:$0xff]   ;;  %v4870_v19 = vld [vmem:[#allocation15 + $0xd4] ss:$8 sps:$4 sm:$0xff]  }
 0x858   : > { %2794 = vmatpush1.bf16.msra.mxu0 %v4294_v20  ;;  %2835 = vmatpush1.bf16.msra.mxu1 %v4296_v21  ;;  %v4873_v20 = vld [vmem:[#allocation15 + $0x1d4] ss:$8 sps:$4 sm:$0xff]   ;;  %v4868_v21 = vld [vmem:[#allocation15 + $0xd0] ss:$8 sps:$4 sm:$0xff]  }
 0x859   : > { %3697 = vmatprep.subr.bf16.mxu0 %v4792_v22  ;;  %3738 = vmatprep.subr.bf16.mxu1 %v4795_v23  ;;  %v4871_v22 = vld [vmem:[#allocation15 + $0x1d0] ss:$8 sps:$4 sm:$0xff]   ;;  %v4876_v23 = vld [vmem:[#allocation15 + $0xe4] ss:$8 sps:$4 sm:$0xff]  }
 0x85b   : > { %2796 = vmatmul.mubr.bf16.vlgmr.msra.gmra.mrb[20].mxu0 %v5820_v12  ;;  %2837 = vmatmul.mubr.bf16.vlgmr.msra.gmra.mrb[20].mxu1 %v5820_v12  ;;  %v4811_v12 = vld [vmem:[#allocation15 + $0x130] ss:$8 sps:$4 sm:$0xff]  }
 0x85c   : > { %3698 = vmatpush1.bf16.msra.mxu0 %v4790_v24  ;;  %3739 = vmatpush1.bf16.msra.mxu1 %v4793_v25  ;;  %v4879_v24 = vld [vmem:[#allocation15 + $0x1e4] ss:$8 sps:$4 sm:$0xff]   ;;  %v4874_v25 = vld [vmem:[#allocation15 + $0xe0] ss:$8 sps:$4 sm:$0xff]  }
 0x85d   : > { %3699 = vmatprep.subr.bf16.mxu0 %v4798_v26  ;;  %3740 = vmatprep.subr.bf16.mxu1 %v4801_v29  ;;  %v4877_v26 = vld [vmem:[#allocation15 + $0x1e0] ss:$8 sps:$4 sm:$0xff]   ;;  %v4882_v29 = vld [vmem:[#allocation15 + $0xf4] ss:$8 sps:$4 sm:$0xff]  }
 0x860   : > { %3700 = vmatpush1.bf16.msra.mxu0 %v4796_v30  ;;  %3741 = vmatpush1.bf16.msra.mxu1 %v4799_v31  ;;  %v4885_v30 = vld [vmem:[#allocation15 + $0x1f4] ss:$8 sps:$4 sm:$0xff]   ;;  %v4880_v31 = vld [vmem:[#allocation15 + $0xf0] ss:$8 sps:$4 sm:$0xff]  }
 0x861   : > { %3701 = vmatprep.subr.bf16.mxu0 %v4804_v32  ;;  %3742 = vmatprep.subr.bf16.mxu1 %v4807_v33  ;;  %v4883_v32 = vld [vmem:[#allocation15 + $0x1f0] ss:$8 sps:$4 sm:$0xff]   ;;  %v4888_v33 = vld [vmem:[#allocation15 + $0x204] ss:$8 sps:$4 sm:$0xff]  }
 0x864   : > { %3702 = vmatpush1.bf16.msra.mxu0 %v4802_v34  ;;  %3743 = vmatpush1.bf16.msra.mxu1 %v4805_v35  ;;  %v4891_v34 = vld [vmem:[#allocation15 + $0x304] ss:$8 sps:$4 sm:$0xff]   ;;  %v5829_v35 = vld [vmem:[%s5973_s20] sm:$0xff]  ;;  %s5260_s20 = scalar_lea.vmem %s5259_s27, 512 }
 0x865   : > { %3703 = vmatprep.subr.bf16.mxu0 %v4810_v36  ;;  %3744 = vmatprep.subr.bf16.mxu1 %v4813_v37  ;;  %v2004_v36 = vrot.slane %v5829_v35, %v5745_v17  ;;  %v2012_v37 = vrot.slane %v5829_v35, %v739_v1  ;;  %p5262_p9 = scmp.lt.s32.totalorder %s5260_s20, %s5254_s1 }
 0x867   : > { %p5263_p6 = por %p5262_p9, %p5261_p3 }
 0x868   : > { %3704 = vmatpush1.bf16.msra.mxu0 %v4808_v38  ;;  %3745 = vmatpush1.bf16.msra.mxu1 %v4811_v12  ;;  %v2008_v38 = vrot.slane %v5829_v35, %v5742_v16  ;;  %v2016_v12 = vrot.slane %v5829_v35, %v743_v3 }
 0x869   : > { %3705 = vmatprep.subr.bf16.mxu0 %v4816_v39  ;;  %3746 = vmatprep.subr.bf16.mxu1 %v4819_v40  ;;  %p5264_p0 = pnand %p5263_p6, %p5257_p1 }
 0x86c   : > { %3706 = vmatpush1.bf16.msra.mxu0 %v4814_v41  ;;  %3747 = vmatpush1.bf16.msra.mxu1 %v4817_v42 }
 0x86d   : > { %3707 = vmatprep.subr.bf16.mxu0 %v4822_v43  ;;  %3748 = vmatprep.subr.bf16.mxu1 %v4825_v44 }
 0x870   : > { %3708 = vmatpush1.bf16.msra.mxu0 %v4820_v45  ;;  %3749 = vmatpush1.bf16.msra.mxu1 %v4823_v46 }
 0x871   : > { %3709 = vmatprep.subr.bf16.mxu0 %v4828_v47  ;;  %3750 = vmatprep.subr.bf16.mxu1 %v4831_v48 }
 0x874   : > { %3710 = vmatpush1.bf16.msra.mxu0 %v4826_v49  ;;  %3751 = vmatpush1.bf16.msra.mxu1 %v4829_v50 }
 0x875   : > { %3711 = vmatprep.subr.bf16.mxu0 %v4834_v53  ;;  %3752 = vmatprep.subr.bf16.mxu1 %v4837_v54 }
 0x878   : > { %3712 = vmatpush1.bf16.msra.mxu0 %v4832_v55  ;;  %3753 = vmatpush1.bf16.msra.mxu1 %v4835_v56 }
 0x879   : > { %3713 = vmatprep.subr.bf16.mxu0 %v4840_v57  ;;  %3754 = vmatprep.subr.bf16.mxu1 %v4843_v58 }
 0x87c   : > { %3714 = vmatpush1.bf16.msra.mxu0 %v4838_v59  ;;  %3755 = vmatpush1.bf16.msra.mxu1 %v4841_v60 }
 0x87d   : > { %3715 = vmatprep.subr.bf16.mxu0 %v4846_v61  ;;  %3756 = vmatprep.subr.bf16.mxu1 %v4849_v62 }
 0x880   : > { %3716 = vmatpush1.bf16.msra.mxu0 %v4844_v63  ;;  %3757 = vmatpush1.bf16.msra.mxu1 %v4847_v0 }
 0x881   : > { %3717 = vmatprep.subr.bf16.mxu0 %v4852_v2  ;;  %3758 = vmatprep.subr.bf16.mxu1 %v4855_v4 }
 0x884   : > { %3718 = vmatpush1.bf16.msra.mxu0 %v4850_v5  ;;  %3759 = vmatpush1.bf16.msra.mxu1 %v4853_v6 }
 0x885   : > { %3719 = vmatprep.subr.bf16.mxu0 %v4858_v8  ;;  %3760 = vmatprep.subr.bf16.mxu1 %v4861_v10 }
 0x888   : > { %3720 = vmatpush1.bf16.msra.mxu0 %v4856_v11  ;;  %3761 = vmatpush1.bf16.msra.mxu1 %v4859_v13 }
 0x889   : > { %3721 = vmatprep.subr.bf16.mxu0 %v4864_v51  ;;  %3762 = vmatprep.subr.bf16.mxu1 %v4867_v52 }
 0x88c   : > { %3722 = vmatpush1.bf16.msra.mxu0 %v4862_v14  ;;  %3763 = vmatpush1.bf16.msra.mxu1 %v4865_v18  ;;  %v4886_v18 = vld [vmem:[#allocation15 + $0x200] ss:$8 sps:$4 sm:$0xff]  }
 0x88d   : > { %3723 = vmatprep.subr.bf16.mxu0 %v4870_v19  ;;  %3764 = vmatprep.subr.bf16.mxu1 %v4873_v20 }
 0x890   : > { %3724 = vmatpush1.bf16.msra.mxu0 %v4868_v21  ;;  %3765 = vmatpush1.bf16.msra.mxu1 %v4871_v22  ;;  %v4889_v21 = vld [vmem:[#allocation15 + $0x300] ss:$8 sps:$4 sm:$0xff]   ;;  %v4894_v22 = vld [vmem:[#allocation15 + $0x214] ss:$8 sps:$4 sm:$0xff]  }
 0x891   : > { %3725 = vmatprep.subr.bf16.mxu0 %v4876_v23  ;;  %3766 = vmatprep.subr.bf16.mxu1 %v4879_v24  ;;  %v4897_v24 = vld [vmem:[#allocation15 + $0x314] ss:$8 sps:$4 sm:$0xff]  }
 0x894   : > { %3726 = vmatpush1.bf16.msra.mxu0 %v4874_v25  ;;  %3767 = vmatpush1.bf16.msra.mxu1 %v4877_v26  ;;  %v4892_v25 = vld [vmem:[#allocation15 + $0x210] ss:$8 sps:$4 sm:$0xff]  }
 0x895   : > { %3727 = vmatprep.subr.bf16.mxu0 %v4882_v29  ;;  %3768 = vmatprep.subr.bf16.mxu1 %v4885_v30  ;;  %v4895_v26 = vld [vmem:[#allocation15 + $0x310] ss:$8 sps:$4 sm:$0xff]   ;;  %v4900_v29 = vld [vmem:[#allocation15 + $0x224] ss:$8 sps:$4 sm:$0xff]  }
 0x896   : > { %v4903_v30 = vld [vmem:[#allocation15 + $0x324] ss:$8 sps:$4 sm:$0xff]  }
 0x898   : > { %3728 = vmatpush1.bf16.msra.mxu0 %v4880_v31  ;;  %3769 = vmatpush1.bf16.msra.mxu1 %v4883_v32  ;;  %v4898_v31 = vld [vmem:[#allocation15 + $0x220] ss:$8 sps:$4 sm:$0xff]  }
 0x899   : > { %3779 = vmatprep.subr.bf16.mxu0 %v4888_v33  ;;  %3820 = vmatprep.subr.bf16.mxu1 %v4891_v34  ;;  %v4901_v32 = vld [vmem:[#allocation15 + $0x320] ss:$8 sps:$4 sm:$0xff]   ;;  %v4906_v33 = vld [vmem:[#allocation15 + $0x234] ss:$8 sps:$4 sm:$0xff]  }
 0x89a   : > { %v4909_v34 = vld [vmem:[#allocation15 + $0x334] ss:$8 sps:$4 sm:$0xff]  }
 0x8ee   : > { %v2715_v39 = vpop.f32.mrb[16].mxu0  ;;  %v2756_v40 = vpop.f32.mrb[16].mxu1 }
 0x8ef   : > { %v2716_v41 = vadd.f32 %v2715_v39, %v2004_v36  ;;  %v2757_v42 = vadd.f32 %v2756_v40, %v2012_v37  ;;  %v2717_v43 = vpop.f32.mrb[17].mxu0  ;;  %v2758_v44 = vpop.f32.mrb[17].mxu1  ;;  %v4904_v36 = vld [vmem:[#allocation15 + $0x230] ss:$8 sps:$4 sm:$0xff]   ;;  %v4910_v39 = vld [vmem:[#allocation15 + $0x240] ss:$8 sps:$4 sm:$0xff]  }
 0x8f0   : > { %v2718_v45 = vadd.f32 %v2717_v43, %v2008_v38  ;;  %v2759_v46 = vadd.f32 %v2758_v44, %v2016_v12  ;;  %v2719_v47 = vpop.f32.mrb[18].mxu0  ;;  %v2760_v48 = vpop.f32.mrb[18].mxu1  ;;  %v4907_v37 = vld [vmem:[#allocation15 + $0x330] ss:$8 sps:$4 sm:$0xff]   ;;  %v4912_v38 = vld [vmem:[#allocation15 + $0x244] ss:$8 sps:$4 sm:$0xff]  }
 0x8f1   : > { %v4298_v49 = vmul.f32 -1.702, %v2716_v41  ;;  %v4300_v50 = vmul.f32 -1.702, %v2757_v42  ;;  %v2720_v1 = vpop.f32.mrb[19].mxu0  ;;  %v2761_v53 = vpop.f32.mrb[19].mxu1 }
 0x8f2   : > { %v4299_v54 = vmul.f32 -1.702, %v2718_v45  ;;  %v4301_v55 = vmul.f32 -1.702, %v2759_v46  ;;  %v4915_v12 = vld [vmem:[#allocation15 + $0x344] ss:$8 sps:$4 sm:$0xff]   ;;  %v2020_v53 = vrot.slane %v5829_v35, %v747_v27 }
 0x8f3   : > { %v2861_v56 = vmul.f32 1.442695, %v4298_v49  ;;  %v2865_v57 = vmul.f32 1.442695, %v4300_v50  ;;  %v4913_v40 = vld [vmem:[#allocation15 + $0x340] ss:$8 sps:$4 sm:$0xff]  }
 0x8f4   : > { %v2863_v58 = vmul.f32 1.442695, %v4299_v54  ;;  %v2867_v3 = vmul.f32 1.442695, %v4301_v55  ;;  %v4916_v43 = vld [vmem:[#allocation15 + $0x250] ss:$8 sps:$4 sm:$0xff]  }
 0x8f5   : > { %4994 = vpow2.f32 %v2861_v56  ;;  %v4919_v44 = vld [vmem:[#allocation15 + $0x350] ss:$8 sps:$4 sm:$0xff]   ;;  %v2027_v47 = vsub.s32 6, %v5739_v15  ;;  %v2031_v48 = vsub.s32 7, %v5739_v15  ;;  %v4922_v49 = vld [vmem:[#allocation15 + $0x260] ss:$8 sps:$4 sm:$0xff]   ;;  %v2024_v56 = vrot.slane %v5829_v35, %v751_v28 }
 0x8f6   : > { %4996 = vpow2.f32 %v2865_v57  ;;  %v4925_v50 = vld [vmem:[#allocation15 + $0x360] ss:$8 sps:$4 sm:$0xff]   ;;  %v4930_v1 = vld [vmem:[#allocation15 + $0x274] ss:$8 sps:$4 sm:$0xff]   ;;  %v4939_v15 = vld [vmem:[#allocation15 + $0x384] ss:$8 sps:$4 sm:$0xff]  }
 0x8f7   : > { %4998 = vpow2.f32 %v2863_v58  ;;  %v2028_v54 = vrot.slane %v5829_v35, %v2027_v47  ;;  %v4933_v55 = vld [vmem:[#allocation15 + $0x374] ss:$8 sps:$4 sm:$0xff]   ;;  %v2032_v57 = vrot.slane %v5829_v35, %v2031_v48  ;;  %v4928_v58 = vld [vmem:[#allocation15 + $0x270] ss:$8 sps:$4 sm:$0xff]  }
 0x8f8   : > { %5000 = vpow2.f32 %v2867_v3  ;;  %v4969_v48 = vld [vmem:[#allocation15 + $0x3d4] ss:$8 sps:$4 sm:$0xff]  }
 0x8ff   : > { %v4995_v59 = vpop.eup %4994 }
 0x900   : > { %v4997_v60 = vpop.eup %4996  ;;  %v2877_v61 = vadd.f32 1.0, %v4995_v59 }
 0x901   : > { %v4999_v62 = vpop.eup %4998  ;;  %v2879_v63 = vadd.f32 1.0, %v4997_v60  ;;  %v4931_v60 = vld [vmem:[#allocation15 + $0x370] ss:$8 sps:$4 sm:$0xff]  }
 0x902   : > { %v5001_v0 = vpop.eup %5000  ;;  %5002 = vrcp.f32 %v2877_v61  ;;  %v2878_v2 = vadd.f32 1.0, %v4999_v62  ;;  %v4936_v61 = vld [vmem:[#allocation15 + $0x284] ss:$8 sps:$4 sm:$0xff]  }
 0x903   : > { %5004 = vrcp.f32 %v2879_v63  ;;  %v2880_v4 = vadd.f32 1.0, %v5001_v0 }
 0x904   : > { %5006 = vrcp.f32 %v2878_v2 }
 0x905   : > { %5008 = vrcp.f32 %v2880_v4 }
 0x90c   : > { %v5003_v5 = vpop.eup %5002 }
 0x90d   : > { %v5005_v6 = vpop.eup %5004  ;;  %v2901_v10 = vmul.f32 %v5003_v5, %v2716_v41  ;;  %v4918_v41 = vld [vmem:[#allocation15 + $0x254] ss:$8 sps:$4 sm:$0xff]   ;;  %v4934_v5 = vld [vmem:[#allocation15 + $0x280] ss:$8 sps:$4 sm:$0xff]  }
 0x90e   : > { %v5007_v8 = vpop.eup %5006  ;;  %v2903_v13 = vmul.f32 %v5005_v6, %v2757_v42  ;;  %v4921_v42 = vld [vmem:[#allocation15 + $0x354] ss:$8 sps:$4 sm:$0xff]   ;;  %v4937_v6 = vld [vmem:[#allocation15 + $0x380] ss:$8 sps:$4 sm:$0xff]  }
 0x90f   : > { %v5009_v11 = vpop.eup %5008  ;;  %v2902_v51 = vmul.f32 %v5007_v8, %v2718_v45  ;;  %v2909_v19 = vpack.c.bf16 %v2901_v10, %v2901_v10  ;;  %v4924_v45 = vld [vmem:[#allocation15 + $0x264] ss:$8 sps:$4 sm:$0xff]  }
 0x910   : > { %v2904_v52 = vmul.f32 %v5009_v11, %v2759_v46  ;;  %v2911_v23 = vpack.c.bf16 %v2903_v13, %v2903_v13  ;;  %v4927_v46 = vld [vmem:[#allocation15 + $0x364] ss:$8 sps:$4 sm:$0xff]  }
 0x911   : > { %v2910_v14 = vpack.c.bf16 %v2902_v51, %v2902_v51 }
 0x912   : > { %v2912_v20 = vpack.c.bf16 %v2904_v52, %v2904_v52 }
 0x913   : > { %3729 = vmatprep.mubr.bf16.mxu0 %v2910_v14  ;;  %v4942_v14 = vld [vmem:[#allocation15 + $0x294] ss:$8 sps:$4 sm:$0xff]  }
 0x914   : > { %3770 = vmatprep.mubr.bf16.mxu1 %v2912_v20  ;;  %3730 = vmatmul.mubr.bf16.vlgmr.msra.gmra.mrb[24].mxu0 %v2909_v19  ;;  %v4945_v20 = vld [vmem:[#allocation15 + $0x394] ss:$8 sps:$4 sm:$0xff]  }
 0x915   : > { %3771 = vmatmul.mubr.bf16.vlgmr.msra.gmra.mrb[24].mxu1 %v2911_v23  ;;  %3780 = vmatpush1.bf16.msra.mxu0 %v4886_v18  ;;  %v4940_v23 = vld [vmem:[#allocation15 + $0x290] ss:$8 sps:$4 sm:$0xff]  }
 0x916   : > { %3821 = vmatpush1.bf16.msra.mxu1 %v4889_v21  ;;  %3781 = vmatprep.subr.bf16.mxu0 %v4894_v22 }
 0x917   : > { %3822 = vmatprep.subr.bf16.mxu1 %v4897_v24  ;;  %v4943_v24 = vld [vmem:[#allocation15 + $0x390] ss:$8 sps:$4 sm:$0xff]  }
 0x919   : > { %3782 = vmatpush1.bf16.msra.mxu0 %v4892_v25  ;;  %v4948_v25 = vld [vmem:[#allocation15 + $0x2a4] ss:$8 sps:$4 sm:$0xff]  }
 0x91a   : > { %3823 = vmatpush1.bf16.msra.mxu1 %v4895_v26  ;;  %3783 = vmatprep.subr.bf16.mxu0 %v4900_v29  ;;  %v4951_v26 = vld [vmem:[#allocation15 + $0x3a4] ss:$8 sps:$4 sm:$0xff]   ;;  %v4946_v29 = vld [vmem:[#allocation15 + $0x2a0] ss:$8 sps:$4 sm:$0xff]  }
 0x91b   : > { %3824 = vmatprep.subr.bf16.mxu1 %v4903_v30  ;;  %v4949_v30 = vld [vmem:[#allocation15 + $0x3a0] ss:$8 sps:$4 sm:$0xff]  }
 0x91d   : > { %3784 = vmatpush1.bf16.msra.mxu0 %v4898_v31  ;;  %v4954_v31 = vld [vmem:[#allocation15 + $0x2b4] ss:$8 sps:$4 sm:$0xff]  }
 0x91e   : > { %3825 = vmatpush1.bf16.msra.mxu1 %v4901_v32  ;;  %3785 = vmatprep.subr.bf16.mxu0 %v4906_v33  ;;  %v4957_v32 = vld [vmem:[#allocation15 + $0x3b4] ss:$8 sps:$4 sm:$0xff]   ;;  %v4952_v33 = vld [vmem:[#allocation15 + $0x2b0] ss:$8 sps:$4 sm:$0xff]  }
 0x91f   : > { %3826 = vmatprep.subr.bf16.mxu1 %v4909_v34  ;;  %v4955_v34 = vld [vmem:[#allocation15 + $0x3b0] ss:$8 sps:$4 sm:$0xff]  }
 0x921   : > { %3786 = vmatpush1.bf16.msra.mxu0 %v4904_v36  ;;  %v4960_v36 = vld [vmem:[#allocation15 + $0x2c4] ss:$8 sps:$4 sm:$0xff]  }
 0x922   : > { %3827 = vmatpush1.bf16.msra.mxu1 %v4907_v37  ;;  %3787 = vmatprep.subr.bf16.mxu0 %v4912_v38  ;;  %v4963_v38 = vld [vmem:[#allocation15 + $0x3c4] ss:$8 sps:$4 sm:$0xff]  }
 0x923   : > { %3828 = vmatprep.subr.bf16.mxu1 %v4915_v12 }
 0x925   : > { %3788 = vmatpush1.bf16.msra.mxu0 %v4910_v39 }
 0x926   : > { %3829 = vmatpush1.bf16.msra.mxu1 %v4913_v40  ;;  %3789 = vmatprep.subr.bf16.mxu0 %v4918_v41 }
 0x927   : > { %3830 = vmatprep.subr.bf16.mxu1 %v4921_v42  ;;  %v4958_v42 = vld [vmem:[#allocation15 + $0x2c0] ss:$8 sps:$4 sm:$0xff]  }
 0x929   : > { %3790 = vmatpush1.bf16.msra.mxu0 %v4916_v43 }
 0x92a   : > { %3831 = vmatpush1.bf16.msra.mxu1 %v4919_v44  ;;  %3791 = vmatprep.subr.bf16.mxu0 %v4924_v45  ;;  %v4961_v45 = vld [vmem:[#allocation15 + $0x3c0] ss:$8 sps:$4 sm:$0xff]  }
 0x92b   : > { %3832 = vmatprep.subr.bf16.mxu1 %v4927_v46  ;;  %v4966_v46 = vld [vmem:[#allocation15 + $0x2d4] ss:$8 sps:$4 sm:$0xff]  }
 0x92d   : > { %3792 = vmatpush1.bf16.msra.mxu0 %v4922_v49  ;;  %v4964_v49 = vld [vmem:[#allocation15 + $0x2d0] ss:$8 sps:$4 sm:$0xff]  }
 0x92e   : > { %3833 = vmatpush1.bf16.msra.mxu1 %v4925_v50  ;;  %v2797_v3 = vpop.f32.mrb[20].mxu0  ;;  %v2838_v59 = vpop.f32.mrb[20].mxu1  ;;  %3793 = vmatprep.subr.bf16.mxu0 %v4930_v1  ;;  %v4967_v50 = vld [vmem:[#allocation15 + $0x3d0] ss:$8 sps:$4 sm:$0xff]   ;;  %v4972_v1 = vld [vmem:[#allocation15 + $0x2e4] ss:$8 sps:$4 sm:$0xff]  }
 0x92f   : > { %v5851_v62 = vadd.f32 %v2797_v3, %v2020_v53  ;;  %v5853_v27 = vadd.f32 %v2838_v59, %v2028_v54  ;;  %v2799_v63 = vpop.f32.mrb[21].mxu0  ;;  %v2840_v0 = vpop.f32.mrb[21].mxu1  ;;  %3834 = vmatprep.subr.bf16.mxu1 %v4933_v55  ;;  %v4975_v53 = vld [vmem:[#allocation15 + $0x3e4] ss:$8 sps:$4 sm:$0xff]   ;;  %v4970_v54 = vld [vmem:[#allocation15 + $0x2e0] ss:$8 sps:$4 sm:$0xff]  }
 0x930   : > { %v5855_v2 = vadd.f32 %v2799_v63, %v2024_v56  ;;  %v5857_v28 = vadd.f32 %v2840_v0, %v2032_v57  ;;  %v2801_v35 = vpop.f32.mrb[22].mxu0  ;;  %v2842_v4 = vpop.f32.mrb[22].mxu1  ;;  %v4973_v55 = vld [vmem:[#allocation15 + $0x3e0] ss:$8 sps:$4 sm:$0xff]   ;;  %v4978_v56 = vld [vmem:[#allocation15 + $0x2f4] ss:$8 sps:$4 sm:$0xff]  }
 0x931   : > { %v4302_v8 = vmul.f32 -1.702, %v5851_v62  ;;  %v4304_v10 = vmul.f32 -1.702, %v5853_v27  ;;  %3794 = vmatpush1.bf16.msra.mxu0 %v4928_v58  ;;  %v2802_v11 = vpop.f32.mrb[23].mxu0  ;;  %v2843_v13 = vpop.f32.mrb[23].mxu1 }
 0x932   : > { %v4303_v51 = vmul.f32 -1.702, %v5855_v2  ;;  %v4305_v52 = vmul.f32 -1.702, %v5857_v28  ;;  %3835 = vmatpush1.bf16.msra.mxu1 %v4931_v60  ;;  %3795 = vmatprep.subr.bf16.mxu0 %v4936_v61  ;;  %v4981_v57 = vld [vmem:[#allocation15 + $0x3f4] ss:$8 sps:$4 sm:$0xff]  }
 0x933   : > { %v2869_v18 = vmul.f32 1.442695, %v4302_v8  ;;  %v2873_v19 = vmul.f32 1.442695, %v4304_v10  ;;  %3836 = vmatprep.subr.bf16.mxu1 %v4939_v15  ;;  %v4976_v59 = vld [vmem:[#allocation15 + $0x2f0] ss:$8 sps:$4 sm:$0xff]  }
 0x934   : > { %v2871_v21 = vmul.f32 1.442695, %v4303_v51  ;;  %v2875_v22 = vmul.f32 1.442695, %v4305_v52  ;;  %v4979_v63 = vld [vmem:[#allocation15 + $0x3f0] ss:$8 sps:$4 sm:$0xff]  }
 0x935   : > { %5010 = vpow2.f32 %v2869_v18  ;;  %3796 = vmatpush1.bf16.msra.mxu0 %v4934_v5 }
 0x936   : > { %5012 = vpow2.f32 %v2873_v19  ;;  %3837 = vmatpush1.bf16.msra.mxu1 %v4937_v6  ;;  %3797 = vmatprep.subr.bf16.mxu0 %v4942_v14 }
 0x937   : > { %5014 = vpow2.f32 %v2871_v21  ;;  %3838 = vmatprep.subr.bf16.mxu1 %v4945_v20 }
 0x938   : > { %5016 = vpow2.f32 %v2875_v22 }
 0x939   : > { %3798 = vmatpush1.bf16.msra.mxu0 %v4940_v23 }
 0x93a   : > { %3839 = vmatpush1.bf16.msra.mxu1 %v4943_v24  ;;  %3799 = vmatprep.subr.bf16.mxu0 %v4948_v25 }
 0x93b   : > { %3840 = vmatprep.subr.bf16.mxu1 %v4951_v26 }
 0x93d   : > { %3800 = vmatpush1.bf16.msra.mxu0 %v4946_v29 }
 0x93e   : > { %3841 = vmatpush1.bf16.msra.mxu1 %v4949_v30  ;;  %3801 = vmatprep.subr.bf16.mxu0 %v4954_v31 }
 0x93f   : > { %v5011_v37 = vpop.eup %5010  ;;  %3842 = vmatprep.subr.bf16.mxu1 %v4957_v32 }
 0x940   : > { %v5013_v12 = vpop.eup %5012  ;;  %v2881_v39 = vadd.f32 1.0, %v5011_v37 }
 0x941   : > { %v5015_v40 = vpop.eup %5014  ;;  %v2883_v41 = vadd.f32 1.0, %v5013_v12  ;;  %3802 = vmatpush1.bf16.msra.mxu0 %v4952_v33 }
 0x942   : > { %v5017_v43 = vpop.eup %5016  ;;  %5018 = vrcp.f32 %v2881_v39  ;;  %v2882_v44 = vadd.f32 1.0, %v5015_v40  ;;  %3843 = vmatpush1.bf16.msra.mxu1 %v4955_v34  ;;  %3803 = vmatprep.subr.bf16.mxu0 %v4960_v36 }
 0x943   : > { %5020 = vrcp.f32 %v2883_v41  ;;  %v2884_v47 = vadd.f32 1.0, %v5017_v43  ;;  %3844 = vmatprep.subr.bf16.mxu1 %v4963_v38 }
 0x944   : > { %5022 = vrcp.f32 %v2882_v44 }
 0x945   : > { %5024 = vrcp.f32 %v2884_v47  ;;  %3804 = vmatpush1.bf16.msra.mxu0 %v4958_v42 }
 0x946   : > { %3845 = vmatpush1.bf16.msra.mxu1 %v4961_v45  ;;  %3805 = vmatprep.subr.bf16.mxu0 %v4966_v46 }
 0x947   : > { %3846 = vmatprep.subr.bf16.mxu1 %v4969_v48 }
 0x949   : > { %3806 = vmatpush1.bf16.msra.mxu0 %v4964_v49 }
 0x94a   : > { %3847 = vmatpush1.bf16.msra.mxu1 %v4967_v50  ;;  %3807 = vmatprep.subr.bf16.mxu0 %v4972_v1 }
 0x94b   : > { %3848 = vmatprep.subr.bf16.mxu1 %v4975_v53 }
 0x94c   : > { %v5019_v58 = vpop.eup %5018 }
 0x94d   : > { %v5021_v3 = vpop.eup %5020  ;;  %3808 = vmatpush1.bf16.msra.mxu0 %v4970_v54  ;;  %v2905_v61 = vmul.f32 %v5019_v58, %v5851_v62  ;;  %v3045_v62 = vld [vmem:[%s5974_s7] sm:$0x3] }
 0x94e   : > { %v5023_v60 = vpop.eup %5022  ;;  %3849 = vmatpush1.bf16.msra.mxu1 %v4973_v55  ;;  %3809 = vmatprep.subr.bf16.mxu0 %v4978_v56  ;;  %v2907_v15 = vmul.f32 %v5021_v3, %v5853_v27  ;;  %v3050_v27 = vrot.slane %v3045_v62, %v5745_v17 }
 0x94f   : > { %v5025_v0 = vpop.eup %5024  ;;  %v2906_v35 = vmul.f32 %v5023_v60, %v5855_v2  ;;  %3850 = vmatprep.subr.bf16.mxu1 %v4981_v57  ;;  %v2913_v6 = vpack.c.bf16 %v2905_v61, %v2905_v61  ;;  %v3054_v2 = vrot.slane %v3045_v62, %v5742_v16 }
 0x950   : > { %v2908_v4 = vmul.f32 %v5025_v0, %v5857_v28  ;;  %v2915_v10 = vpack.c.bf16 %v2907_v15, %v2907_v15 }
 0x951   : > { %v2914_v5 = vpack.c.bf16 %v2906_v35, %v2906_v35  ;;  %3810 = vmatpush1.bf16.msra.mxu0 %v4976_v59 }
 0x952   : > { %v2916_v8 = vpack.c.bf16 %v2908_v4, %v2908_v4  ;;  %3851 = vmatpush1.bf16.msra.mxu1 %v4979_v63 }
 0x953   : > { %3811 = vmatprep.mubr.bf16.mxu0 %v2914_v5 }
 0x954   : > { %3852 = vmatprep.mubr.bf16.mxu1 %v2916_v8  ;;  %3812 = vmatmul.mubr.bf16.vlgmr.msra.gmra.mrb[28].mxu0 %v2913_v6 }
 0x955   : > { %3853 = vmatmul.mubr.bf16.vlgmr.msra.gmra.mrb[28].mxu1 %v2915_v10 }
 0x9e7   : > { %v3731_v11 = vpop.f32.mrb[24].mxu0 }
 0x9e8   : > { %v3732_v28 = vadd.f32 %v3731_v11, %v3050_v27  ;;  %v3772_v13 = vpop.f32.mrb[24].mxu1  ;;  %v3733_v51 = vpop.f32.mrb[25].mxu0 }
 0x9e9   : > { %v3734_v52 = vadd.f32 %v3733_v51, %v3054_v2  ;;  %v3774_v14 = vpop.f32.mrb[25].mxu1  ;;  %v3735_v18 = vpop.f32.mrb[26].mxu0 }
 0x9ea   : > { %v3773_v19 = vadd.f32 %v3772_v13, %v3732_v28  ;;  %v3776_v20 = vpop.f32.mrb[26].mxu1  ;;  %v3736_v21 = vpop.f32.mrb[27].mxu0 }
 0x9eb   : > { %v3775_v22 = vadd.f32 %v3774_v14, %v3734_v52  ;;  %v3777_v23 = vpop.f32.mrb[27].mxu1 }
 0xa27   : > { %v3813_v24 = vpop.f32.mrb[28].mxu0 }
 0xa28   : > { %v3814_v25 = vadd.f32 %v3813_v24, %v3773_v19  ;;  %v3854_v26 = vpop.f32.mrb[28].mxu1  ;;  %v3815_v17 = vpop.f32.mrb[29].mxu0 }
 0xa29   : > { %v3816_v29 = vadd.f32 %v3815_v17, %v3775_v22  ;;  %v3856_v16 = vpop.f32.mrb[29].mxu1  ;;  %v3817_v30 = vpop.f32.mrb[30].mxu0 }
 0xa2a   : > { %v3855_v31 = vadd.f32 %v3854_v26, %v3814_v25  ;;  %v3858_v32 = vpop.f32.mrb[30].mxu1  ;;  %v3818_v33 = vpop.f32.mrb[31].mxu0 }
 0xa2b   : > { %v3857_v34 = vadd.f32 %v3856_v16, %v3816_v29  ;;  %v3859_v36 = vpop.f32.mrb[31].mxu1 }
 0xa2c   : > { %v3861_v37 = vadd.f32 %v3855_v31, %v5792_v7 }
 0xa2d   : > { %v3862_v38 = vadd.f32 %v3857_v34, %v5794_v9 }
 0xa2e   : > { %3863 = vst [vmem:[%s579_s22] sm:$0xff] %v3861_v37 }
 0xa2f   : > { %3864 = vst [vmem:[%s579_s22 + $0x8] sm:$0xff] %v3862_v38 }
 0xa30   : > { %5267 = shalt.err (!%p5264_p0)
}
 0xa31   : > { %s5268_s25 = scalar_lea.hbm %s5880_s24, 256  ;;  %s5272_s7 = scalar_lea.hbm %s5975_s17, 512 }
 0xa32   : > { %p5269_p2 = scmp.ne.s32.totalorder %s5880_s24, %s5268_s25  ;;  %p5273_p12 = scmp.lt.u32.totalorder %s5880_s24, %s5975_s17 }
 0xa33   : > { %p5274_p11 = scmp.lt.u32.totalorder %s5272_s7, %s5268_s25  ;;  %p5276_p5 = scmp.lt.u32.totalorder %s5268_s25, %s5880_s24 }
 0xa34   : > { %p5270_p8 = pnand %p5269_p2, %p5976_p7 }
 0xa35   : > { %p5275_p13 = por %p5274_p11, %p5273_p12 }
 0xa36   : > { %p5271_p10 = pneg %p5270_p8 }
 0xa37   : > { %p5277_p4 = por %p5276_p5, %p5275_p13 }
 0xa39   : > { %p5278_p1 = pnand %p5277_p4, %p5271_p10 }
 0xa3b   : > { %5281 = shalt.err (!%p5278_p1)
}
 0xa3c   : > { %4503 = dma.vmem_to_hbm [thread:$0]  (%p5976_p7), %s5882_s28, 256, %s5880_s24, %s3866_s19  }
 0xa3d PF: > { %s3892_s9 = sand.u32 1, %s5324_s29   ;;  %p5977_p3 = scmp.ne.s32.totalorder %s5959_s8, 0 }
 0xa3e   : > { %p5978_p9 = scmp.ge.s32.totalorder %s5336_s16, 2  ;;  %s3893_s23 = scalar_lea.sflag [#allocation5], %s3892_s9 }
 0xa40   : > { %p4532_p6 = pnand %p5978_p9, %p5977_p3 }
 0xa42   : > { %5319 = dma.done.wait (!%p4532_p6), %s3893_s23, 256  }
 0xa43   : > { %5321 = vsyncadd (!%p4532_p6), %s3893_s23, 4294967040  ;;  %p31_p0 = scmp.ge.s32.totalorder %s5623_s21, 4   ;;  %s5979_s29 = smov %s5328_s30 }
 0xa44   : > { %s5980_s30 = smov %s5332_s15  ;;  %s5981_s15 = smov %s5635_s3 }
 0xa45   : > { %s5982_s16 = smov %s5623_s21  ;;  %33 = sbr.rel (!%p31_p0) target bundleno = 18 (0x12), region = 149 }
 0xa4c   :  { %3898 = vsyncpa [#allocation4], 1 }
 0xa4d   :  { %3900 = vsyncpa [#allocation4 + $0x1], 1 }
 0xa4e   :  { %3901 = vsyncpa [#allocation7], 1 }
 0xa4f   :  { %3902 = vsyncpa [#allocation10], 1 }
 0xa50   :  { %3903 = vsyncpa [#allocation13], 1 }
 0xa51   :  { %3904 = vsyncpa [#allocation16], 1 }
 0xa52   :  { %3905 = vsyncpa [#allocation5], 1 }
 0xa53   :  { %3907 = vsyncpa [#allocation5 + $0x1], 1 }

</bundles_post_ra>
